<compile_context>
chip_gen: v7x
topology: tpu7x:2x2x1
jax: 0.10.0
libtpu: 0.0.40
codegen_flags: <defaults>
</compile_context>

<pallas_src>
import jax
import jax.numpy as jnp
from jax import lax
from jax.experimental import pallas as pl
from jax.experimental.pallas import tpu as pltpu


def encoder_kernel(src_ref, w_in_ref, w_hh_ref, b_gi_ref, b_hn_ref,
                   fcw_ref, fcb_ref,
                   out_ref, hid_ref,
                   gi_ref):
    """Fused bidirectional-GRU + fc + tanh.

    src_ref : (L*Bp, E)            flattened, batch padded to Bp (mult of 8)
    w_in_ref: (6, E, H)            per-gate input weights  [f_r,f_z,f_n,b_r,b_z,b_n]
    w_hh_ref: (6, H, H)            per-gate recurrent weights (same order)
    b_gi_ref: (6, 1, H)            folded biases added to GI (b_ih + b_hh for r,z; b_ih for n)
    b_hn_ref: (2, 1, H)            b_hh_n per direction (stays inside r*(...))
    fcw_ref : (2, H, D)            fc weight split into fwd/bwd halves (transposed)
    fcb_ref : (1, D)
    out_ref : (L, Bp, 2H)          fwd half in [:, :, :H], bwd half in [:, :, H:]
    hid_ref : (Bp, D)
    gi_ref  : (6, L*Bp, H) scratch precomputed input-gate activations
    """
    L, Bp, twoH = out_ref.shape
    H = twoH // 2

    # ---- Hoisted input projection: one pass over src, 6 big MXU matmuls with
    # biases folded in.  Nothing input-dependent remains in the serial loop.
    src_flat = src_ref[...]
    for g in range(6):
        gi_ref[g] = (jnp.dot(src_flat, w_in_ref[g],
                             preferred_element_type=jnp.float32)
                     + b_gi_ref[g])

    # Hoist recurrent weight / bias loads out of the time loop (JAX does not
    # CSE these if left inside the body).
    wh = [w_hh_ref[g] for g in range(6)]
    bhn_f = b_hn_ref[0]
    bhn_b = b_hn_ref[1]

    h0 = jnp.zeros((Bp, H), jnp.float32)

    def step(t, carry):
        h_f, h_b = carry
        tb = L - 1 - t
        rf_row = pl.multiple_of(t * Bp, Bp)
        rb_row = pl.multiple_of(tb * Bp, Bp)

        # ---- forward direction, time t
        gi_r = gi_ref[0, pl.ds(rf_row, Bp), :]
        gi_z = gi_ref[1, pl.ds(rf_row, Bp), :]
        gi_n = gi_ref[2, pl.ds(rf_row, Bp), :]
        r_f = jax.nn.sigmoid(
            gi_r + jnp.dot(h_f, wh[0], preferred_element_type=jnp.float32))
        z_f = jax.nn.sigmoid(
            gi_z + jnp.dot(h_f, wh[1], preferred_element_type=jnp.float32))
        n_f = jnp.tanh(
            gi_n + r_f * (jnp.dot(h_f, wh[2],
                                  preferred_element_type=jnp.float32) + bhn_f))
        h_f_new = (1.0 - z_f) * n_f + z_f * h_f

        # ---- backward direction, time tb = L-1-t (independent of fwd -> ILP)
        gi_rb = gi_ref[3, pl.ds(rb_row, Bp), :]
        gi_zb = gi_ref[4, pl.ds(rb_row, Bp), :]
        gi_nb = gi_ref[5, pl.ds(rb_row, Bp), :]
        r_b = jax.nn.sigmoid(
            gi_rb + jnp.dot(h_b, wh[3], preferred_element_type=jnp.float32))
        z_b = jax.nn.sigmoid(
            gi_zb + jnp.dot(h_b, wh[4], preferred_element_type=jnp.float32))
        n_b = jnp.tanh(
            gi_nb + r_b * (jnp.dot(h_b, wh[5],
                                   preferred_element_type=jnp.float32) + bhn_b))
        h_b_new = (1.0 - z_b) * n_b + z_b * h_b

        # Direct writes into the fused (L, Bp, 2H) output: no post-kernel concat.
        out_ref[t, :, 0:H] = h_f_new
        out_ref[tb, :, H:2 * H] = h_b_new
        return (h_f_new, h_b_new)

    h_f_last, h_b_last = lax.fori_loop(0, L, step, (h0, h0), unroll=True)

    # hidden = tanh(h_fwd @ W_top + h_bwd @ W_bot + b)   (no in-kernel concat)
    hid_ref[...] = jnp.tanh(
        jnp.dot(h_f_last, fcw_ref[0], preferred_element_type=jnp.float32)
        + jnp.dot(h_b_last, fcw_ref[1], preferred_element_type=jnp.float32)
        + fcb_ref[...])


@jax.jit
def encoder_forward(src, params):
    """src: (L, B, emb_dim) float32. Returns (outputs (L,B,2H), hidden (B,D))."""
    L, B, E = src.shape
    H = params["w_hh_f"].shape[1]          # enc_hid_dim
    D = params["fc_w"].shape[0]            # dec_hid_dim

    # --- Parameter re-layout (per-gate, pre-transposed, biases folded).
    def split3_t(w):                        # (3H, X) -> [ (X, H) x3 ]  gate order r,z,n
        return [w[g * H:(g + 1) * H, :].T for g in range(3)]

    w_in = jnp.stack(split3_t(params["w_ih_f"]) + split3_t(params["w_ih_b"]))   # (6,E,H)
    w_hh = jnp.stack(split3_t(params["w_hh_f"]) + split3_t(params["w_hh_b"]))   # (6,H,H)

    bih_f = params["b_ih_f"].reshape(3, 1, H)
    bhh_f = params["b_hh_f"].reshape(3, 1, H)
    bih_b = params["b_ih_b"].reshape(3, 1, H)
    bhh_b = params["b_hh_b"].reshape(3, 1, H)
    gate_mask = jnp.array([1.0, 1.0, 0.0], jnp.float32).reshape(3, 1, 1)
    b_gi = jnp.concatenate([bih_f + gate_mask * bhh_f,
                            bih_b + gate_mask * bhh_b], axis=0)                 # (6,1,H)
    b_hn = jnp.stack([bhh_f[2], bhh_b[2]], axis=0)                              # (2,1,H)

    fcw = jnp.stack([params["fc_w"][:, :H].T, params["fc_w"][:, H:].T])         # (2,H,D)
    fcb = params["fc_b"].reshape(1, D)

    # --- Pad batch to a multiple of 8 (sublane alignment + MXU rows).
    Bp = ((B + 7) // 8) * 8
    src_p = src if Bp == B else jnp.pad(src, ((0, 0), (0, Bp - B), (0, 0)))
    src_flat = src_p.reshape(L * Bp, E)

    vmem = pl.BlockSpec(memory_space=pltpu.MemorySpace.VMEM)

    out, hid = pl.pallas_call(
        encoder_kernel,
        out_shape=(
            jax.ShapeDtypeStruct((L, Bp, 2 * H), jnp.float32),
            jax.ShapeDtypeStruct((Bp, D), jnp.float32),
        ),
        in_specs=[vmem] * 7,
        out_specs=(vmem, vmem),
        scratch_shapes=[pltpu.VMEM((6, L * Bp, H), jnp.float32)],
        compiler_params=pltpu.CompilerParams(
            vmem_limit_bytes=32 * 1024 * 1024),
    )(src_flat, w_in, w_hh, b_gi, b_hn, fcw, fcb)

    return out[:, :B, :], hid[:B, :]


def encoder_reference(src, params):
    """Pure-JAX reference implementing PyTorch bidirectional-GRU semantics."""
    L, B, E = src.shape
    H = params["w_hh_f"].shape[1]

    def cell(x, h, wih, whh, bih, bhh):
        gi = x @ wih.T + bih
        gh = h @ whh.T + bhh
        r = jax.nn.sigmoid(gi[:, :H] + gh[:, :H])
        z = jax.nn.sigmoid(gi[:, H:2 * H] + gh[:, H:2 * H])
        n = jnp.tanh(gi[:, 2 * H:] + r * gh[:, 2 * H:])
        return (1.0 - z) * n + z * h

    h_f = jnp.zeros((B, H), jnp.float32)
    h_b = jnp.zeros((B, H), jnp.float32)
    outs_f, outs_b = [], [None] * L
    for t in range(L):
        h_f = cell(src[t], h_f, params["w_ih_f"], params["w_hh_f"],
                   params["b_ih_f"], params["b_hh_f"])
        outs_f.append(h_f)
    for t in range(L - 1, -1, -1):
        h_b = cell(src[t], h_b, params["w_ih_b"], params["w_hh_b"],
                   params["b_ih_b"], params["b_hh_b"])
        outs_b[t] = h_b
    outputs = jnp.concatenate([jnp.stack(outs_f), jnp.stack(outs_b)], axis=-1)
    hidden = jnp.tanh(jnp.concatenate([h_f, h_b], axis=1)
                      @ params["fc_w"].T + params["fc_b"])
    return outputs, hidden


def init_params(key, emb_dim, enc_hid_dim, dec_hid_dim):
    """Deterministic init mirroring PyTorch shapes (uniform(-k, k))."""
    H = enc_hid_dim
    k_gru = 1.0 / jnp.sqrt(H)
    k_fc = 1.0 / jnp.sqrt(2 * H)
    keys = jax.random.split(key, 10)

    def u(k, shape, bound):
        return jax.random.uniform(k, shape, jnp.float32, -bound, bound)

    return {
        "w_ih_f": u(keys[0], (3 * H, emb_dim), k_gru),
        "w_hh_f": u(keys[1], (3 * H, H), k_gru),
        "b_ih_f": u(keys[2], (3 * H,), k_gru),
        "b_hh_f": u(keys[3], (3 * H,), k_gru),
        "w_ih_b": u(keys[4], (3 * H, emb_dim), k_gru),
        "w_hh_b": u(keys[5], (3 * H, H), k_gru),
        "b_ih_b": u(keys[6], (3 * H,), k_gru),
        "b_hh_b": u(keys[7], (3 * H,), k_gru),
        "fc_w": u(keys[8], (dec_hid_dim, 2 * H), k_fc),
        "fc_b": u(keys[9], (dec_hid_dim,), k_fc),
    }


if __name__ == "__main__":
    # Small shapes consistent with the module's forward:
    #   src: src_len x batch x emb_dim
    L, B, EMB = 8, 2, 32
    ENC_HID, DEC_HID = 32, 32

    key = jax.random.PRNGKey(0)
    k_src, k_par = jax.random.split(key)
    src = jax.random.normal(k_src, (L, B, EMB), jnp.float32)
    params = init_params(k_par, EMB, ENC_HID, DEC_HID)

    outputs, hidden = encoder_forward(src, params)
    jax.block_until_ready((outputs, hidden))

    assert outputs.shape == (L, B, 2 * ENC_HID)
    assert hidden.shape == (B, DEC_HID)

    # Numerical check against a pure-JAX PyTorch-semantics reference.
    ref_out, ref_hid = encoder_reference(src, params)
    assert float(jnp.max(jnp.abs(outputs - ref_out))) < 2e-3
    assert float(jnp.max(jnp.abs(hidden - ref_hid))) < 2e-3

    print("KERNEL_OK")
</pallas_src>

<mosaic_0001>
module attributes {stable_mosaic.version = 11 : i64} {
  func.func @encoder_kernel(%arg0: memref<64x32xf32, #tpu.memory_space<vmem>>, %arg1: memref<6x32x32xf32, #tpu.memory_space<vmem>>, %arg2: memref<6x32x32xf32, #tpu.memory_space<vmem>>, %arg3: memref<6x1x32xf32, #tpu.memory_space<vmem>>, %arg4: memref<2x1x32xf32, #tpu.memory_space<vmem>>, %arg5: memref<2x32x32xf32, #tpu.memory_space<vmem>>, %arg6: memref<1x32xf32, #tpu.memory_space<vmem>>, %arg7: memref<8x8x64xf32, #tpu.memory_space<vmem>>, %arg8: memref<8x32xf32, #tpu.memory_space<vmem>>, %arg9: memref<6x64x32xf32, #tpu.memory_space<vmem>>) attributes {dimension_semantics = [], scalar_prefetch = 0 : i64, scratch_operands = 1 : i64, tpu.core_type = #tpu.core_type<tc>} {
    %c0 = arith.constant 0 : index
    %c0_0 = arith.constant 0 : index
    %0 = vector.load %arg0[%c0, %c0_0] : memref<64x32xf32, #tpu.memory_space<vmem>>, vector<64x32xf32>
    %c0_1 = arith.constant 0 : index
    %c0_2 = arith.constant 0 : index
    %c0_3 = arith.constant 0 : index
    %1 = vector.load %arg1[%c0_1, %c0_2, %c0_3] : memref<6x32x32xf32, #tpu.memory_space<vmem>>, vector<1x32x32xf32>
    %2 = vector.shape_cast %1 : vector<1x32x32xf32> to vector<32x32xf32>
    %cst = arith.constant dense<0.000000e+00> : vector<64x32xf32>
    %3 = tpu.matmul %0, %2, %cst {dimension_numbers = #tpu.dot_dimension_numbers<[1], [0], [0], [1], [0, 0, 1, 1], [], []>} : vector<64x32xf32>, vector<32x32xf32>, vector<64x32xf32> -> vector<64x32xf32>
    %c0_4 = arith.constant 0 : index
    %c0_5 = arith.constant 0 : index
    %c0_6 = arith.constant 0 : index
    %4 = vector.load %arg3[%c0_4, %c0_5, %c0_6] : memref<6x1x32xf32, #tpu.memory_space<vmem>>, vector<1x1x32xf32>
    %5 = vector.shape_cast %4 : vector<1x1x32xf32> to vector<1x32xf32>
    %6 = vector.broadcast %5 : vector<1x32xf32> to vector<64x32xf32>
    %7 = arith.addf %3, %6 : vector<64x32xf32>
    %c0_7 = arith.constant 0 : index
    %c0_8 = arith.constant 0 : index
    %c0_9 = arith.constant 0 : index
    %8 = vector.load %arg9[%c0_7, %c0_8, %c0_9] : memref<6x64x32xf32, #tpu.memory_space<vmem>>, vector<1x64x32xf32>
    %9 = vector.shape_cast %8 : vector<1x64x32xf32> to vector<64x32xf32>
    %10 = vector.shape_cast %7 : vector<64x32xf32> to vector<1x64x32xf32>
    tpu.vector_store %arg9[%c0_7, %c0_8, %c0_9], %10 {strides = array<i32>} : memref<6x64x32xf32, #tpu.memory_space<vmem>>, vector<1x64x32xf32>,
    %c1 = arith.constant 1 : index
    %c0_10 = arith.constant 0 : index
    %c0_11 = arith.constant 0 : index
    %11 = vector.load %arg1[%c1, %c0_10, %c0_11] : memref<6x32x32xf32, #tpu.memory_space<vmem>>, vector<1x32x32xf32>
    %12 = vector.shape_cast %11 : vector<1x32x32xf32> to vector<32x32xf32>
    %cst_12 = arith.constant dense<0.000000e+00> : vector<64x32xf32>
    %13 = tpu.matmul %0, %12, %cst_12 {dimension_numbers = #tpu.dot_dimension_numbers<[1], [0], [0], [1], [0, 0, 1, 1], [], []>} : vector<64x32xf32>, vector<32x32xf32>, vector<64x32xf32> -> vector<64x32xf32>
    %c1_13 = arith.constant 1 : index
    %c0_14 = arith.constant 0 : index
    %c0_15 = arith.constant 0 : index
    %14 = vector.load %arg3[%c1_13, %c0_14, %c0_15] : memref<6x1x32xf32, #tpu.memory_space<vmem>>, vector<1x1x32xf32>
    %15 = vector.shape_cast %14 : vector<1x1x32xf32> to vector<1x32xf32>
    %16 = vector.broadcast %15 : vector<1x32xf32> to vector<64x32xf32>
    %17 = arith.addf %13, %16 : vector<64x32xf32>
    %c1_16 = arith.constant 1 : index
    %c0_17 = arith.constant 0 : index
    %c0_18 = arith.constant 0 : index
    %18 = vector.load %arg9[%c1_16, %c0_17, %c0_18] : memref<6x64x32xf32, #tpu.memory_space<vmem>>, vector<1x64x32xf32>
    %19 = vector.shape_cast %18 : vector<1x64x32xf32> to vector<64x32xf32>
    %20 = vector.shape_cast %17 : vector<64x32xf32> to vector<1x64x32xf32>
    tpu.vector_store %arg9[%c1_16, %c0_17, %c0_18], %20 {strides = array<i32>} : memref<6x64x32xf32, #tpu.memory_space<vmem>>, vector<1x64x32xf32>,
    %c2 = arith.constant 2 : index
    %c0_19 = arith.constant 0 : index
    %c0_20 = arith.constant 0 : index
    %21 = vector.load %arg1[%c2, %c0_19, %c0_20] : memref<6x32x32xf32, #tpu.memory_space<vmem>>, vector<1x32x32xf32>
    %22 = vector.shape_cast %21 : vector<1x32x32xf32> to vector<32x32xf32>
    %cst_21 = arith.constant dense<0.000000e+00> : vector<64x32xf32>
    %23 = tpu.matmul %0, %22, %cst_21 {dimension_numbers = #tpu.dot_dimension_numbers<[1], [0], [0], [1], [0, 0, 1, 1], [], []>} : vector<64x32xf32>, vector<32x32xf32>, vector<64x32xf32> -> vector<64x32xf32>
    %c2_22 = arith.constant 2 : index
    %c0_23 = arith.constant 0 : index
    %c0_24 = arith.constant 0 : index
    %24 = vector.load %arg3[%c2_22, %c0_23, %c0_24] : memref<6x1x32xf32, #tpu.memory_space<vmem>>, vector<1x1x32xf32>
    %25 = vector.shape_cast %24 : vector<1x1x32xf32> to vector<1x32xf32>
    %26 = vector.broadcast %25 : vector<1x32xf32> to vector<64x32xf32>
    %27 = arith.addf %23, %26 : vector<64x32xf32>
    %c2_25 = arith.constant 2 : index
    %c0_26 = arith.constant 0 : index
    %c0_27 = arith.constant 0 : index
    %28 = vector.load %arg9[%c2_25, %c0_26, %c0_27] : memref<6x64x32xf32, #tpu.memory_space<vmem>>, vector<1x64x32xf32>
    %29 = vector.shape_cast %28 : vector<1x64x32xf32> to vector<64x32xf32>
    %30 = vector.shape_cast %27 : vector<64x32xf32> to vector<1x64x32xf32>
    tpu.vector_store %arg9[%c2_25, %c0_26, %c0_27], %30 {strides = array<i32>} : memref<6x64x32xf32, #tpu.memory_space<vmem>>, vector<1x64x32xf32>,
    %c3 = arith.constant 3 : index
    %c0_28 = arith.constant 0 : index
    %c0_29 = arith.constant 0 : index
    %31 = vector.load %arg1[%c3, %c0_28, %c0_29] : memref<6x32x32xf32, #tpu.memory_space<vmem>>, vector<1x32x32xf32>
    %32 = vector.shape_cast %31 : vector<1x32x32xf32> to vector<32x32xf32>
    %cst_30 = arith.constant dense<0.000000e+00> : vector<64x32xf32>
    %33 = tpu.matmul %0, %32, %cst_30 {dimension_numbers = #tpu.dot_dimension_numbers<[1], [0], [0], [1], [0, 0, 1, 1], [], []>} : vector<64x32xf32>, vector<32x32xf32>, vector<64x32xf32> -> vector<64x32xf32>
    %c3_31 = arith.constant 3 : index
    %c0_32 = arith.constant 0 : index
    %c0_33 = arith.constant 0 : index
    %34 = vector.load %arg3[%c3_31, %c0_32, %c0_33] : memref<6x1x32xf32, #tpu.memory_space<vmem>>, vector<1x1x32xf32>
    %35 = vector.shape_cast %34 : vector<1x1x32xf32> to vector<1x32xf32>
    %36 = vector.broadcast %35 : vector<1x32xf32> to vector<64x32xf32>
    %37 = arith.addf %33, %36 : vector<64x32xf32>
    %c3_34 = arith.constant 3 : index
    %c0_35 = arith.constant 0 : index
    %c0_36 = arith.constant 0 : index
    %38 = vector.load %arg9[%c3_34, %c0_35, %c0_36] : memref<6x64x32xf32, #tpu.memory_space<vmem>>, vector<1x64x32xf32>
    %39 = vector.shape_cast %38 : vector<1x64x32xf32> to vector<64x32xf32>
    %40 = vector.shape_cast %37 : vector<64x32xf32> to vector<1x64x32xf32>
    tpu.vector_store %arg9[%c3_34, %c0_35, %c0_36], %40 {strides = array<i32>} : memref<6x64x32xf32, #tpu.memory_space<vmem>>, vector<1x64x32xf32>,
    %c4 = arith.constant 4 : index
    %c0_37 = arith.constant 0 : index
    %c0_38 = arith.constant 0 : index
    %41 = vector.load %arg1[%c4, %c0_37, %c0_38] : memref<6x32x32xf32, #tpu.memory_space<vmem>>, vector<1x32x32xf32>
    %42 = vector.shape_cast %41 : vector<1x32x32xf32> to vector<32x32xf32>
    %cst_39 = arith.constant dense<0.000000e+00> : vector<64x32xf32>
    %43 = tpu.matmul %0, %42, %cst_39 {dimension_numbers = #tpu.dot_dimension_numbers<[1], [0], [0], [1], [0, 0, 1, 1], [], []>} : vector<64x32xf32>, vector<32x32xf32>, vector<64x32xf32> -> vector<64x32xf32>
    %c4_40 = arith.constant 4 : index
    %c0_41 = arith.constant 0 : index
    %c0_42 = arith.constant 0 : index
    %44 = vector.load %arg3[%c4_40, %c0_41, %c0_42] : memref<6x1x32xf32, #tpu.memory_space<vmem>>, vector<1x1x32xf32>
    %45 = vector.shape_cast %44 : vector<1x1x32xf32> to vector<1x32xf32>
    %46 = vector.broadcast %45 : vector<1x32xf32> to vector<64x32xf32>
    %47 = arith.addf %43, %46 : vector<64x32xf32>
    %c4_43 = arith.constant 4 : index
    %c0_44 = arith.constant 0 : index
    %c0_45 = arith.constant 0 : index
    %48 = vector.load %arg9[%c4_43, %c0_44, %c0_45] : memref<6x64x32xf32, #tpu.memory_space<vmem>>, vector<1x64x32xf32>
    %49 = vector.shape_cast %48 : vector<1x64x32xf32> to vector<64x32xf32>
    %50 = vector.shape_cast %47 : vector<64x32xf32> to vector<1x64x32xf32>
    tpu.vector_store %arg9[%c4_43, %c0_44, %c0_45], %50 {strides = array<i32>} : memref<6x64x32xf32, #tpu.memory_space<vmem>>, vector<1x64x32xf32>,
    %c5 = arith.constant 5 : index
    %c0_46 = arith.constant 0 : index
    %c0_47 = arith.constant 0 : index
    %51 = vector.load %arg1[%c5, %c0_46, %c0_47] : memref<6x32x32xf32, #tpu.memory_space<vmem>>, vector<1x32x32xf32>
    %52 = vector.shape_cast %51 : vector<1x32x32xf32> to vector<32x32xf32>
    %cst_48 = arith.constant dense<0.000000e+00> : vector<64x32xf32>
    %53 = tpu.matmul %0, %52, %cst_48 {dimension_numbers = #tpu.dot_dimension_numbers<[1], [0], [0], [1], [0, 0, 1, 1], [], []>} : vector<64x32xf32>, vector<32x32xf32>, vector<64x32xf32> -> vector<64x32xf32>
    %c5_49 = arith.constant 5 : index
    %c0_50 = arith.constant 0 : index
    %c0_51 = arith.constant 0 : index
    %54 = vector.load %arg3[%c5_49, %c0_50, %c0_51] : memref<6x1x32xf32, #tpu.memory_space<vmem>>, vector<1x1x32xf32>
    %55 = vector.shape_cast %54 : vector<1x1x32xf32> to vector<1x32xf32>
    %56 = vector.broadcast %55 : vector<1x32xf32> to vector<64x32xf32>
    %57 = arith.addf %53, %56 : vector<64x32xf32>
    %c5_52 = arith.constant 5 : index
    %c0_53 = arith.constant 0 : index
    %c0_54 = arith.constant 0 : index
    %58 = vector.load %arg9[%c5_52, %c0_53, %c0_54] : memref<6x64x32xf32, #tpu.memory_space<vmem>>, vector<1x64x32xf32>
    %59 = vector.shape_cast %58 : vector<1x64x32xf32> to vector<64x32xf32>
    %60 = vector.shape_cast %57 : vector<64x32xf32> to vector<1x64x32xf32>
    tpu.vector_store %arg9[%c5_52, %c0_53, %c0_54], %60 {strides = array<i32>} : memref<6x64x32xf32, #tpu.memory_space<vmem>>, vector<1x64x32xf32>,
    %c0_55 = arith.constant 0 : index
    %c0_56 = arith.constant 0 : index
    %c0_57 = arith.constant 0 : index
    %61 = vector.load %arg2[%c0_55, %c0_56, %c0_57] : memref<6x32x32xf32, #tpu.memory_space<vmem>>, vector<1x32x32xf32>
    %62 = vector.shape_cast %61 : vector<1x32x32xf32> to vector<32x32xf32>
    %c1_58 = arith.constant 1 : index
    %c0_59 = arith.constant 0 : index
    %c0_60 = arith.constant 0 : index
    %63 = vector.load %arg2[%c1_58, %c0_59, %c0_60] : memref<6x32x32xf32, #tpu.memory_space<vmem>>, vector<1x32x32xf32>
    %64 = vector.shape_cast %63 : vector<1x32x32xf32> to vector<32x32xf32>
    %c2_61 = arith.constant 2 : index
    %c0_62 = arith.constant 0 : index
    %c0_63 = arith.constant 0 : index
    %65 = vector.load %arg2[%c2_61, %c0_62, %c0_63] : memref<6x32x32xf32, #tpu.memory_space<vmem>>, vector<1x32x32xf32>
    %66 = vector.shape_cast %65 : vector<1x32x32xf32> to vector<32x32xf32>
    %c3_64 = arith.constant 3 : index
    %c0_65 = arith.constant 0 : index
    %c0_66 = arith.constant 0 : index
    %67 = vector.load %arg2[%c3_64, %c0_65, %c0_66] : memref<6x32x32xf32, #tpu.memory_space<vmem>>, vector<1x32x32xf32>
    %68 = vector.shape_cast %67 : vector<1x32x32xf32> to vector<32x32xf32>
    %c4_67 = arith.constant 4 : index
    %c0_68 = arith.constant 0 : index
    %c0_69 = arith.constant 0 : index
    %69 = vector.load %arg2[%c4_67, %c0_68, %c0_69] : memref<6x32x32xf32, #tpu.memory_space<vmem>>, vector<1x32x32xf32>
    %70 = vector.shape_cast %69 : vector<1x32x32xf32> to vector<32x32xf32>
    %c5_70 = arith.constant 5 : index
    %c0_71 = arith.constant 0 : index
    %c0_72 = arith.constant 0 : index
    %71 = vector.load %arg2[%c5_70, %c0_71, %c0_72] : memref<6x32x32xf32, #tpu.memory_space<vmem>>, vector<1x32x32xf32>
    %72 = vector.shape_cast %71 : vector<1x32x32xf32> to vector<32x32xf32>
    %c0_73 = arith.constant 0 : index
    %c0_74 = arith.constant 0 : index
    %c0_75 = arith.constant 0 : index
    %73 = vector.load %arg4[%c0_73, %c0_74, %c0_75] : memref<2x1x32xf32, #tpu.memory_space<vmem>>, vector<1x1x32xf32>
    %74 = vector.shape_cast %73 : vector<1x1x32xf32> to vector<1x32xf32>
    %c1_76 = arith.constant 1 : index
    %c0_77 = arith.constant 0 : index
    %c0_78 = arith.constant 0 : index
    %75 = vector.load %arg4[%c1_76, %c0_77, %c0_78] : memref<2x1x32xf32, #tpu.memory_space<vmem>>, vector<1x1x32xf32>
    %76 = vector.shape_cast %75 : vector<1x1x32xf32> to vector<1x32xf32>
    %cst_79 = arith.constant 0.000000e+00 : f32
    %77 = vector.broadcast %cst_79 : f32 to vector<8x32xf32>
    %c0_i32 = arith.constant 0 : i32
    %c7_i32 = arith.constant 7 : i32
    %78 = arith.subi %c7_i32, %c0_i32 : i32
    %c8_i32 = arith.constant 8 : i32
    %79 = arith.muli %c0_i32, %c8_i32 : i32
    %80 = tpu.assume_multiple %79, 8 : i32
    %c8_i32_80 = arith.constant 8 : i32
    %81 = arith.muli %78, %c8_i32_80 : i32
    %82 = tpu.assume_multiple %81, 8 : i32
    %c0_81 = arith.constant 0 : index
    %83 = arith.index_cast %80 : i32 to index
    %c0_82 = arith.constant 0 : index
    %84 = vector.load %arg9[%c0_81, %83, %c0_82] : memref<6x64x32xf32, #tpu.memory_space<vmem>>, vector<1x8x32xf32>
    %85 = vector.shape_cast %84 : vector<1x8x32xf32> to vector<8x32xf32>
    %c1_83 = arith.constant 1 : index
    %86 = arith.index_cast %80 : i32 to index
    %c0_84 = arith.constant 0 : index
    %87 = vector.load %arg9[%c1_83, %86, %c0_84] : memref<6x64x32xf32, #tpu.memory_space<vmem>>, vector<1x8x32xf32>
    %88 = vector.shape_cast %87 : vector<1x8x32xf32> to vector<8x32xf32>
    %c2_85 = arith.constant 2 : index
    %89 = arith.index_cast %80 : i32 to index
    %c0_86 = arith.constant 0 : index
    %90 = vector.load %arg9[%c2_85, %89, %c0_86] : memref<6x64x32xf32, #tpu.memory_space<vmem>>, vector<1x8x32xf32>
    %91 = vector.shape_cast %90 : vector<1x8x32xf32> to vector<8x32xf32>
    %cst_87 = arith.constant dense<0.000000e+00> : vector<8x32xf32>
    %92 = tpu.matmul %77, %62, %cst_87 {dimension_numbers = #tpu.dot_dimension_numbers<[1], [0], [0], [1], [0, 0, 1, 1], [], []>} : vector<8x32xf32>, vector<32x32xf32>, vector<8x32xf32> -> vector<8x32xf32>
    %93 = arith.addf %85, %92 : vector<8x32xf32>
    %94 = arith.negf %93 : vector<8x32xf32>
    %95 = math.exp %94 : vector<8x32xf32>
    %cst_88 = arith.constant 1.000000e+00 : f32
    %96 = vector.broadcast %cst_88 : f32 to vector<8x32xf32>
    %97 = arith.addf %96, %95 : vector<8x32xf32>
    %98 = arith.divf %96, %97 : vector<8x32xf32>
    %cst_89 = arith.constant dense<0.000000e+00> : vector<8x32xf32>
    %99 = tpu.matmul %77, %64, %cst_89 {dimension_numbers = #tpu.dot_dimension_numbers<[1], [0], [0], [1], [0, 0, 1, 1], [], []>} : vector<8x32xf32>, vector<32x32xf32>, vector<8x32xf32> -> vector<8x32xf32>
    %100 = arith.addf %88, %99 : vector<8x32xf32>
    %101 = arith.negf %100 : vector<8x32xf32>
    %102 = math.exp %101 : vector<8x32xf32>
    %cst_90 = arith.constant 1.000000e+00 : f32
    %103 = vector.broadcast %cst_90 : f32 to vector<8x32xf32>
    %104 = arith.addf %103, %102 : vector<8x32xf32>
    %105 = arith.divf %103, %104 : vector<8x32xf32>
    %cst_91 = arith.constant dense<0.000000e+00> : vector<8x32xf32>
    %106 = tpu.matmul %77, %66, %cst_91 {dimension_numbers = #tpu.dot_dimension_numbers<[1], [0], [0], [1], [0, 0, 1, 1], [], []>} : vector<8x32xf32>, vector<32x32xf32>, vector<8x32xf32> -> vector<8x32xf32>
    %107 = vector.broadcast %74 : vector<1x32xf32> to vector<8x32xf32>
    %108 = arith.addf %106, %107 : vector<8x32xf32>
    %109 = arith.mulf %98, %108 : vector<8x32xf32>
    %110 = arith.addf %91, %109 : vector<8x32xf32>
    %111 = math.tanh %110 : vector<8x32xf32>
    %cst_92 = arith.constant 1.000000e+00 : f32
    %112 = vector.broadcast %cst_92 : f32 to vector<8x32xf32>
    %113 = arith.subf %112, %105 : vector<8x32xf32>
    %114 = arith.mulf %113, %111 : vector<8x32xf32>
    %115 = arith.mulf %105, %77 : vector<8x32xf32>
    %116 = arith.addf %114, %115 : vector<8x32xf32>
    %c3_93 = arith.constant 3 : index
    %117 = arith.index_cast %82 : i32 to index
    %c0_94 = arith.constant 0 : index
    %118 = vector.load %arg9[%c3_93, %117, %c0_94] : memref<6x64x32xf32, #tpu.memory_space<vmem>>, vector<1x8x32xf32>
    %119 = vector.shape_cast %118 : vector<1x8x32xf32> to vector<8x32xf32>
    %c4_95 = arith.constant 4 : index
    %120 = arith.index_cast %82 : i32 to index
    %c0_96 = arith.constant 0 : index
    %121 = vector.load %arg9[%c4_95, %120, %c0_96] : memref<6x64x32xf32, #tpu.memory_space<vmem>>, vector<1x8x32xf32>
    %122 = vector.shape_cast %121 : vector<1x8x32xf32> to vector<8x32xf32>
    %c5_97 = arith.constant 5 : index
    %123 = arith.index_cast %82 : i32 to index
    %c0_98 = arith.constant 0 : index
    %124 = vector.load %arg9[%c5_97, %123, %c0_98] : memref<6x64x32xf32, #tpu.memory_space<vmem>>, vector<1x8x32xf32>
    %125 = vector.shape_cast %124 : vector<1x8x32xf32> to vector<8x32xf32>
    %cst_99 = arith.constant dense<0.000000e+00> : vector<8x32xf32>
    %126 = tpu.matmul %77, %68, %cst_99 {dimension_numbers = #tpu.dot_dimension_numbers<[1], [0], [0], [1], [0, 0, 1, 1], [], []>} : vector<8x32xf32>, vector<32x32xf32>, vector<8x32xf32> -> vector<8x32xf32>
    %127 = arith.addf %119, %126 : vector<8x32xf32>
    %128 = arith.negf %127 : vector<8x32xf32>
    %129 = math.exp %128 : vector<8x32xf32>
    %cst_100 = arith.constant 1.000000e+00 : f32
    %130 = vector.broadcast %cst_100 : f32 to vector<8x32xf32>
    %131 = arith.addf %130, %129 : vector<8x32xf32>
    %132 = arith.divf %130, %131 : vector<8x32xf32>
    %cst_101 = arith.constant dense<0.000000e+00> : vector<8x32xf32>
    %133 = tpu.matmul %77, %70, %cst_101 {dimension_numbers = #tpu.dot_dimension_numbers<[1], [0], [0], [1], [0, 0, 1, 1], [], []>} : vector<8x32xf32>, vector<32x32xf32>, vector<8x32xf32> -> vector<8x32xf32>
    %134 = arith.addf %122, %133 : vector<8x32xf32>
    %135 = arith.negf %134 : vector<8x32xf32>
    %136 = math.exp %135 : vector<8x32xf32>
    %cst_102 = arith.constant 1.000000e+00 : f32
    %137 = vector.broadcast %cst_102 : f32 to vector<8x32xf32>
    %138 = arith.addf %137, %136 : vector<8x32xf32>
    %139 = arith.divf %137, %138 : vector<8x32xf32>
    %cst_103 = arith.constant dense<0.000000e+00> : vector<8x32xf32>
    %140 = tpu.matmul %77, %72, %cst_103 {dimension_numbers = #tpu.dot_dimension_numbers<[1], [0], [0], [1], [0, 0, 1, 1], [], []>} : vector<8x32xf32>, vector<32x32xf32>, vector<8x32xf32> -> vector<8x32xf32>
    %141 = vector.broadcast %76 : vector<1x32xf32> to vector<8x32xf32>
    %142 = arith.addf %140, %141 : vector<8x32xf32>
    %143 = arith.mulf %132, %142 : vector<8x32xf32>
    %144 = arith.addf %125, %143 : vector<8x32xf32>
    %145 = math.tanh %144 : vector<8x32xf32>
    %cst_104 = arith.constant 1.000000e+00 : f32
    %146 = vector.broadcast %cst_104 : f32 to vector<8x32xf32>
    %147 = arith.subf %146, %139 : vector<8x32xf32>
    %148 = arith.mulf %147, %145 : vector<8x32xf32>
    %149 = arith.mulf %139, %77 : vector<8x32xf32>
    %150 = arith.addf %148, %149 : vector<8x32xf32>
    %151 = arith.index_cast %c0_i32 : i32 to index
    %c0_105 = arith.constant 0 : index
    %c0_106 = arith.constant 0 : index
    %152 = vector.load %arg7[%151, %c0_105, %c0_106] : memref<8x8x64xf32, #tpu.memory_space<vmem>>, vector<1x8x32xf32>
    %153 = vector.shape_cast %152 : vector<1x8x32xf32> to vector<8x32xf32>
    %154 = vector.shape_cast %116 : vector<8x32xf32> to vector<1x8x32xf32>
    tpu.vector_store %arg7[%151, %c0_105, %c0_106], %154 {strides = array<i32>} : memref<8x8x64xf32, #tpu.memory_space<vmem>>, vector<1x8x32xf32>,
    %155 = arith.index_cast %78 : i32 to index
    %c0_107 = arith.constant 0 : index
    %c32 = arith.constant 32 : index
    %156 = vector.load %arg7[%155, %c0_107, %c32] : memref<8x8x64xf32, #tpu.memory_space<vmem>>, vector<1x8x32xf32>
    %157 = vector.shape_cast %156 : vector<1x8x32xf32> to vector<8x32xf32>
    %158 = vector.shape_cast %150 : vector<8x32xf32> to vector<1x8x32xf32>
    tpu.vector_store %arg7[%155, %c0_107, %c32], %158 {strides = array<i32>} : memref<8x8x64xf32, #tpu.memory_space<vmem>>, vector<1x8x32xf32>,
    %c1_i32 = arith.constant 1 : i32
    %c7_i32_108 = arith.constant 7 : i32
    %159 = arith.subi %c7_i32_108, %c1_i32 : i32
    %c8_i32_109 = arith.constant 8 : i32
    %160 = arith.muli %c1_i32, %c8_i32_109 : i32
    %161 = tpu.assume_multiple %160, 8 : i32
    %c8_i32_110 = arith.constant 8 : i32
    %162 = arith.muli %159, %c8_i32_110 : i32
    %163 = tpu.assume_multiple %162, 8 : i32
    %c0_111 = arith.constant 0 : index
    %164 = arith.index_cast %161 : i32 to index
    %c0_112 = arith.constant 0 : index
    %165 = vector.load %arg9[%c0_111, %164, %c0_112] : memref<6x64x32xf32, #tpu.memory_space<vmem>>, vector<1x8x32xf32>
    %166 = vector.shape_cast %165 : vector<1x8x32xf32> to vector<8x32xf32>
    %c1_113 = arith.constant 1 : index
    %167 = arith.index_cast %161 : i32 to index
    %c0_114 = arith.constant 0 : index
    %168 = vector.load %arg9[%c1_113, %167, %c0_114] : memref<6x64x32xf32, #tpu.memory_space<vmem>>, vector<1x8x32xf32>
    %169 = vector.shape_cast %168 : vector<1x8x32xf32> to vector<8x32xf32>
    %c2_115 = arith.constant 2 : index
    %170 = arith.index_cast %161 : i32 to index
    %c0_116 = arith.constant 0 : index
    %171 = vector.load %arg9[%c2_115, %170, %c0_116] : memref<6x64x32xf32, #tpu.memory_space<vmem>>, vector<1x8x32xf32>
    %172 = vector.shape_cast %171 : vector<1x8x32xf32> to vector<8x32xf32>
    %cst_117 = arith.constant dense<0.000000e+00> : vector<8x32xf32>
    %173 = tpu.matmul %116, %62, %cst_117 {dimension_numbers = #tpu.dot_dimension_numbers<[1], [0], [0], [1], [0, 0, 1, 1], [], []>} : vector<8x32xf32>, vector<32x32xf32>, vector<8x32xf32> -> vector<8x32xf32>
    %174 = arith.addf %166, %173 : vector<8x32xf32>
    %175 = arith.negf %174 : vector<8x32xf32>
    %176 = math.exp %175 : vector<8x32xf32>
    %cst_118 = arith.constant 1.000000e+00 : f32
    %177 = vector.broadcast %cst_118 : f32 to vector<8x32xf32>
    %178 = arith.addf %177, %176 : vector<8x32xf32>
    %179 = arith.divf %177, %178 : vector<8x32xf32>
    %cst_119 = arith.constant dense<0.000000e+00> : vector<8x32xf32>
    %180 = tpu.matmul %116, %64, %cst_119 {dimension_numbers = #tpu.dot_dimension_numbers<[1], [0], [0], [1], [0, 0, 1, 1], [], []>} : vector<8x32xf32>, vector<32x32xf32>, vector<8x32xf32> -> vector<8x32xf32>
    %181 = arith.addf %169, %180 : vector<8x32xf32>
    %182 = arith.negf %181 : vector<8x32xf32>
    %183 = math.exp %182 : vector<8x32xf32>
    %cst_120 = arith.constant 1.000000e+00 : f32
    %184 = vector.broadcast %cst_120 : f32 to vector<8x32xf32>
    %185 = arith.addf %184, %183 : vector<8x32xf32>
    %186 = arith.divf %184, %185 : vector<8x32xf32>
    %cst_121 = arith.constant dense<0.000000e+00> : vector<8x32xf32>
    %187 = tpu.matmul %116, %66, %cst_121 {dimension_numbers = #tpu.dot_dimension_numbers<[1], [0], [0], [1], [0, 0, 1, 1], [], []>} : vector<8x32xf32>, vector<32x32xf32>, vector<8x32xf32> -> vector<8x32xf32>
    %188 = vector.broadcast %74 : vector<1x32xf32> to vector<8x32xf32>
    %189 = arith.addf %187, %188 : vector<8x32xf32>
    %190 = arith.mulf %179, %189 : vector<8x32xf32>
    %191 = arith.addf %172, %190 : vector<8x32xf32>
    %192 = math.tanh %191 : vector<8x32xf32>
    %cst_122 = arith.constant 1.000000e+00 : f32
    %193 = vector.broadcast %cst_122 : f32 to vector<8x32xf32>
    %194 = arith.subf %193, %186 : vector<8x32xf32>
    %195 = arith.mulf %194, %192 : vector<8x32xf32>
    %196 = arith.mulf %186, %116 : vector<8x32xf32>
    %197 = arith.addf %195, %196 : vector<8x32xf32>
    %c3_123 = arith.constant 3 : index
    %198 = arith.index_cast %163 : i32 to index
    %c0_124 = arith.constant 0 : index
    %199 = vector.load %arg9[%c3_123, %198, %c0_124] : memref<6x64x32xf32, #tpu.memory_space<vmem>>, vector<1x8x32xf32>
    %200 = vector.shape_cast %199 : vector<1x8x32xf32> to vector<8x32xf32>
    %c4_125 = arith.constant 4 : index
    %201 = arith.index_cast %163 : i32 to index
    %c0_126 = arith.constant 0 : index
    %202 = vector.load %arg9[%c4_125, %201, %c0_126] : memref<6x64x32xf32, #tpu.memory_space<vmem>>, vector<1x8x32xf32>
    %203 = vector.shape_cast %202 : vector<1x8x32xf32> to vector<8x32xf32>
    %c5_127 = arith.constant 5 : index
    %204 = arith.index_cast %163 : i32 to index
    %c0_128 = arith.constant 0 : index
    %205 = vector.load %arg9[%c5_127, %204, %c0_128] : memref<6x64x32xf32, #tpu.memory_space<vmem>>, vector<1x8x32xf32>
    %206 = vector.shape_cast %205 : vector<1x8x32xf32> to vector<8x32xf32>
    %cst_129 = arith.constant dense<0.000000e+00> : vector<8x32xf32>
    %207 = tpu.matmul %150, %68, %cst_129 {dimension_numbers = #tpu.dot_dimension_numbers<[1], [0], [0], [1], [0, 0, 1, 1], [], []>} : vector<8x32xf32>, vector<32x32xf32>, vector<8x32xf32> -> vector<8x32xf32>
    %208 = arith.addf %200, %207 : vector<8x32xf32>
    %209 = arith.negf %208 : vector<8x32xf32>
    %210 = math.exp %209 : vector<8x32xf32>
    %cst_130 = arith.constant 1.000000e+00 : f32
    %211 = vector.broadcast %cst_130 : f32 to vector<8x32xf32>
    %212 = arith.addf %211, %210 : vector<8x32xf32>
    %213 = arith.divf %211, %212 : vector<8x32xf32>
    %cst_131 = arith.constant dense<0.000000e+00> : vector<8x32xf32>
    %214 = tpu.matmul %150, %70, %cst_131 {dimension_numbers = #tpu.dot_dimension_numbers<[1], [0], [0], [1], [0, 0, 1, 1], [], []>} : vector<8x32xf32>, vector<32x32xf32>, vector<8x32xf32> -> vector<8x32xf32>
    %215 = arith.addf %203, %214 : vector<8x32xf32>
    %216 = arith.negf %215 : vector<8x32xf32>
    %217 = math.exp %216 : vector<8x32xf32>
    %cst_132 = arith.constant 1.000000e+00 : f32
    %218 = vector.broadcast %cst_132 : f32 to vector<8x32xf32>
    %219 = arith.addf %218, %217 : vector<8x32xf32>
    %220 = arith.divf %218, %219 : vector<8x32xf32>
    %cst_133 = arith.constant dense<0.000000e+00> : vector<8x32xf32>
    %221 = tpu.matmul %150, %72, %cst_133 {dimension_numbers = #tpu.dot_dimension_numbers<[1], [0], [0], [1], [0, 0, 1, 1], [], []>} : vector<8x32xf32>, vector<32x32xf32>, vector<8x32xf32> -> vector<8x32xf32>
    %222 = vector.broadcast %76 : vector<1x32xf32> to vector<8x32xf32>
    %223 = arith.addf %221, %222 : vector<8x32xf32>
    %224 = arith.mulf %213, %223 : vector<8x32xf32>
    %225 = arith.addf %206, %224 : vector<8x32xf32>
    %226 = math.tanh %225 : vector<8x32xf32>
    %cst_134 = arith.constant 1.000000e+00 : f32
    %227 = vector.broadcast %cst_134 : f32 to vector<8x32xf32>
    %228 = arith.subf %227, %220 : vector<8x32xf32>
    %229 = arith.mulf %228, %226 : vector<8x32xf32>
    %230 = arith.mulf %220, %150 : vector<8x32xf32>
    %231 = arith.addf %229, %230 : vector<8x32xf32>
    %232 = arith.index_cast %c1_i32 : i32 to index
    %c0_135 = arith.constant 0 : index
    %c0_136 = arith.constant 0 : index
    %233 = vector.load %arg7[%232, %c0_135, %c0_136] : memref<8x8x64xf32, #tpu.memory_space<vmem>>, vector<1x8x32xf32>
    %234 = vector.shape_cast %233 : vector<1x8x32xf32> to vector<8x32xf32>
    %235 = vector.shape_cast %197 : vector<8x32xf32> to vector<1x8x32xf32>
    tpu.vector_store %arg7[%232, %c0_135, %c0_136], %235 {strides = array<i32>} : memref<8x8x64xf32, #tpu.memory_space<vmem>>, vector<1x8x32xf32>,
    %236 = arith.index_cast %159 : i32 to index
    %c0_137 = arith.constant 0 : index
    %c32_138 = arith.constant 32 : index
    %237 = vector.load %arg7[%236, %c0_137, %c32_138] : memref<8x8x64xf32, #tpu.memory_space<vmem>>, vector<1x8x32xf32>
    %238 = vector.shape_cast %237 : vector<1x8x32xf32> to vector<8x32xf32>
    %239 = vector.shape_cast %231 : vector<8x32xf32> to vector<1x8x32xf32>
    tpu.vector_store %arg7[%236, %c0_137, %c32_138], %239 {strides = array<i32>} : memref<8x8x64xf32, #tpu.memory_space<vmem>>, vector<1x8x32xf32>,
    %c2_i32 = arith.constant 2 : i32
    %c7_i32_139 = arith.constant 7 : i32
    %240 = arith.subi %c7_i32_139, %c2_i32 : i32
    %c8_i32_140 = arith.constant 8 : i32
    %241 = arith.muli %c2_i32, %c8_i32_140 : i32
    %242 = tpu.assume_multiple %241, 8 : i32
    %c8_i32_141 = arith.constant 8 : i32
    %243 = arith.muli %240, %c8_i32_141 : i32
    %244 = tpu.assume_multiple %243, 8 : i32
    %c0_142 = arith.constant 0 : index
    %245 = arith.index_cast %242 : i32 to index
    %c0_143 = arith.constant 0 : index
    %246 = vector.load %arg9[%c0_142, %245, %c0_143] : memref<6x64x32xf32, #tpu.memory_space<vmem>>, vector<1x8x32xf32>
    %247 = vector.shape_cast %246 : vector<1x8x32xf32> to vector<8x32xf32>
    %c1_144 = arith.constant 1 : index
    %248 = arith.index_cast %242 : i32 to index
    %c0_145 = arith.constant 0 : index
    %249 = vector.load %arg9[%c1_144, %248, %c0_145] : memref<6x64x32xf32, #tpu.memory_space<vmem>>, vector<1x8x32xf32>
    %250 = vector.shape_cast %249 : vector<1x8x32xf32> to vector<8x32xf32>
    %c2_146 = arith.constant 2 : index
    %251 = arith.index_cast %242 : i32 to index
    %c0_147 = arith.constant 0 : index
    %252 = vector.load %arg9[%c2_146, %251, %c0_147] : memref<6x64x32xf32, #tpu.memory_space<vmem>>, vector<1x8x32xf32>
    %253 = vector.shape_cast %252 : vector<1x8x32xf32> to vector<8x32xf32>
    %cst_148 = arith.constant dense<0.000000e+00> : vector<8x32xf32>
    %254 = tpu.matmul %197, %62, %cst_148 {dimension_numbers = #tpu.dot_dimension_numbers<[1], [0], [0], [1], [0, 0, 1, 1], [], []>} : vector<8x32xf32>, vector<32x32xf32>, vector<8x32xf32> -> vector<8x32xf32>
    %255 = arith.addf %247, %254 : vector<8x32xf32>
    %256 = arith.negf %255 : vector<8x32xf32>
    %257 = math.exp %256 : vector<8x32xf32>
    %cst_149 = arith.constant 1.000000e+00 : f32
    %258 = vector.broadcast %cst_149 : f32 to vector<8x32xf32>
    %259 = arith.addf %258, %257 : vector<8x32xf32>
    %260 = arith.divf %258, %259 : vector<8x32xf32>
    %cst_150 = arith.constant dense<0.000000e+00> : vector<8x32xf32>
    %261 = tpu.matmul %197, %64, %cst_150 {dimension_numbers = #tpu.dot_dimension_numbers<[1], [0], [0], [1], [0, 0, 1, 1], [], []>} : vector<8x32xf32>, vector<32x32xf32>, vector<8x32xf32> -> vector<8x32xf32>
    %262 = arith.addf %250, %261 : vector<8x32xf32>
    %263 = arith.negf %262 : vector<8x32xf32>
    %264 = math.exp %263 : vector<8x32xf32>
    %cst_151 = arith.constant 1.000000e+00 : f32
    %265 = vector.broadcast %cst_151 : f32 to vector<8x32xf32>
    %266 = arith.addf %265, %264 : vector<8x32xf32>
    %267 = arith.divf %265, %266 : vector<8x32xf32>
    %cst_152 = arith.constant dense<0.000000e+00> : vector<8x32xf32>
    %268 = tpu.matmul %197, %66, %cst_152 {dimension_numbers = #tpu.dot_dimension_numbers<[1], [0], [0], [1], [0, 0, 1, 1], [], []>} : vector<8x32xf32>, vector<32x32xf32>, vector<8x32xf32> -> vector<8x32xf32>
    %269 = vector.broadcast %74 : vector<1x32xf32> to vector<8x32xf32>
    %270 = arith.addf %268, %269 : vector<8x32xf32>
    %271 = arith.mulf %260, %270 : vector<8x32xf32>
    %272 = arith.addf %253, %271 : vector<8x32xf32>
    %273 = math.tanh %272 : vector<8x32xf32>
    %cst_153 = arith.constant 1.000000e+00 : f32
    %274 = vector.broadcast %cst_153 : f32 to vector<8x32xf32>
    %275 = arith.subf %274, %267 : vector<8x32xf32>
    %276 = arith.mulf %275, %273 : vector<8x32xf32>
    %277 = arith.mulf %267, %197 : vector<8x32xf32>
    %278 = arith.addf %276, %277 : vector<8x32xf32>
    %c3_154 = arith.constant 3 : index
    %279 = arith.index_cast %244 : i32 to index
    %c0_155 = arith.constant 0 : index
    %280 = vector.load %arg9[%c3_154, %279, %c0_155] : memref<6x64x32xf32, #tpu.memory_space<vmem>>, vector<1x8x32xf32>
    %281 = vector.shape_cast %280 : vector<1x8x32xf32> to vector<8x32xf32>
    %c4_156 = arith.constant 4 : index
    %282 = arith.index_cast %244 : i32 to index
    %c0_157 = arith.constant 0 : index
    %283 = vector.load %arg9[%c4_156, %282, %c0_157] : memref<6x64x32xf32, #tpu.memory_space<vmem>>, vector<1x8x32xf32>
    %284 = vector.shape_cast %283 : vector<1x8x32xf32> to vector<8x32xf32>
    %c5_158 = arith.constant 5 : index
    %285 = arith.index_cast %244 : i32 to index
    %c0_159 = arith.constant 0 : index
    %286 = vector.load %arg9[%c5_158, %285, %c0_159] : memref<6x64x32xf32, #tpu.memory_space<vmem>>, vector<1x8x32xf32>
    %287 = vector.shape_cast %286 : vector<1x8x32xf32> to vector<8x32xf32>
    %cst_160 = arith.constant dense<0.000000e+00> : vector<8x32xf32>
    %288 = tpu.matmul %231, %68, %cst_160 {dimension_numbers = #tpu.dot_dimension_numbers<[1], [0], [0], [1], [0, 0, 1, 1], [], []>} : vector<8x32xf32>, vector<32x32xf32>, vector<8x32xf32> -> vector<8x32xf32>
    %289 = arith.addf %281, %288 : vector<8x32xf32>
    %290 = arith.negf %289 : vector<8x32xf32>
    %291 = math.exp %290 : vector<8x32xf32>
    %cst_161 = arith.constant 1.000000e+00 : f32
    %292 = vector.broadcast %cst_161 : f32 to vector<8x32xf32>
    %293 = arith.addf %292, %291 : vector<8x32xf32>
    %294 = arith.divf %292, %293 : vector<8x32xf32>
    %cst_162 = arith.constant dense<0.000000e+00> : vector<8x32xf32>
    %295 = tpu.matmul %231, %70, %cst_162 {dimension_numbers = #tpu.dot_dimension_numbers<[1], [0], [0], [1], [0, 0, 1, 1], [], []>} : vector<8x32xf32>, vector<32x32xf32>, vector<8x32xf32> -> vector<8x32xf32>
    %296 = arith.addf %284, %295 : vector<8x32xf32>
    %297 = arith.negf %296 : vector<8x32xf32>
    %298 = math.exp %297 : vector<8x32xf32>
    %cst_163 = arith.constant 1.000000e+00 : f32
    %299 = vector.broadcast %cst_163 : f32 to vector<8x32xf32>
    %300 = arith.addf %299, %298 : vector<8x32xf32>
    %301 = arith.divf %299, %300 : vector<8x32xf32>
    %cst_164 = arith.constant dense<0.000000e+00> : vector<8x32xf32>
    %302 = tpu.matmul %231, %72, %cst_164 {dimension_numbers = #tpu.dot_dimension_numbers<[1], [0], [0], [1], [0, 0, 1, 1], [], []>} : vector<8x32xf32>, vector<32x32xf32>, vector<8x32xf32> -> vector<8x32xf32>
    %303 = vector.broadcast %76 : vector<1x32xf32> to vector<8x32xf32>
    %304 = arith.addf %302, %303 : vector<8x32xf32>
    %305 = arith.mulf %294, %304 : vector<8x32xf32>
    %306 = arith.addf %287, %305 : vector<8x32xf32>
    %307 = math.tanh %306 : vector<8x32xf32>
    %cst_165 = arith.constant 1.000000e+00 : f32
    %308 = vector.broadcast %cst_165 : f32 to vector<8x32xf32>
    %309 = arith.subf %308, %301 : vector<8x32xf32>
    %310 = arith.mulf %309, %307 : vector<8x32xf32>
    %311 = arith.mulf %301, %231 : vector<8x32xf32>
    %312 = arith.addf %310, %311 : vector<8x32xf32>
    %313 = arith.index_cast %c2_i32 : i32 to index
    %c0_166 = arith.constant 0 : index
    %c0_167 = arith.constant 0 : index
    %314 = vector.load %arg7[%313, %c0_166, %c0_167] : memref<8x8x64xf32, #tpu.memory_space<vmem>>, vector<1x8x32xf32>
    %315 = vector.shape_cast %314 : vector<1x8x32xf32> to vector<8x32xf32>
    %316 = vector.shape_cast %278 : vector<8x32xf32> to vector<1x8x32xf32>
    tpu.vector_store %arg7[%313, %c0_166, %c0_167], %316 {strides = array<i32>} : memref<8x8x64xf32, #tpu.memory_space<vmem>>, vector<1x8x32xf32>,
    %317 = arith.index_cast %240 : i32 to index
    %c0_168 = arith.constant 0 : index
    %c32_169 = arith.constant 32 : index
    %318 = vector.load %arg7[%317, %c0_168, %c32_169] : memref<8x8x64xf32, #tpu.memory_space<vmem>>, vector<1x8x32xf32>
    %319 = vector.shape_cast %318 : vector<1x8x32xf32> to vector<8x32xf32>
    %320 = vector.shape_cast %312 : vector<8x32xf32> to vector<1x8x32xf32>
    tpu.vector_store %arg7[%317, %c0_168, %c32_169], %320 {strides = array<i32>} : memref<8x8x64xf32, #tpu.memory_space<vmem>>, vector<1x8x32xf32>,
    %c3_i32 = arith.constant 3 : i32
    %c7_i32_170 = arith.constant 7 : i32
    %321 = arith.subi %c7_i32_170, %c3_i32 : i32
    %c8_i32_171 = arith.constant 8 : i32
    %322 = arith.muli %c3_i32, %c8_i32_171 : i32
    %323 = tpu.assume_multiple %322, 8 : i32
    %c8_i32_172 = arith.constant 8 : i32
    %324 = arith.muli %321, %c8_i32_172 : i32
    %325 = tpu.assume_multiple %324, 8 : i32
    %c0_173 = arith.constant 0 : index
    %326 = arith.index_cast %323 : i32 to index
    %c0_174 = arith.constant 0 : index
    %327 = vector.load %arg9[%c0_173, %326, %c0_174] : memref<6x64x32xf32, #tpu.memory_space<vmem>>, vector<1x8x32xf32>
    %328 = vector.shape_cast %327 : vector<1x8x32xf32> to vector<8x32xf32>
    %c1_175 = arith.constant 1 : index
    %329 = arith.index_cast %323 : i32 to index
    %c0_176 = arith.constant 0 : index
    %330 = vector.load %arg9[%c1_175, %329, %c0_176] : memref<6x64x32xf32, #tpu.memory_space<vmem>>, vector<1x8x32xf32>
    %331 = vector.shape_cast %330 : vector<1x8x32xf32> to vector<8x32xf32>
    %c2_177 = arith.constant 2 : index
    %332 = arith.index_cast %323 : i32 to index
    %c0_178 = arith.constant 0 : index
    %333 = vector.load %arg9[%c2_177, %332, %c0_178] : memref<6x64x32xf32, #tpu.memory_space<vmem>>, vector<1x8x32xf32>
    %334 = vector.shape_cast %333 : vector<1x8x32xf32> to vector<8x32xf32>
    %cst_179 = arith.constant dense<0.000000e+00> : vector<8x32xf32>
    %335 = tpu.matmul %278, %62, %cst_179 {dimension_numbers = #tpu.dot_dimension_numbers<[1], [0], [0], [1], [0, 0, 1, 1], [], []>} : vector<8x32xf32>, vector<32x32xf32>, vector<8x32xf32> -> vector<8x32xf32>
    %336 = arith.addf %328, %335 : vector<8x32xf32>
    %337 = arith.negf %336 : vector<8x32xf32>
    %338 = math.exp %337 : vector<8x32xf32>
    %cst_180 = arith.constant 1.000000e+00 : f32
    %339 = vector.broadcast %cst_180 : f32 to vector<8x32xf32>
    %340 = arith.addf %339, %338 : vector<8x32xf32>
    %341 = arith.divf %339, %340 : vector<8x32xf32>
    %cst_181 = arith.constant dense<0.000000e+00> : vector<8x32xf32>
    %342 = tpu.matmul %278, %64, %cst_181 {dimension_numbers = #tpu.dot_dimension_numbers<[1], [0], [0], [1], [0, 0, 1, 1], [], []>} : vector<8x32xf32>, vector<32x32xf32>, vector<8x32xf32> -> vector<8x32xf32>
    %343 = arith.addf %331, %342 : vector<8x32xf32>
    %344 = arith.negf %343 : vector<8x32xf32>
    %345 = math.exp %344 : vector<8x32xf32>
    %cst_182 = arith.constant 1.000000e+00 : f32
    %346 = vector.broadcast %cst_182 : f32 to vector<8x32xf32>
    %347 = arith.addf %346, %345 : vector<8x32xf32>
    %348 = arith.divf %346, %347 : vector<8x32xf32>
    %cst_183 = arith.constant dense<0.000000e+00> : vector<8x32xf32>
    %349 = tpu.matmul %278, %66, %cst_183 {dimension_numbers = #tpu.dot_dimension_numbers<[1], [0], [0], [1], [0, 0, 1, 1], [], []>} : vector<8x32xf32>, vector<32x32xf32>, vector<8x32xf32> -> vector<8x32xf32>
    %350 = vector.broadcast %74 : vector<1x32xf32> to vector<8x32xf32>
    %351 = arith.addf %349, %350 : vector<8x32xf32>
    %352 = arith.mulf %341, %351 : vector<8x32xf32>
    %353 = arith.addf %334, %352 : vector<8x32xf32>
    %354 = math.tanh %353 : vector<8x32xf32>
    %cst_184 = arith.constant 1.000000e+00 : f32
    %355 = vector.broadcast %cst_184 : f32 to vector<8x32xf32>
    %356 = arith.subf %355, %348 : vector<8x32xf32>
    %357 = arith.mulf %356, %354 : vector<8x32xf32>
    %358 = arith.mulf %348, %278 : vector<8x32xf32>
    %359 = arith.addf %357, %358 : vector<8x32xf32>
    %c3_185 = arith.constant 3 : index
    %360 = arith.index_cast %325 : i32 to index
    %c0_186 = arith.constant 0 : index
    %361 = vector.load %arg9[%c3_185, %360, %c0_186] : memref<6x64x32xf32, #tpu.memory_space<vmem>>, vector<1x8x32xf32>
    %362 = vector.shape_cast %361 : vector<1x8x32xf32> to vector<8x32xf32>
    %c4_187 = arith.constant 4 : index
    %363 = arith.index_cast %325 : i32 to index
    %c0_188 = arith.constant 0 : index
    %364 = vector.load %arg9[%c4_187, %363, %c0_188] : memref<6x64x32xf32, #tpu.memory_space<vmem>>, vector<1x8x32xf32>
    %365 = vector.shape_cast %364 : vector<1x8x32xf32> to vector<8x32xf32>
    %c5_189 = arith.constant 5 : index
    %366 = arith.index_cast %325 : i32 to index
    %c0_190 = arith.constant 0 : index
    %367 = vector.load %arg9[%c5_189, %366, %c0_190] : memref<6x64x32xf32, #tpu.memory_space<vmem>>, vector<1x8x32xf32>
    %368 = vector.shape_cast %367 : vector<1x8x32xf32> to vector<8x32xf32>
    %cst_191 = arith.constant dense<0.000000e+00> : vector<8x32xf32>
    %369 = tpu.matmul %312, %68, %cst_191 {dimension_numbers = #tpu.dot_dimension_numbers<[1], [0], [0], [1], [0, 0, 1, 1], [], []>} : vector<8x32xf32>, vector<32x32xf32>, vector<8x32xf32> -> vector<8x32xf32>
    %370 = arith.addf %362, %369 : vector<8x32xf32>
    %371 = arith.negf %370 : vector<8x32xf32>
    %372 = math.exp %371 : vector<8x32xf32>
    %cst_192 = arith.constant 1.000000e+00 : f32
    %373 = vector.broadcast %cst_192 : f32 to vector<8x32xf32>
    %374 = arith.addf %373, %372 : vector<8x32xf32>
    %375 = arith.divf %373, %374 : vector<8x32xf32>
    %cst_193 = arith.constant dense<0.000000e+00> : vector<8x32xf32>
    %376 = tpu.matmul %312, %70, %cst_193 {dimension_numbers = #tpu.dot_dimension_numbers<[1], [0], [0], [1], [0, 0, 1, 1], [], []>} : vector<8x32xf32>, vector<32x32xf32>, vector<8x32xf32> -> vector<8x32xf32>
    %377 = arith.addf %365, %376 : vector<8x32xf32>
    %378 = arith.negf %377 : vector<8x32xf32>
    %379 = math.exp %378 : vector<8x32xf32>
    %cst_194 = arith.constant 1.000000e+00 : f32
    %380 = vector.broadcast %cst_194 : f32 to vector<8x32xf32>
    %381 = arith.addf %380, %379 : vector<8x32xf32>
    %382 = arith.divf %380, %381 : vector<8x32xf32>
    %cst_195 = arith.constant dense<0.000000e+00> : vector<8x32xf32>
    %383 = tpu.matmul %312, %72, %cst_195 {dimension_numbers = #tpu.dot_dimension_numbers<[1], [0], [0], [1], [0, 0, 1, 1], [], []>} : vector<8x32xf32>, vector<32x32xf32>, vector<8x32xf32> -> vector<8x32xf32>
    %384 = vector.broadcast %76 : vector<1x32xf32> to vector<8x32xf32>
    %385 = arith.addf %383, %384 : vector<8x32xf32>
    %386 = arith.mulf %375, %385 : vector<8x32xf32>
    %387 = arith.addf %368, %386 : vector<8x32xf32>
    %388 = math.tanh %387 : vector<8x32xf32>
    %cst_196 = arith.constant 1.000000e+00 : f32
    %389 = vector.broadcast %cst_196 : f32 to vector<8x32xf32>
    %390 = arith.subf %389, %382 : vector<8x32xf32>
    %391 = arith.mulf %390, %388 : vector<8x32xf32>
    %392 = arith.mulf %382, %312 : vector<8x32xf32>
    %393 = arith.addf %391, %392 : vector<8x32xf32>
    %394 = arith.index_cast %c3_i32 : i32 to index
    %c0_197 = arith.constant 0 : index
    %c0_198 = arith.constant 0 : index
    %395 = vector.load %arg7[%394, %c0_197, %c0_198] : memref<8x8x64xf32, #tpu.memory_space<vmem>>, vector<1x8x32xf32>
    %396 = vector.shape_cast %395 : vector<1x8x32xf32> to vector<8x32xf32>
    %397 = vector.shape_cast %359 : vector<8x32xf32> to vector<1x8x32xf32>
    tpu.vector_store %arg7[%394, %c0_197, %c0_198], %397 {strides = array<i32>} : memref<8x8x64xf32, #tpu.memory_space<vmem>>, vector<1x8x32xf32>,
    %398 = arith.index_cast %321 : i32 to index
    %c0_199 = arith.constant 0 : index
    %c32_200 = arith.constant 32 : index
    %399 = vector.load %arg7[%398, %c0_199, %c32_200] : memref<8x8x64xf32, #tpu.memory_space<vmem>>, vector<1x8x32xf32>
    %400 = vector.shape_cast %399 : vector<1x8x32xf32> to vector<8x32xf32>
    %401 = vector.shape_cast %393 : vector<8x32xf32> to vector<1x8x32xf32>
    tpu.vector_store %arg7[%398, %c0_199, %c32_200], %401 {strides = array<i32>} : memref<8x8x64xf32, #tpu.memory_space<vmem>>, vector<1x8x32xf32>,
    %c4_i32 = arith.constant 4 : i32
    %c7_i32_201 = arith.constant 7 : i32
    %402 = arith.subi %c7_i32_201, %c4_i32 : i32
    %c8_i32_202 = arith.constant 8 : i32
    %403 = arith.muli %c4_i32, %c8_i32_202 : i32
    %404 = tpu.assume_multiple %403, 8 : i32
    %c8_i32_203 = arith.constant 8 : i32
    %405 = arith.muli %402, %c8_i32_203 : i32
    %406 = tpu.assume_multiple %405, 8 : i32
    %c0_204 = arith.constant 0 : index
    %407 = arith.index_cast %404 : i32 to index
    %c0_205 = arith.constant 0 : index
    %408 = vector.load %arg9[%c0_204, %407, %c0_205] : memref<6x64x32xf32, #tpu.memory_space<vmem>>, vector<1x8x32xf32>
    %409 = vector.shape_cast %408 : vector<1x8x32xf32> to vector<8x32xf32>
    %c1_206 = arith.constant 1 : index
    %410 = arith.index_cast %404 : i32 to index
    %c0_207 = arith.constant 0 : index
    %411 = vector.load %arg9[%c1_206, %410, %c0_207] : memref<6x64x32xf32, #tpu.memory_space<vmem>>, vector<1x8x32xf32>
    %412 = vector.shape_cast %411 : vector<1x8x32xf32> to vector<8x32xf32>
    %c2_208 = arith.constant 2 : index
    %413 = arith.index_cast %404 : i32 to index
    %c0_209 = arith.constant 0 : index
    %414 = vector.load %arg9[%c2_208, %413, %c0_209] : memref<6x64x32xf32, #tpu.memory_space<vmem>>, vector<1x8x32xf32>
    %415 = vector.shape_cast %414 : vector<1x8x32xf32> to vector<8x32xf32>
    %cst_210 = arith.constant dense<0.000000e+00> : vector<8x32xf32>
    %416 = tpu.matmul %359, %62, %cst_210 {dimension_numbers = #tpu.dot_dimension_numbers<[1], [0], [0], [1], [0, 0, 1, 1], [], []>} : vector<8x32xf32>, vector<32x32xf32>, vector<8x32xf32> -> vector<8x32xf32>
    %417 = arith.addf %409, %416 : vector<8x32xf32>
    %418 = arith.negf %417 : vector<8x32xf32>
    %419 = math.exp %418 : vector<8x32xf32>
    %cst_211 = arith.constant 1.000000e+00 : f32
    %420 = vector.broadcast %cst_211 : f32 to vector<8x32xf32>
    %421 = arith.addf %420, %419 : vector<8x32xf32>
    %422 = arith.divf %420, %421 : vector<8x32xf32>
    %cst_212 = arith.constant dense<0.000000e+00> : vector<8x32xf32>
    %423 = tpu.matmul %359, %64, %cst_212 {dimension_numbers = #tpu.dot_dimension_numbers<[1], [0], [0], [1], [0, 0, 1, 1], [], []>} : vector<8x32xf32>, vector<32x32xf32>, vector<8x32xf32> -> vector<8x32xf32>
    %424 = arith.addf %412, %423 : vector<8x32xf32>
    %425 = arith.negf %424 : vector<8x32xf32>
    %426 = math.exp %425 : vector<8x32xf32>
    %cst_213 = arith.constant 1.000000e+00 : f32
    %427 = vector.broadcast %cst_213 : f32 to vector<8x32xf32>
    %428 = arith.addf %427, %426 : vector<8x32xf32>
    %429 = arith.divf %427, %428 : vector<8x32xf32>
    %cst_214 = arith.constant dense<0.000000e+00> : vector<8x32xf32>
    %430 = tpu.matmul %359, %66, %cst_214 {dimension_numbers = #tpu.dot_dimension_numbers<[1], [0], [0], [1], [0, 0, 1, 1], [], []>} : vector<8x32xf32>, vector<32x32xf32>, vector<8x32xf32> -> vector<8x32xf32>
    %431 = vector.broadcast %74 : vector<1x32xf32> to vector<8x32xf32>
    %432 = arith.addf %430, %431 : vector<8x32xf32>
    %433 = arith.mulf %422, %432 : vector<8x32xf32>
    %434 = arith.addf %415, %433 : vector<8x32xf32>
    %435 = math.tanh %434 : vector<8x32xf32>
    %cst_215 = arith.constant 1.000000e+00 : f32
    %436 = vector.broadcast %cst_215 : f32 to vector<8x32xf32>
    %437 = arith.subf %436, %429 : vector<8x32xf32>
    %438 = arith.mulf %437, %435 : vector<8x32xf32>
    %439 = arith.mulf %429, %359 : vector<8x32xf32>
    %440 = arith.addf %438, %439 : vector<8x32xf32>
    %c3_216 = arith.constant 3 : index
    %441 = arith.index_cast %406 : i32 to index
    %c0_217 = arith.constant 0 : index
    %442 = vector.load %arg9[%c3_216, %441, %c0_217] : memref<6x64x32xf32, #tpu.memory_space<vmem>>, vector<1x8x32xf32>
    %443 = vector.shape_cast %442 : vector<1x8x32xf32> to vector<8x32xf32>
    %c4_218 = arith.constant 4 : index
    %444 = arith.index_cast %406 : i32 to index
    %c0_219 = arith.constant 0 : index
    %445 = vector.load %arg9[%c4_218, %444, %c0_219] : memref<6x64x32xf32, #tpu.memory_space<vmem>>, vector<1x8x32xf32>
    %446 = vector.shape_cast %445 : vector<1x8x32xf32> to vector<8x32xf32>
    %c5_220 = arith.constant 5 : index
    %447 = arith.index_cast %406 : i32 to index
    %c0_221 = arith.constant 0 : index
    %448 = vector.load %arg9[%c5_220, %447, %c0_221] : memref<6x64x32xf32, #tpu.memory_space<vmem>>, vector<1x8x32xf32>
    %449 = vector.shape_cast %448 : vector<1x8x32xf32> to vector<8x32xf32>
    %cst_222 = arith.constant dense<0.000000e+00> : vector<8x32xf32>
    %450 = tpu.matmul %393, %68, %cst_222 {dimension_numbers = #tpu.dot_dimension_numbers<[1], [0], [0], [1], [0, 0, 1, 1], [], []>} : vector<8x32xf32>, vector<32x32xf32>, vector<8x32xf32> -> vector<8x32xf32>
    %451 = arith.addf %443, %450 : vector<8x32xf32>
    %452 = arith.negf %451 : vector<8x32xf32>
    %453 = math.exp %452 : vector<8x32xf32>
    %cst_223 = arith.constant 1.000000e+00 : f32
    %454 = vector.broadcast %cst_223 : f32 to vector<8x32xf32>
    %455 = arith.addf %454, %453 : vector<8x32xf32>
    %456 = arith.divf %454, %455 : vector<8x32xf32>
    %cst_224 = arith.constant dense<0.000000e+00> : vector<8x32xf32>
    %457 = tpu.matmul %393, %70, %cst_224 {dimension_numbers = #tpu.dot_dimension_numbers<[1], [0], [0], [1], [0, 0, 1, 1], [], []>} : vector<8x32xf32>, vector<32x32xf32>, vector<8x32xf32> -> vector<8x32xf32>
    %458 = arith.addf %446, %457 : vector<8x32xf32>
    %459 = arith.negf %458 : vector<8x32xf32>
    %460 = math.exp %459 : vector<8x32xf32>
    %cst_225 = arith.constant 1.000000e+00 : f32
    %461 = vector.broadcast %cst_225 : f32 to vector<8x32xf32>
    %462 = arith.addf %461, %460 : vector<8x32xf32>
    %463 = arith.divf %461, %462 : vector<8x32xf32>
    %cst_226 = arith.constant dense<0.000000e+00> : vector<8x32xf32>
    %464 = tpu.matmul %393, %72, %cst_226 {dimension_numbers = #tpu.dot_dimension_numbers<[1], [0], [0], [1], [0, 0, 1, 1], [], []>} : vector<8x32xf32>, vector<32x32xf32>, vector<8x32xf32> -> vector<8x32xf32>
    %465 = vector.broadcast %76 : vector<1x32xf32> to vector<8x32xf32>
    %466 = arith.addf %464, %465 : vector<8x32xf32>
    %467 = arith.mulf %456, %466 : vector<8x32xf32>
    %468 = arith.addf %449, %467 : vector<8x32xf32>
    %469 = math.tanh %468 : vector<8x32xf32>
    %cst_227 = arith.constant 1.000000e+00 : f32
    %470 = vector.broadcast %cst_227 : f32 to vector<8x32xf32>
    %471 = arith.subf %470, %463 : vector<8x32xf32>
    %472 = arith.mulf %471, %469 : vector<8x32xf32>
    %473 = arith.mulf %463, %393 : vector<8x32xf32>
    %474 = arith.addf %472, %473 : vector<8x32xf32>
    %475 = arith.index_cast %c4_i32 : i32 to index
    %c0_228 = arith.constant 0 : index
    %c0_229 = arith.constant 0 : index
    %476 = vector.load %arg7[%475, %c0_228, %c0_229] : memref<8x8x64xf32, #tpu.memory_space<vmem>>, vector<1x8x32xf32>
    %477 = vector.shape_cast %476 : vector<1x8x32xf32> to vector<8x32xf32>
    %478 = vector.shape_cast %440 : vector<8x32xf32> to vector<1x8x32xf32>
    tpu.vector_store %arg7[%475, %c0_228, %c0_229], %478 {strides = array<i32>} : memref<8x8x64xf32, #tpu.memory_space<vmem>>, vector<1x8x32xf32>,
    %479 = arith.index_cast %402 : i32 to index
    %c0_230 = arith.constant 0 : index
    %c32_231 = arith.constant 32 : index
    %480 = vector.load %arg7[%479, %c0_230, %c32_231] : memref<8x8x64xf32, #tpu.memory_space<vmem>>, vector<1x8x32xf32>
    %481 = vector.shape_cast %480 : vector<1x8x32xf32> to vector<8x32xf32>
    %482 = vector.shape_cast %474 : vector<8x32xf32> to vector<1x8x32xf32>
    tpu.vector_store %arg7[%479, %c0_230, %c32_231], %482 {strides = array<i32>} : memref<8x8x64xf32, #tpu.memory_space<vmem>>, vector<1x8x32xf32>,
    %c5_i32 = arith.constant 5 : i32
    %c7_i32_232 = arith.constant 7 : i32
    %483 = arith.subi %c7_i32_232, %c5_i32 : i32
    %c8_i32_233 = arith.constant 8 : i32
    %484 = arith.muli %c5_i32, %c8_i32_233 : i32
    %485 = tpu.assume_multiple %484, 8 : i32
    %c8_i32_234 = arith.constant 8 : i32
    %486 = arith.muli %483, %c8_i32_234 : i32
    %487 = tpu.assume_multiple %486, 8 : i32
    %c0_235 = arith.constant 0 : index
    %488 = arith.index_cast %485 : i32 to index
    %c0_236 = arith.constant 0 : index
    %489 = vector.load %arg9[%c0_235, %488, %c0_236] : memref<6x64x32xf32, #tpu.memory_space<vmem>>, vector<1x8x32xf32>
    %490 = vector.shape_cast %489 : vector<1x8x32xf32> to vector<8x32xf32>
    %c1_237 = arith.constant 1 : index
    %491 = arith.index_cast %485 : i32 to index
    %c0_238 = arith.constant 0 : index
    %492 = vector.load %arg9[%c1_237, %491, %c0_238] : memref<6x64x32xf32, #tpu.memory_space<vmem>>, vector<1x8x32xf32>
    %493 = vector.shape_cast %492 : vector<1x8x32xf32> to vector<8x32xf32>
    %c2_239 = arith.constant 2 : index
    %494 = arith.index_cast %485 : i32 to index
    %c0_240 = arith.constant 0 : index
    %495 = vector.load %arg9[%c2_239, %494, %c0_240] : memref<6x64x32xf32, #tpu.memory_space<vmem>>, vector<1x8x32xf32>
    %496 = vector.shape_cast %495 : vector<1x8x32xf32> to vector<8x32xf32>
    %cst_241 = arith.constant dense<0.000000e+00> : vector<8x32xf32>
    %497 = tpu.matmul %440, %62, %cst_241 {dimension_numbers = #tpu.dot_dimension_numbers<[1], [0], [0], [1], [0, 0, 1, 1], [], []>} : vector<8x32xf32>, vector<32x32xf32>, vector<8x32xf32> -> vector<8x32xf32>
    %498 = arith.addf %490, %497 : vector<8x32xf32>
    %499 = arith.negf %498 : vector<8x32xf32>
    %500 = math.exp %499 : vector<8x32xf32>
    %cst_242 = arith.constant 1.000000e+00 : f32
    %501 = vector.broadcast %cst_242 : f32 to vector<8x32xf32>
    %502 = arith.addf %501, %500 : vector<8x32xf32>
    %503 = arith.divf %501, %502 : vector<8x32xf32>
    %cst_243 = arith.constant dense<0.000000e+00> : vector<8x32xf32>
    %504 = tpu.matmul %440, %64, %cst_243 {dimension_numbers = #tpu.dot_dimension_numbers<[1], [0], [0], [1], [0, 0, 1, 1], [], []>} : vector<8x32xf32>, vector<32x32xf32>, vector<8x32xf32> -> vector<8x32xf32>
    %505 = arith.addf %493, %504 : vector<8x32xf32>
    %506 = arith.negf %505 : vector<8x32xf32>
    %507 = math.exp %506 : vector<8x32xf32>
    %cst_244 = arith.constant 1.000000e+00 : f32
    %508 = vector.broadcast %cst_244 : f32 to vector<8x32xf32>
    %509 = arith.addf %508, %507 : vector<8x32xf32>
    %510 = arith.divf %508, %509 : vector<8x32xf32>
    %cst_245 = arith.constant dense<0.000000e+00> : vector<8x32xf32>
    %511 = tpu.matmul %440, %66, %cst_245 {dimension_numbers = #tpu.dot_dimension_numbers<[1], [0], [0], [1], [0, 0, 1, 1], [], []>} : vector<8x32xf32>, vector<32x32xf32>, vector<8x32xf32> -> vector<8x32xf32>
    %512 = vector.broadcast %74 : vector<1x32xf32> to vector<8x32xf32>
    %513 = arith.addf %511, %512 : vector<8x32xf32>
    %514 = arith.mulf %503, %513 : vector<8x32xf32>
    %515 = arith.addf %496, %514 : vector<8x32xf32>
    %516 = math.tanh %515 : vector<8x32xf32>
    %cst_246 = arith.constant 1.000000e+00 : f32
    %517 = vector.broadcast %cst_246 : f32 to vector<8x32xf32>
    %518 = arith.subf %517, %510 : vector<8x32xf32>
    %519 = arith.mulf %518, %516 : vector<8x32xf32>
    %520 = arith.mulf %510, %440 : vector<8x32xf32>
    %521 = arith.addf %519, %520 : vector<8x32xf32>
    %c3_247 = arith.constant 3 : index
    %522 = arith.index_cast %487 : i32 to index
    %c0_248 = arith.constant 0 : index
    %523 = vector.load %arg9[%c3_247, %522, %c0_248] : memref<6x64x32xf32, #tpu.memory_space<vmem>>, vector<1x8x32xf32>
    %524 = vector.shape_cast %523 : vector<1x8x32xf32> to vector<8x32xf32>
    %c4_249 = arith.constant 4 : index
    %525 = arith.index_cast %487 : i32 to index
    %c0_250 = arith.constant 0 : index
    %526 = vector.load %arg9[%c4_249, %525, %c0_250] : memref<6x64x32xf32, #tpu.memory_space<vmem>>, vector<1x8x32xf32>
    %527 = vector.shape_cast %526 : vector<1x8x32xf32> to vector<8x32xf32>
    %c5_251 = arith.constant 5 : index
    %528 = arith.index_cast %487 : i32 to index
    %c0_252 = arith.constant 0 : index
    %529 = vector.load %arg9[%c5_251, %528, %c0_252] : memref<6x64x32xf32, #tpu.memory_space<vmem>>, vector<1x8x32xf32>
    %530 = vector.shape_cast %529 : vector<1x8x32xf32> to vector<8x32xf32>
    %cst_253 = arith.constant dense<0.000000e+00> : vector<8x32xf32>
    %531 = tpu.matmul %474, %68, %cst_253 {dimension_numbers = #tpu.dot_dimension_numbers<[1], [0], [0], [1], [0, 0, 1, 1], [], []>} : vector<8x32xf32>, vector<32x32xf32>, vector<8x32xf32> -> vector<8x32xf32>
    %532 = arith.addf %524, %531 : vector<8x32xf32>
    %533 = arith.negf %532 : vector<8x32xf32>
    %534 = math.exp %533 : vector<8x32xf32>
    %cst_254 = arith.constant 1.000000e+00 : f32
    %535 = vector.broadcast %cst_254 : f32 to vector<8x32xf32>
    %536 = arith.addf %535, %534 : vector<8x32xf32>
    %537 = arith.divf %535, %536 : vector<8x32xf32>
    %cst_255 = arith.constant dense<0.000000e+00> : vector<8x32xf32>
    %538 = tpu.matmul %474, %70, %cst_255 {dimension_numbers = #tpu.dot_dimension_numbers<[1], [0], [0], [1], [0, 0, 1, 1], [], []>} : vector<8x32xf32>, vector<32x32xf32>, vector<8x32xf32> -> vector<8x32xf32>
    %539 = arith.addf %527, %538 : vector<8x32xf32>
    %540 = arith.negf %539 : vector<8x32xf32>
    %541 = math.exp %540 : vector<8x32xf32>
    %cst_256 = arith.constant 1.000000e+00 : f32
    %542 = vector.broadcast %cst_256 : f32 to vector<8x32xf32>
    %543 = arith.addf %542, %541 : vector<8x32xf32>
    %544 = arith.divf %542, %543 : vector<8x32xf32>
    %cst_257 = arith.constant dense<0.000000e+00> : vector<8x32xf32>
    %545 = tpu.matmul %474, %72, %cst_257 {dimension_numbers = #tpu.dot_dimension_numbers<[1], [0], [0], [1], [0, 0, 1, 1], [], []>} : vector<8x32xf32>, vector<32x32xf32>, vector<8x32xf32> -> vector<8x32xf32>
    %546 = vector.broadcast %76 : vector<1x32xf32> to vector<8x32xf32>
    %547 = arith.addf %545, %546 : vector<8x32xf32>
    %548 = arith.mulf %537, %547 : vector<8x32xf32>
    %549 = arith.addf %530, %548 : vector<8x32xf32>
    %550 = math.tanh %549 : vector<8x32xf32>
    %cst_258 = arith.constant 1.000000e+00 : f32
    %551 = vector.broadcast %cst_258 : f32 to vector<8x32xf32>
    %552 = arith.subf %551, %544 : vector<8x32xf32>
    %553 = arith.mulf %552, %550 : vector<8x32xf32>
    %554 = arith.mulf %544, %474 : vector<8x32xf32>
    %555 = arith.addf %553, %554 : vector<8x32xf32>
    %556 = arith.index_cast %c5_i32 : i32 to index
    %c0_259 = arith.constant 0 : index
    %c0_260 = arith.constant 0 : index
    %557 = vector.load %arg7[%556, %c0_259, %c0_260] : memref<8x8x64xf32, #tpu.memory_space<vmem>>, vector<1x8x32xf32>
    %558 = vector.shape_cast %557 : vector<1x8x32xf32> to vector<8x32xf32>
    %559 = vector.shape_cast %521 : vector<8x32xf32> to vector<1x8x32xf32>
    tpu.vector_store %arg7[%556, %c0_259, %c0_260], %559 {strides = array<i32>} : memref<8x8x64xf32, #tpu.memory_space<vmem>>, vector<1x8x32xf32>,
    %560 = arith.index_cast %483 : i32 to index
    %c0_261 = arith.constant 0 : index
    %c32_262 = arith.constant 32 : index
    %561 = vector.load %arg7[%560, %c0_261, %c32_262] : memref<8x8x64xf32, #tpu.memory_space<vmem>>, vector<1x8x32xf32>
    %562 = vector.shape_cast %561 : vector<1x8x32xf32> to vector<8x32xf32>
    %563 = vector.shape_cast %555 : vector<8x32xf32> to vector<1x8x32xf32>
    tpu.vector_store %arg7[%560, %c0_261, %c32_262], %563 {strides = array<i32>} : memref<8x8x64xf32, #tpu.memory_space<vmem>>, vector<1x8x32xf32>,
    %c6_i32 = arith.constant 6 : i32
    %c7_i32_263 = arith.constant 7 : i32
    %564 = arith.subi %c7_i32_263, %c6_i32 : i32
    %c8_i32_264 = arith.constant 8 : i32
    %565 = arith.muli %c6_i32, %c8_i32_264 : i32
    %566 = tpu.assume_multiple %565, 8 : i32
    %c8_i32_265 = arith.constant 8 : i32
    %567 = arith.muli %564, %c8_i32_265 : i32
    %568 = tpu.assume_multiple %567, 8 : i32
    %c0_266 = arith.constant 0 : index
    %569 = arith.index_cast %566 : i32 to index
    %c0_267 = arith.constant 0 : index
    %570 = vector.load %arg9[%c0_266, %569, %c0_267] : memref<6x64x32xf32, #tpu.memory_space<vmem>>, vector<1x8x32xf32>
    %571 = vector.shape_cast %570 : vector<1x8x32xf32> to vector<8x32xf32>
    %c1_268 = arith.constant 1 : index
    %572 = arith.index_cast %566 : i32 to index
    %c0_269 = arith.constant 0 : index
    %573 = vector.load %arg9[%c1_268, %572, %c0_269] : memref<6x64x32xf32, #tpu.memory_space<vmem>>, vector<1x8x32xf32>
    %574 = vector.shape_cast %573 : vector<1x8x32xf32> to vector<8x32xf32>
    %c2_270 = arith.constant 2 : index
    %575 = arith.index_cast %566 : i32 to index
    %c0_271 = arith.constant 0 : index
    %576 = vector.load %arg9[%c2_270, %575, %c0_271] : memref<6x64x32xf32, #tpu.memory_space<vmem>>, vector<1x8x32xf32>
    %577 = vector.shape_cast %576 : vector<1x8x32xf32> to vector<8x32xf32>
    %cst_272 = arith.constant dense<0.000000e+00> : vector<8x32xf32>
    %578 = tpu.matmul %521, %62, %cst_272 {dimension_numbers = #tpu.dot_dimension_numbers<[1], [0], [0], [1], [0, 0, 1, 1], [], []>} : vector<8x32xf32>, vector<32x32xf32>, vector<8x32xf32> -> vector<8x32xf32>
    %579 = arith.addf %571, %578 : vector<8x32xf32>
    %580 = arith.negf %579 : vector<8x32xf32>
    %581 = math.exp %580 : vector<8x32xf32>
    %cst_273 = arith.constant 1.000000e+00 : f32
    %582 = vector.broadcast %cst_273 : f32 to vector<8x32xf32>
    %583 = arith.addf %582, %581 : vector<8x32xf32>
    %584 = arith.divf %582, %583 : vector<8x32xf32>
    %cst_274 = arith.constant dense<0.000000e+00> : vector<8x32xf32>
    %585 = tpu.matmul %521, %64, %cst_274 {dimension_numbers = #tpu.dot_dimension_numbers<[1], [0], [0], [1], [0, 0, 1, 1], [], []>} : vector<8x32xf32>, vector<32x32xf32>, vector<8x32xf32> -> vector<8x32xf32>
    %586 = arith.addf %574, %585 : vector<8x32xf32>
    %587 = arith.negf %586 : vector<8x32xf32>
    %588 = math.exp %587 : vector<8x32xf32>
    %cst_275 = arith.constant 1.000000e+00 : f32
    %589 = vector.broadcast %cst_275 : f32 to vector<8x32xf32>
    %590 = arith.addf %589, %588 : vector<8x32xf32>
    %591 = arith.divf %589, %590 : vector<8x32xf32>
    %cst_276 = arith.constant dense<0.000000e+00> : vector<8x32xf32>
    %592 = tpu.matmul %521, %66, %cst_276 {dimension_numbers = #tpu.dot_dimension_numbers<[1], [0], [0], [1], [0, 0, 1, 1], [], []>} : vector<8x32xf32>, vector<32x32xf32>, vector<8x32xf32> -> vector<8x32xf32>
    %593 = vector.broadcast %74 : vector<1x32xf32> to vector<8x32xf32>
    %594 = arith.addf %592, %593 : vector<8x32xf32>
    %595 = arith.mulf %584, %594 : vector<8x32xf32>
    %596 = arith.addf %577, %595 : vector<8x32xf32>
    %597 = math.tanh %596 : vector<8x32xf32>
    %cst_277 = arith.constant 1.000000e+00 : f32
    %598 = vector.broadcast %cst_277 : f32 to vector<8x32xf32>
    %599 = arith.subf %598, %591 : vector<8x32xf32>
    %600 = arith.mulf %599, %597 : vector<8x32xf32>
    %601 = arith.mulf %591, %521 : vector<8x32xf32>
    %602 = arith.addf %600, %601 : vector<8x32xf32>
    %c3_278 = arith.constant 3 : index
    %603 = arith.index_cast %568 : i32 to index
    %c0_279 = arith.constant 0 : index
    %604 = vector.load %arg9[%c3_278, %603, %c0_279] : memref<6x64x32xf32, #tpu.memory_space<vmem>>, vector<1x8x32xf32>
    %605 = vector.shape_cast %604 : vector<1x8x32xf32> to vector<8x32xf32>
    %c4_280 = arith.constant 4 : index
    %606 = arith.index_cast %568 : i32 to index
    %c0_281 = arith.constant 0 : index
    %607 = vector.load %arg9[%c4_280, %606, %c0_281] : memref<6x64x32xf32, #tpu.memory_space<vmem>>, vector<1x8x32xf32>
    %608 = vector.shape_cast %607 : vector<1x8x32xf32> to vector<8x32xf32>
    %c5_282 = arith.constant 5 : index
    %609 = arith.index_cast %568 : i32 to index
    %c0_283 = arith.constant 0 : index
    %610 = vector.load %arg9[%c5_282, %609, %c0_283] : memref<6x64x32xf32, #tpu.memory_space<vmem>>, vector<1x8x32xf32>
    %611 = vector.shape_cast %610 : vector<1x8x32xf32> to vector<8x32xf32>
    %cst_284 = arith.constant dense<0.000000e+00> : vector<8x32xf32>
    %612 = tpu.matmul %555, %68, %cst_284 {dimension_numbers = #tpu.dot_dimension_numbers<[1], [0], [0], [1], [0, 0, 1, 1], [], []>} : vector<8x32xf32>, vector<32x32xf32>, vector<8x32xf32> -> vector<8x32xf32>
    %613 = arith.addf %605, %612 : vector<8x32xf32>
    %614 = arith.negf %613 : vector<8x32xf32>
    %615 = math.exp %614 : vector<8x32xf32>
    %cst_285 = arith.constant 1.000000e+00 : f32
    %616 = vector.broadcast %cst_285 : f32 to vector<8x32xf32>
    %617 = arith.addf %616, %615 : vector<8x32xf32>
    %618 = arith.divf %616, %617 : vector<8x32xf32>
    %cst_286 = arith.constant dense<0.000000e+00> : vector<8x32xf32>
    %619 = tpu.matmul %555, %70, %cst_286 {dimension_numbers = #tpu.dot_dimension_numbers<[1], [0], [0], [1], [0, 0, 1, 1], [], []>} : vector<8x32xf32>, vector<32x32xf32>, vector<8x32xf32> -> vector<8x32xf32>
    %620 = arith.addf %608, %619 : vector<8x32xf32>
    %621 = arith.negf %620 : vector<8x32xf32>
    %622 = math.exp %621 : vector<8x32xf32>
    %cst_287 = arith.constant 1.000000e+00 : f32
    %623 = vector.broadcast %cst_287 : f32 to vector<8x32xf32>
    %624 = arith.addf %623, %622 : vector<8x32xf32>
    %625 = arith.divf %623, %624 : vector<8x32xf32>
    %cst_288 = arith.constant dense<0.000000e+00> : vector<8x32xf32>
    %626 = tpu.matmul %555, %72, %cst_288 {dimension_numbers = #tpu.dot_dimension_numbers<[1], [0], [0], [1], [0, 0, 1, 1], [], []>} : vector<8x32xf32>, vector<32x32xf32>, vector<8x32xf32> -> vector<8x32xf32>
    %627 = vector.broadcast %76 : vector<1x32xf32> to vector<8x32xf32>
    %628 = arith.addf %626, %627 : vector<8x32xf32>
    %629 = arith.mulf %618, %628 : vector<8x32xf32>
    %630 = arith.addf %611, %629 : vector<8x32xf32>
    %631 = math.tanh %630 : vector<8x32xf32>
    %cst_289 = arith.constant 1.000000e+00 : f32
    %632 = vector.broadcast %cst_289 : f32 to vector<8x32xf32>
    %633 = arith.subf %632, %625 : vector<8x32xf32>
    %634 = arith.mulf %633, %631 : vector<8x32xf32>
    %635 = arith.mulf %625, %555 : vector<8x32xf32>
    %636 = arith.addf %634, %635 : vector<8x32xf32>
    %637 = arith.index_cast %c6_i32 : i32 to index
    %c0_290 = arith.constant 0 : index
    %c0_291 = arith.constant 0 : index
    %638 = vector.load %arg7[%637, %c0_290, %c0_291] : memref<8x8x64xf32, #tpu.memory_space<vmem>>, vector<1x8x32xf32>
    %639 = vector.shape_cast %638 : vector<1x8x32xf32> to vector<8x32xf32>
    %640 = vector.shape_cast %602 : vector<8x32xf32> to vector<1x8x32xf32>
    tpu.vector_store %arg7[%637, %c0_290, %c0_291], %640 {strides = array<i32>} : memref<8x8x64xf32, #tpu.memory_space<vmem>>, vector<1x8x32xf32>,
    %641 = arith.index_cast %564 : i32 to index
    %c0_292 = arith.constant 0 : index
    %c32_293 = arith.constant 32 : index
    %642 = vector.load %arg7[%641, %c0_292, %c32_293] : memref<8x8x64xf32, #tpu.memory_space<vmem>>, vector<1x8x32xf32>
    %643 = vector.shape_cast %642 : vector<1x8x32xf32> to vector<8x32xf32>
    %644 = vector.shape_cast %636 : vector<8x32xf32> to vector<1x8x32xf32>
    tpu.vector_store %arg7[%641, %c0_292, %c32_293], %644 {strides = array<i32>} : memref<8x8x64xf32, #tpu.memory_space<vmem>>, vector<1x8x32xf32>,
    %c7_i32_294 = arith.constant 7 : i32
    %c7_i32_295 = arith.constant 7 : i32
    %645 = arith.subi %c7_i32_295, %c7_i32_294 : i32
    %c8_i32_296 = arith.constant 8 : i32
    %646 = arith.muli %c7_i32_294, %c8_i32_296 : i32
    %647 = tpu.assume_multiple %646, 8 : i32
    %c8_i32_297 = arith.constant 8 : i32
    %648 = arith.muli %645, %c8_i32_297 : i32
    %649 = tpu.assume_multiple %648, 8 : i32
    %c0_298 = arith.constant 0 : index
    %650 = arith.index_cast %647 : i32 to index
    %c0_299 = arith.constant 0 : index
    %651 = vector.load %arg9[%c0_298, %650, %c0_299] : memref<6x64x32xf32, #tpu.memory_space<vmem>>, vector<1x8x32xf32>
    %652 = vector.shape_cast %651 : vector<1x8x32xf32> to vector<8x32xf32>
    %c1_300 = arith.constant 1 : index
    %653 = arith.index_cast %647 : i32 to index
    %c0_301 = arith.constant 0 : index
    %654 = vector.load %arg9[%c1_300, %653, %c0_301] : memref<6x64x32xf32, #tpu.memory_space<vmem>>, vector<1x8x32xf32>
    %655 = vector.shape_cast %654 : vector<1x8x32xf32> to vector<8x32xf32>
    %c2_302 = arith.constant 2 : index
    %656 = arith.index_cast %647 : i32 to index
    %c0_303 = arith.constant 0 : index
    %657 = vector.load %arg9[%c2_302, %656, %c0_303] : memref<6x64x32xf32, #tpu.memory_space<vmem>>, vector<1x8x32xf32>
    %658 = vector.shape_cast %657 : vector<1x8x32xf32> to vector<8x32xf32>
    %cst_304 = arith.constant dense<0.000000e+00> : vector<8x32xf32>
    %659 = tpu.matmul %602, %62, %cst_304 {dimension_numbers = #tpu.dot_dimension_numbers<[1], [0], [0], [1], [0, 0, 1, 1], [], []>} : vector<8x32xf32>, vector<32x32xf32>, vector<8x32xf32> -> vector<8x32xf32>
    %660 = arith.addf %652, %659 : vector<8x32xf32>
    %661 = arith.negf %660 : vector<8x32xf32>
    %662 = math.exp %661 : vector<8x32xf32>
    %cst_305 = arith.constant 1.000000e+00 : f32
    %663 = vector.broadcast %cst_305 : f32 to vector<8x32xf32>
    %664 = arith.addf %663, %662 : vector<8x32xf32>
    %665 = arith.divf %663, %664 : vector<8x32xf32>
    %cst_306 = arith.constant dense<0.000000e+00> : vector<8x32xf32>
    %666 = tpu.matmul %602, %64, %cst_306 {dimension_numbers = #tpu.dot_dimension_numbers<[1], [0], [0], [1], [0, 0, 1, 1], [], []>} : vector<8x32xf32>, vector<32x32xf32>, vector<8x32xf32> -> vector<8x32xf32>
    %667 = arith.addf %655, %666 : vector<8x32xf32>
    %668 = arith.negf %667 : vector<8x32xf32>
    %669 = math.exp %668 : vector<8x32xf32>
    %cst_307 = arith.constant 1.000000e+00 : f32
    %670 = vector.broadcast %cst_307 : f32 to vector<8x32xf32>
    %671 = arith.addf %670, %669 : vector<8x32xf32>
    %672 = arith.divf %670, %671 : vector<8x32xf32>
    %cst_308 = arith.constant dense<0.000000e+00> : vector<8x32xf32>
    %673 = tpu.matmul %602, %66, %cst_308 {dimension_numbers = #tpu.dot_dimension_numbers<[1], [0], [0], [1], [0, 0, 1, 1], [], []>} : vector<8x32xf32>, vector<32x32xf32>, vector<8x32xf32> -> vector<8x32xf32>
    %674 = vector.broadcast %74 : vector<1x32xf32> to vector<8x32xf32>
    %675 = arith.addf %673, %674 : vector<8x32xf32>
    %676 = arith.mulf %665, %675 : vector<8x32xf32>
    %677 = arith.addf %658, %676 : vector<8x32xf32>
    %678 = math.tanh %677 : vector<8x32xf32>
    %cst_309 = arith.constant 1.000000e+00 : f32
    %679 = vector.broadcast %cst_309 : f32 to vector<8x32xf32>
    %680 = arith.subf %679, %672 : vector<8x32xf32>
    %681 = arith.mulf %680, %678 : vector<8x32xf32>
    %682 = arith.mulf %672, %602 : vector<8x32xf32>
    %683 = arith.addf %681, %682 : vector<8x32xf32>
    %c3_310 = arith.constant 3 : index
    %684 = arith.index_cast %649 : i32 to index
    %c0_311 = arith.constant 0 : index
    %685 = vector.load %arg9[%c3_310, %684, %c0_311] : memref<6x64x32xf32, #tpu.memory_space<vmem>>, vector<1x8x32xf32>
    %686 = vector.shape_cast %685 : vector<1x8x32xf32> to vector<8x32xf32>
    %c4_312 = arith.constant 4 : index
    %687 = arith.index_cast %649 : i32 to index
    %c0_313 = arith.constant 0 : index
    %688 = vector.load %arg9[%c4_312, %687, %c0_313] : memref<6x64x32xf32, #tpu.memory_space<vmem>>, vector<1x8x32xf32>
    %689 = vector.shape_cast %688 : vector<1x8x32xf32> to vector<8x32xf32>
    %c5_314 = arith.constant 5 : index
    %690 = arith.index_cast %649 : i32 to index
    %c0_315 = arith.constant 0 : index
    %691 = vector.load %arg9[%c5_314, %690, %c0_315] : memref<6x64x32xf32, #tpu.memory_space<vmem>>, vector<1x8x32xf32>
    %692 = vector.shape_cast %691 : vector<1x8x32xf32> to vector<8x32xf32>
    %cst_316 = arith.constant dense<0.000000e+00> : vector<8x32xf32>
    %693 = tpu.matmul %636, %68, %cst_316 {dimension_numbers = #tpu.dot_dimension_numbers<[1], [0], [0], [1], [0, 0, 1, 1], [], []>} : vector<8x32xf32>, vector<32x32xf32>, vector<8x32xf32> -> vector<8x32xf32>
    %694 = arith.addf %686, %693 : vector<8x32xf32>
    %695 = arith.negf %694 : vector<8x32xf32>
    %696 = math.exp %695 : vector<8x32xf32>
    %cst_317 = arith.constant 1.000000e+00 : f32
    %697 = vector.broadcast %cst_317 : f32 to vector<8x32xf32>
    %698 = arith.addf %697, %696 : vector<8x32xf32>
    %699 = arith.divf %697, %698 : vector<8x32xf32>
    %cst_318 = arith.constant dense<0.000000e+00> : vector<8x32xf32>
    %700 = tpu.matmul %636, %70, %cst_318 {dimension_numbers = #tpu.dot_dimension_numbers<[1], [0], [0], [1], [0, 0, 1, 1], [], []>} : vector<8x32xf32>, vector<32x32xf32>, vector<8x32xf32> -> vector<8x32xf32>
    %701 = arith.addf %689, %700 : vector<8x32xf32>
    %702 = arith.negf %701 : vector<8x32xf32>
    %703 = math.exp %702 : vector<8x32xf32>
    %cst_319 = arith.constant 1.000000e+00 : f32
    %704 = vector.broadcast %cst_319 : f32 to vector<8x32xf32>
    %705 = arith.addf %704, %703 : vector<8x32xf32>
    %706 = arith.divf %704, %705 : vector<8x32xf32>
    %cst_320 = arith.constant dense<0.000000e+00> : vector<8x32xf32>
    %707 = tpu.matmul %636, %72, %cst_320 {dimension_numbers = #tpu.dot_dimension_numbers<[1], [0], [0], [1], [0, 0, 1, 1], [], []>} : vector<8x32xf32>, vector<32x32xf32>, vector<8x32xf32> -> vector<8x32xf32>
    %708 = vector.broadcast %76 : vector<1x32xf32> to vector<8x32xf32>
    %709 = arith.addf %707, %708 : vector<8x32xf32>
    %710 = arith.mulf %699, %709 : vector<8x32xf32>
    %711 = arith.addf %692, %710 : vector<8x32xf32>
    %712 = math.tanh %711 : vector<8x32xf32>
    %cst_321 = arith.constant 1.000000e+00 : f32
    %713 = vector.broadcast %cst_321 : f32 to vector<8x32xf32>
    %714 = arith.subf %713, %706 : vector<8x32xf32>
    %715 = arith.mulf %714, %712 : vector<8x32xf32>
    %716 = arith.mulf %706, %636 : vector<8x32xf32>
    %717 = arith.addf %715, %716 : vector<8x32xf32>
    %718 = arith.index_cast %c7_i32_294 : i32 to index
    %c0_322 = arith.constant 0 : index
    %c0_323 = arith.constant 0 : index
    %719 = vector.load %arg7[%718, %c0_322, %c0_323] : memref<8x8x64xf32, #tpu.memory_space<vmem>>, vector<1x8x32xf32>
    %720 = vector.shape_cast %719 : vector<1x8x32xf32> to vector<8x32xf32>
    %721 = vector.shape_cast %683 : vector<8x32xf32> to vector<1x8x32xf32>
    tpu.vector_store %arg7[%718, %c0_322, %c0_323], %721 {strides = array<i32>} : memref<8x8x64xf32, #tpu.memory_space<vmem>>, vector<1x8x32xf32>,
    %722 = arith.index_cast %645 : i32 to index
    %c0_324 = arith.constant 0 : index
    %c32_325 = arith.constant 32 : index
    %723 = vector.load %arg7[%722, %c0_324, %c32_325] : memref<8x8x64xf32, #tpu.memory_space<vmem>>, vector<1x8x32xf32>
    %724 = vector.shape_cast %723 : vector<1x8x32xf32> to vector<8x32xf32>
    %725 = vector.shape_cast %717 : vector<8x32xf32> to vector<1x8x32xf32>
    tpu.vector_store %arg7[%722, %c0_324, %c32_325], %725 {strides = array<i32>} : memref<8x8x64xf32, #tpu.memory_space<vmem>>, vector<1x8x32xf32>,
    %c8_i32_326 = arith.constant 8 : i32
    %c0_327 = arith.constant 0 : index
    %c0_328 = arith.constant 0 : index
    %c0_329 = arith.constant 0 : index
    %726 = vector.load %arg5[%c0_327, %c0_328, %c0_329] : memref<2x32x32xf32, #tpu.memory_space<vmem>>, vector<1x32x32xf32>
    %727 = vector.shape_cast %726 : vector<1x32x32xf32> to vector<32x32xf32>
    %cst_330 = arith.constant dense<0.000000e+00> : vector<8x32xf32>
    %728 = tpu.matmul %683, %727, %cst_330 {dimension_numbers = #tpu.dot_dimension_numbers<[1], [0], [0], [1], [0, 0, 1, 1], [], []>} : vector<8x32xf32>, vector<32x32xf32>, vector<8x32xf32> -> vector<8x32xf32>
    %c1_331 = arith.constant 1 : index
    %c0_332 = arith.constant 0 : index
    %c0_333 = arith.constant 0 : index
    %729 = vector.load %arg5[%c1_331, %c0_332, %c0_333] : memref<2x32x32xf32, #tpu.memory_space<vmem>>, vector<1x32x32xf32>
    %730 = vector.shape_cast %729 : vector<1x32x32xf32> to vector<32x32xf32>
    %cst_334 = arith.constant dense<0.000000e+00> : vector<8x32xf32>
    %731 = tpu.matmul %717, %730, %cst_334 {dimension_numbers = #tpu.dot_dimension_numbers<[1], [0], [0], [1], [0, 0, 1, 1], [], []>} : vector<8x32xf32>, vector<32x32xf32>, vector<8x32xf32> -> vector<8x32xf32>
    %732 = arith.addf %728, %731 : vector<8x32xf32>
    %c0_335 = arith.constant 0 : index
    %c0_336 = arith.constant 0 : index
    %733 = vector.load %arg6[%c0_335, %c0_336] : memref<1x32xf32, #tpu.memory_space<vmem>>, vector<1x32xf32>
    %734 = vector.broadcast %733 : vector<1x32xf32> to vector<8x32xf32>
    %735 = arith.addf %732, %734 : vector<8x32xf32>
    %736 = math.tanh %735 : vector<8x32xf32>
    %c0_337 = arith.constant 0 : index
    %c0_338 = arith.constant 0 : index
    %737 = vector.load %arg8[%c0_337, %c0_338] : memref<8x32xf32, #tpu.memory_space<vmem>>, vector<8x32xf32>
    tpu.vector_store %arg8[%c0_337, %c0_338], %736 {strides = array<i32>} : memref<8x32xf32, #tpu.memory_space<vmem>>, vector<8x32xf32>,
    return
  }
}

</mosaic_0001>

<bundles_post_ra>
// kernel: encoder_forward.1
= control target key start
LH: loop header
LB: loop body
LE: loop exit
PB: predicated region body
PF: predicated region fallthrough
CT: control target
= control target key end

     0   :  { %vm47_vm0 = vcmask 261120   ;;  %v6706_v44 = vmov 0.0|0.0   ;;  %vm6707_vm1 = vmmov 0   ;;  %v6708_v61 = vmov 0.0   ;;  %s6709_s17 = smov 32   ;;  %s7708_s1 = inlined_call_operand.vmem [shape: f32[6,32,32], index: 1, kind: input, shape index: {}]   ;;  %s7709_s0 = inlined_call_operand.vmem [shape: f32[64,32], index: 0, kind: input, shape index: {}]   ;;  %s7710_s2 = inlined_call_operand.vmem [shape: f32[6,32,32], index: 2, kind: input, shape index: {}]   ;;  %s7711_s3 = inlined_call_operand.vmem [shape: f32[6,1,32], index: 3, kind: input, shape index: {}]   ;;  %s7712_s4 = inlined_call_operand.vmem [shape: f32[2,1,32], index: 4, kind: input, shape index: {}]   ;;  %s7713_s7 = inlined_call_operand.vmem [shape: f32[8,8,64], index: 7, kind: output, shape index: {0}]   ;;  %s7714_s5 = inlined_call_operand.vmem [shape: f32[2,32,32], index: 5, kind: input, shape index: {}]   ;;  %s7715_s6 = inlined_call_operand.vmem [shape: f32[1,32], index: 6, kind: input, shape index: {}]   ;;  %s7716_s8 = inlined_call_operand.vmem [shape: f32[8,32], index: 8, kind: output, shape index: {1}]  }
   0x1   :  { %v36_v0 = vld [vmem:[%s7708_s1] sm:$0xff]  ;;  %v37_v1 = vld [vmem:[%s7708_s1 + $0x8] sm:$0xff]  ;;  %v38_v5 = vld [vmem:[%s7708_s1 + $0x10] sm:$0xff]  ;;  %vm1351_vm2 = vcmask 523520  }
   0x2   :  { %v5010_v2 = vld [vmem:[%s7708_s1 + $0x20] sm:$0xff]  ;;  %v6190_v3 = vpack.c.bf16 %v37_v1, %v36_v0  ;;  %v5011_v4 = vld [vmem:[%s7708_s1 + $0x28] sm:$0xff]  ;;  %v39_v6 = vld [vmem:[%s7708_s1 + $0x18] sm:$0xff] }
   0x3   :  { %v6198_v7 = vpack.c.bf16 %v5011_v4, %v5010_v2  ;;  %v6194_v8 = vpack.c.bf16 %v39_v6, %v38_v5  ;;  %v5012_v9 = vld [vmem:[%s7708_s1 + $0x30] sm:$0xff]  ;;  %v5013_v10 = vld [vmem:[%s7708_s1 + $0x38] sm:$0xff]  ;;  %v6782_v11 = vld [vmem:[%s7709_s0] sm:$0xff] }
   0x4   :  { %6191 = vmatprep.subr.bf16.mxu0 %v6190_v3  ;;  %v6202_v12 = vpack.c.bf16 %v5013_v10, %v5012_v9  ;;  %5528 = vmatprep.mubr.msk.f32.mxu0 %vm47_vm0, %v6782_v11  ;;  %v5024_v13 = vld [vmem:[%s7708_s1 + $0x40] sm:$0xff]  ;;  %v5025_v14 = vld [vmem:[%s7708_s1 + $0x48] sm:$0xff]  ;;  %v5026_v19 = vld [vmem:[%s7708_s1 + $0x50] sm:$0xff] }
   0x5   :  { %6199 = vmatprep.subr.bf16.mxu1 %v6198_v7  ;;  %6193 = vmatpush3.bf16.msra.mxu0 %v6190_v3  ;;  %v5038_v15 = vld [vmem:[%s7708_s1 + $0x60] sm:$0xff]  ;;  %v5039_v16 = vld [vmem:[%s7708_s1 + $0x68] sm:$0xff]  ;;  %v6206_v17 = vpack.c.bf16 %v5025_v14, %v5024_v13  ;;  %v5027_v20 = vld [vmem:[%s7708_s1 + $0x58] sm:$0xff] }
   0x6   :  { %6201 = vmatpush3.bf16.msra.mxu1 %v6198_v7  ;;  %6195 = vmatprep.subr.bf16.mxu0 %v6194_v8  ;;  %v6214_v18 = vpack.c.bf16 %v5039_v16, %v5038_v15  ;;  %v6809_v21 = vld [vmem:[%s7709_s0 + $0x8] sm:$0xff]  ;;  %v5040_v22 = vld [vmem:[%s7708_s1 + $0x70] sm:$0xff]  ;;  %v5041_v23 = vld [vmem:[%s7708_s1 + $0x78] sm:$0xff]  ;;  %v6210_v25 = vpack.c.bf16 %v5027_v20, %v5026_v19 }
   0x7   :  { %6203 = vmatprep.subr.bf16.mxu1 %v6202_v12  ;;  %5548 = vmatprep.mubr.msk.f32.mxu1 %vm47_vm0, %v6782_v11  ;;  %v6820_v24 = vld [vmem:[%s7709_s0 + $0x10] sm:$0xff]  ;;  %v6218_v26 = vpack.c.bf16 %v5041_v23, %v5040_v22  ;;  %v5052_v27 = vld [vmem:[%s7708_s1 + $0x80] sm:$0xff]  ;;  %v5053_v28 = vld [vmem:[%s7708_s1 + $0x88] sm:$0xff] }
   0x8   :  { %v6835_v29 = vld [vmem:[%s7709_s0 + $0x18] sm:$0xff]  ;;  %v5066_v30 = vld [vmem:[%s7708_s1 + $0xa0] sm:$0xff]  ;;  %v5067_v31 = vld [vmem:[%s7708_s1 + $0xa8] sm:$0xff]  ;;  %v6222_v33 = vpack.c.bf16 %v5053_v28, %v5052_v27 }
   0x9   :  { %6197 = vmatpush3.bf16.msra.mxu0 %v6194_v8  ;;  %v6848_v32 = vld [vmem:[%s7709_s0 + $0x20] sm:$0xff]  ;;  %v6230_v34 = vpack.c.bf16 %v5067_v31, %v5066_v30  ;;  %v6861_v35 = vld [vmem:[%s7709_s0 + $0x28] sm:$0xff]  ;;  %v6868_v36 = vld [vmem:[%s7709_s0 + $0x30] sm:$0xff] }
   0xa   :  { %6205 = vmatpush3.bf16.msra.mxu1 %v6202_v12  ;;  %6207 = vmatprep.subr.bf16.mxu0 %v6206_v17  ;;  %v6879_v37 = vld [vmem:[%s7709_s0 + $0x38] sm:$0xff]  ;;  %v5054_v38 = vld [vmem:[%s7708_s1 + $0x90] sm:$0xff]  ;;  %v820_v45 = vld [vmem:[%s7710_s2] sm:$0xff] }
   0xb   :  { %6215 = vmatprep.subr.bf16.mxu1 %v6214_v18  ;;  %v5055_v39 = vld [vmem:[%s7708_s1 + $0x98] sm:$0xff]  ;;  %v5068_v40 = vld [vmem:[%s7708_s1 + $0xb0] sm:$0xff]  ;;  %v821_v46 = vld [vmem:[%s7710_s2 + $0x8] sm:$0xff] }
   0xc   :  { %5529 = vmatmul.mubr.msk.f32.vlgmr.msra.gmra.mrb[0].mxu0 %vm47_vm0, %v6809_v21  ;;  %v5069_v41 = vld [vmem:[%s7708_s1 + $0xb8] sm:$0xff]  ;;  %v6226_v42 = vpack.c.bf16 %v5055_v39, %v5054_v38  ;;  %v5080_v47 = vld [vmem:[%s7710_s2 + $0x20] sm:$0xff]  ;;  %v5081_v48 = vld [vmem:[%s7710_s2 + $0x28] sm:$0xff]  ;;  %v6947_v49 = vpack.c.bf16 %v821_v46, %v820_v45 }
   0xd   :  { %5549 = vmatmul.mubr.msk.f32.vlgmr.msra.gmra.mrb[0].mxu1 %vm47_vm0, %v6809_v21  ;;  %6209 = vmatpush3.bf16.msra.mxu0 %v6206_v17  ;;  %v6234_v43 = vpack.c.bf16 %v5069_v41, %v5068_v40  ;;  %v6951_v50 = vpack.c.bf16 %v5081_v48, %v5080_v47  ;;  %v822_v51 = vld [vmem:[%s7710_s2 + $0x10] sm:$0xff]  ;;  %v823_v52 = vld [vmem:[%s7710_s2 + $0x18] sm:$0xff]  ;;  %v5084_v57 = vld [vmem:[%s7710_s2 + $0x40] sm:$0xff] }
   0xe   :  { %6217 = vmatpush3.bf16.msra.mxu1 %v6214_v18  ;;  %5531 = vmatprep.mubr.msk.f32.mxu0 %vm47_vm0, %v6820_v24  ;;  %v5082_v53 = vld [vmem:[%s7710_s2 + $0x30] sm:$0xff]  ;;  %v5083_v54 = vld [vmem:[%s7710_s2 + $0x38] sm:$0xff]  ;;  %v6973_v55 = vpack.c.bf16 %v823_v52, %v822_v51  ;;  %v5085_v58 = vld [vmem:[%s7710_s2 + $0x48] sm:$0xff] }
   0xf   :  { %5551 = vmatprep.mubr.msk.f32.mxu1 %vm47_vm0, %v6820_v24  ;;  %6211 = vmatprep.subr.bf16.mxu0 %v6210_v25  ;;  %v6978_v56 = vpack.c.bf16 %v5083_v54, %v5082_v53  ;;  %v5088_v59 = vld [vmem:[%s7710_s2 + $0x60] sm:$0xff]  ;;  %v5089_v60 = vld [vmem:[%s7710_s2 + $0x68] sm:$0xff]  ;;  %v7019_v62 = vpack.c.bf16 %v5085_v58, %v5084_v57  ;;  %v5086_v0 = vld [vmem:[%s7710_s2 + $0x50] sm:$0xff] }
  0x10   :  { %5532 = vmatmul.mubr.msk.f32.gmra.mrb[2].mxu0 %vm47_vm0, %v6835_v29  ;;  %6219 = vmatprep.subr.bf16.mxu1 %v6218_v26  ;;  %v7023_v63 = vpack.c.bf16 %v5089_v60, %v5088_v59  ;;  %v5087_v1 = vld [vmem:[%s7710_s2 + $0x58] sm:$0xff]  ;;  %v5090_v2 = vld [vmem:[%s7710_s2 + $0x70] sm:$0xff]  ;;  %v5092_v6 = vld [vmem:[%s7710_s2 + $0x80] sm:$0xff] }
  0x11   :  { %5552 = vmatmul.mubr.msk.f32.gmra.mrb[2].mxu1 %vm47_vm0, %v6835_v29  ;;  %5534 = vmatprep.mubr.msk.f32.mxu0 %vm47_vm0, %v6848_v32  ;;  %v5091_v3 = vld [vmem:[%s7710_s2 + $0x78] sm:$0xff]  ;;  %v7040_v4 = vpack.c.bf16 %v5087_v1, %v5086_v0  ;;  %v5093_v7 = vld [vmem:[%s7710_s2 + $0x88] sm:$0xff]  ;;  %v5096_v8 = vld [vmem:[%s7710_s2 + $0xa0] sm:$0xff] }
  0x12   :  { %5554 = vmatprep.mubr.msk.f32.mxu1 %vm47_vm0, %v6848_v32  ;;  %6213 = vmatpush3.bf16.msra.mxu0 %v6210_v25  ;;  %v7044_v5 = vpack.c.bf16 %v5091_v3, %v5090_v2  ;;  %v5097_v9 = vld [vmem:[%s7710_s2 + $0xa8] sm:$0xff]  ;;  %v7064_v10 = vpack.c.bf16 %v5093_v7, %v5092_v6  ;;  %v5095_v12 = vld [vmem:[%s7710_s2 + $0x98] sm:$0xff]  ;;  %v5098_v14 = vld [vmem:[%s7710_s2 + $0xb0] sm:$0xff] }
  0x13   :  { %6221 = vmatpush3.bf16.msra.mxu1 %v6218_v26  ;;  %6223 = vmatprep.subr.bf16.mxu0 %v6222_v33  ;;  %v7075_v13 = vpack.c.bf16 %v5097_v9, %v5096_v8  ;;  %v5099_v15 = vld [vmem:[%s7710_s2 + $0xb8] sm:$0xff]  ;;  %v5001_v18 = vld [vmem:[%s7711_s3] ss:$0 sm:$0xff]  ;;  %v5015_v19 = vld [vmem:[%s7711_s3 + $0x1] ss:$0 sm:$0xff] }
  0x14   :  { %5535 = vmatmul.mubr.msk.f32.gmra.mrb[4].mxu0 %vm47_vm0, %v6861_v35  ;;  %6231 = vmatprep.subr.bf16.mxu1 %v6230_v34  ;;  %v7092_v17 = vpack.c.bf16 %v5099_v15, %v5098_v14  ;;  %v5029_v54 = vld [vmem:[%s7711_s3 + $0x2] ss:$0 sm:$0xff]  ;;  %v5043_v58 = vld [vmem:[%s7711_s3 + $0x3] ss:$0 sm:$0xff] }
  0x15   :  { %5555 = vmatmul.mubr.msk.f32.gmra.mrb[4].mxu1 %vm47_vm0, %v6861_v35  ;;  %5537 = vmatprep.mubr.msk.f32.mxu0 %vm47_vm0, %v6868_v36 }
  0x16   :  { %5557 = vmatprep.mubr.msk.f32.mxu1 %vm47_vm0, %v6868_v36 }
  0x18   :  { %5538 = vmatmul.mubr.msk.f32.gmra.mrb[6].mxu0 %vm47_vm0, %v6879_v37 }
  0x19   :  { %5558 = vmatmul.mubr.msk.f32.gmra.mrb[6].mxu1 %vm47_vm0, %v6879_v37  ;;  %5568 = vmatprep.mubr.msk.f32.mxu0 %vm47_vm0, %v6782_v11 }
  0x1a   :  { %5588 = vmatprep.mubr.msk.f32.mxu1 %vm47_vm0, %v6782_v11 }
  0x1c   :  { %5569 = vmatmul.mubr.msk.f32.vlgmr.msra.gmra.mrb[8].mxu0 %vm47_vm0, %v6809_v21 }
  0x1d   :  { %5589 = vmatmul.mubr.msk.f32.vlgmr.msra.gmra.mrb[8].mxu1 %vm47_vm0, %v6809_v21  ;;  %6225 = vmatpush3.bf16.msra.mxu0 %v6222_v33 }
  0x1e   :  { %6233 = vmatpush3.bf16.msra.mxu1 %v6230_v34  ;;  %5571 = vmatprep.mubr.msk.f32.mxu0 %vm47_vm0, %v6820_v24 }
  0x1f   :  { %5591 = vmatprep.mubr.msk.f32.mxu1 %vm47_vm0, %v6820_v24  ;;  %6227 = vmatprep.subr.bf16.mxu0 %v6226_v42 }
  0x20   :  { %5572 = vmatmul.mubr.msk.f32.gmra.mrb[10].mxu0 %vm47_vm0, %v6835_v29  ;;  %6235 = vmatprep.subr.bf16.mxu1 %v6234_v43 }
  0x21   :  { %5592 = vmatmul.mubr.msk.f32.gmra.mrb[10].mxu1 %vm47_vm0, %v6835_v29  ;;  %5574 = vmatprep.mubr.msk.f32.mxu0 %vm47_vm0, %v6848_v32 }
  0x22   :  { %5594 = vmatprep.mubr.msk.f32.mxu1 %vm47_vm0, %v6848_v32  ;;  %6229 = vmatpush3.bf16.msra.mxu0 %v6226_v42 }
  0x23   :  { %6237 = vmatpush3.bf16.msra.mxu1 %v6234_v43  ;;  %6238 = vmatprep.subr.bf16.mxu0 %v6706_v44 }
  0x24   :  { %5575 = vmatmul.mubr.msk.f32.gmra.mrb[12].mxu0 %vm47_vm0, %v6861_v35  ;;  %6244 = vmatprep.subr.bf16.mxu1 %v6706_v44 }
  0x25   :  { %5595 = vmatmul.mubr.msk.f32.gmra.mrb[12].mxu1 %vm47_vm0, %v6861_v35  ;;  %5577 = vmatprep.mubr.msk.f32.mxu0 %vm47_vm0, %v6868_v36 }
  0x26   :  { %5597 = vmatprep.mubr.msk.f32.mxu1 %vm47_vm0, %v6868_v36 }
  0x28   :  { %5578 = vmatmul.mubr.msk.f32.gmra.mrb[14].mxu0 %vm47_vm0, %v6879_v37 }
  0x29   :  { %5598 = vmatmul.mubr.msk.f32.gmra.mrb[14].mxu1 %vm47_vm0, %v6879_v37  ;;  %5608 = vmatprep.mubr.msk.f32.mxu0 %vm47_vm0, %v6782_v11 }
  0x2a   :  { %5628 = vmatprep.mubr.msk.f32.mxu1 %vm47_vm0, %v6782_v11  ;;  %v5094_v11 = vld [vmem:[%s7710_s2 + $0x90] sm:$0xff] }
  0x2b   :  { %v7086_v16 = vpack.c.bf16 %v5095_v12, %v5094_v11 }
  0x2c   :  { %5609 = vmatmul.mubr.msk.f32.vlgmr.msra.gmra.mrb[16].mxu0 %vm47_vm0, %v6809_v21 }
  0x2d   :  { %5629 = vmatmul.mubr.msk.f32.vlgmr.msra.gmra.mrb[16].mxu1 %vm47_vm0, %v6809_v21  ;;  %6240 = vmatpush3.bf16.msra.mxu0 %v6947_v49 }
  0x2e   :  { %6246 = vmatpush3.bf16.msra.mxu1 %v6951_v50  ;;  %5611 = vmatprep.mubr.msk.f32.mxu0 %vm47_vm0, %v6820_v24 }
  0x2f   :  { %5631 = vmatprep.mubr.msk.f32.mxu1 %vm47_vm0, %v6820_v24  ;;  %6241 = vmatprep.subr.bf16.mxu0 %v6706_v44 }
  0x30   :  { %5612 = vmatmul.mubr.msk.f32.gmra.mrb[18].mxu0 %vm47_vm0, %v6835_v29  ;;  %6247 = vmatprep.subr.bf16.mxu1 %v6706_v44 }
  0x31   :  { %5632 = vmatmul.mubr.msk.f32.gmra.mrb[18].mxu1 %vm47_vm0, %v6835_v29  ;;  %5614 = vmatprep.mubr.msk.f32.mxu0 %vm47_vm0, %v6848_v32 }
  0x32   :  { %5634 = vmatprep.mubr.msk.f32.mxu1 %vm47_vm0, %v6848_v32  ;;  %6243 = vmatpush3.bf16.msra.mxu0 %v6973_v55 }
  0x33   :  { %6249 = vmatpush3.bf16.msra.mxu1 %v6978_v56  ;;  %6250 = vmatprep.subr.bf16.mxu0 %v6706_v44 }
  0x34   :  { %5615 = vmatmul.mubr.msk.f32.gmra.mrb[20].mxu0 %vm47_vm0, %v6861_v35  ;;  %6256 = vmatprep.subr.bf16.mxu1 %v6706_v44 }
  0x35   :  { %5635 = vmatmul.mubr.msk.f32.gmra.mrb[20].mxu1 %vm47_vm0, %v6861_v35  ;;  %5617 = vmatprep.mubr.msk.f32.mxu0 %vm47_vm0, %v6868_v36 }
  0x36   :  { %5637 = vmatprep.mubr.msk.f32.mxu1 %vm47_vm0, %v6868_v36 }
  0x38   :  { %5618 = vmatmul.mubr.msk.f32.gmra.mrb[22].mxu0 %vm47_vm0, %v6879_v37 }
  0x39   :  { %5638 = vmatmul.mubr.msk.f32.gmra.mrb[22].mxu1 %vm47_vm0, %v6879_v37  ;;  %5648 = vmatprep.mubr.msk.f32.mxu0 %vm6707_vm1, %v6708_v61 }
  0x3a   :  { %5659 = vmatprep.mubr.msk.f32.mxu1 %vm6707_vm1, %v6708_v61 }
  0x3c   :  { %5649 = vmatmul.mubr.f32.vlgmr.msra.gmra.mrb[24].mxu0 %v6708_v61 }
  0x3d   :  { %5660 = vmatmul.mubr.f32.vlgmr.msra.gmra.mrb[24].mxu1 %v6708_v61  ;;  %6252 = vmatpush3.bf16.msra.mxu0 %v7019_v62 }
  0x3e   :  { %6258 = vmatpush3.bf16.msra.mxu1 %v7023_v63  ;;  %6253 = vmatprep.subr.bf16.mxu0 %v6706_v44 }
  0x3f   :  { %6259 = vmatprep.subr.bf16.mxu1 %v6706_v44  ;;  %5681 = vmatprep.mubr.msk.f32.mxu1 %vm6707_vm1, %v6708_v61 }
  0x40   :  { %5670 = vmatprep.mubr.msk.f32.mxu0 %vm6707_vm1, %v6708_v61 }
  0x41   :  { %6255 = vmatpush3.bf16.msra.mxu0 %v7040_v4 }
  0x42   :  { %6261 = vmatpush3.bf16.msra.mxu1 %v7044_v5  ;;  %6262 = vmatprep.subr.bf16.mxu0 %v6706_v44 }
  0x43   :  { %6268 = vmatprep.subr.bf16.mxu1 %v6706_v44 }
  0x44   :  { %5671 = vmatmul.mubr.f32.vlgmr.msra.gmra.mrb[26].mxu0 %v6708_v61 }
  0x45   :  { %5682 = vmatmul.mubr.f32.vlgmr.msra.gmra.mrb[26].mxu1 %v6708_v61  ;;  %6264 = vmatpush3.bf16.msra.mxu0 %v7064_v10 }
  0x46   :  { %6265 = vmatprep.subr.bf16.mxu0 %v6706_v44  ;;  %5692 = vmatprep.mubr.msk.f32.mxu0 %vm6707_vm1, %v6708_v61 }
  0x47   :  { %6270 = vmatpush3.bf16.msra.mxu1 %v7075_v13  ;;  %5703 = vmatprep.mubr.msk.f32.mxu1 %vm6707_vm1, %v6708_v61 }
  0x48   :  { %6271 = vmatprep.subr.bf16.mxu1 %v6706_v44 }
  0x49   :  { %6267 = vmatpush3.bf16.msra.mxu0 %v7086_v16 }
  0x4a   :  { %6274 = vmatprep.subr.bf16.mxu0 %v6706_v44 }
  0x4b   :  { %6273 = vmatpush3.bf16.msra.mxu1 %v7092_v17 }
  0x4c   :  { %5693 = vmatmul.mubr.f32.vlgmr.msra.gmra.mrb[28].mxu0 %v6708_v61  ;;  %6280 = vmatprep.subr.bf16.mxu1 %v6706_v44 }
  0x4d   :  { %6276 = vmatpush3.bf16.msra.mxu0 %v6947_v49  ;;  %5714 = vmatprep.mubr.msk.f32.mxu0 %vm6707_vm1, %v6708_v61 }
  0x4e   :  { %5704 = vmatmul.mubr.f32.vlgmr.msra.gmra.mrb[28].mxu1 %v6708_v61  ;;  %6277 = vmatprep.subr.bf16.mxu0 %v6706_v44 }
  0x4f   :  { %6282 = vmatpush3.bf16.msra.mxu1 %v6951_v50  ;;  %5725 = vmatprep.mubr.msk.f32.mxu1 %vm6707_vm1, %v6708_v61 }
  0x50   :  { %6283 = vmatprep.subr.bf16.mxu1 %v6706_v44 }
  0x51   :  { %6279 = vmatpush3.bf16.msra.mxu0 %v6973_v55 }
  0x52   :  { %6286 = vmatprep.subr.bf16.mxu0 %v6706_v44 }
  0x53   :  { %6285 = vmatpush3.bf16.msra.mxu1 %v6978_v56 }
  0x54   :  { %6292 = vmatprep.subr.bf16.mxu1 %v6706_v44 }
  0xdf   :  { %v5530_v20 = vpop.f32.mrb[0].mxu0 }
  0xe0   :  { %v144_v21 = vadd.f32 %v5530_v20, %v5001_v18  ;;  %v5550_v22 = vpop.f32.mrb[0].mxu1  ;;  %v138_v23 = vpop.f32.mrb[1].mxu0 }
  0xe1   :  { %v270_v24 = vadd.f32 %v5550_v22, %v5015_v19  ;;  %v139_v25 = vadd.f32 %v5001_v18, %v138_v23  ;;  %v264_v26 = vpop.f32.mrb[1].mxu1 }
  0xe2   :  { %178 = vst.msk [vmem:[#allocation2 + $0x8] sm:$0xff] %vm47_vm0, %v144_v21  ;;  %v265_v27 = vadd.f32 %v5015_v19, %v264_v26 }
  0xe3   :  { %305 = vst.msk [vmem:[#allocation2 + $0x48] sm:$0xff] %vm47_vm0, %v270_v24  ;;  %177 = vst.msk [vmem:[#allocation2] sm:$0xff] %vm47_vm0, %v139_v25  ;;  %v5533_v28 = vpop.f32.mrb[2].mxu0 }
  0xe4   :  { %304 = vst.msk [vmem:[#allocation2 + $0x40] sm:$0xff] %vm47_vm0, %v265_v27  ;;  %v154_v29 = vadd.f32 %v5533_v28, %v5001_v18  ;;  %v5553_v30 = vpop.f32.mrb[2].mxu1  ;;  %v148_v31 = vpop.f32.mrb[3].mxu0 }
  0xe5   :  { %v280_v32 = vadd.f32 %v5553_v30, %v5015_v19  ;;  %v149_v33 = vadd.f32 %v5001_v18, %v148_v31  ;;  %v274_v34 = vpop.f32.mrb[3].mxu1 }
  0xe6   :  { %180 = vst.msk [vmem:[#allocation2 + $0x18] sm:$0xff] %vm47_vm0, %v154_v29  ;;  %v275_v35 = vadd.f32 %v5015_v19, %v274_v34 }
  0xe7   :  { %307 = vst.msk [vmem:[#allocation2 + $0x58] sm:$0xff] %vm47_vm0, %v280_v32  ;;  %179 = vst.msk [vmem:[#allocation2 + $0x10] sm:$0xff] %vm47_vm0, %v149_v33  ;;  %v5536_v36 = vpop.f32.mrb[4].mxu0 }
  0xe8   :  { %306 = vst.msk [vmem:[#allocation2 + $0x50] sm:$0xff] %vm47_vm0, %v275_v35  ;;  %v164_v37 = vadd.f32 %v5536_v36, %v5001_v18  ;;  %v5556_v38 = vpop.f32.mrb[4].mxu1  ;;  %v158_v39 = vpop.f32.mrb[5].mxu0  ;;  %v5057_v35 = vld [vmem:[%s7711_s3 + $0x4] ss:$0 sm:$0xff] }
  0xe9   :  { %v290_v40 = vadd.f32 %v5556_v38, %v5015_v19  ;;  %v159_v41 = vadd.f32 %v5001_v18, %v158_v39  ;;  %v284_v42 = vpop.f32.mrb[5].mxu1 }
  0xea   :  { %182 = vst.msk [vmem:[#allocation2 + $0x28] sm:$0xff] %vm47_vm0, %v164_v37  ;;  %v285_v43 = vadd.f32 %v5015_v19, %v284_v42  ;;  %v5071_v37 = vld [vmem:[%s7711_s3 + $0x5] ss:$0 sm:$0xff] }
  0xeb   :  { %309 = vst.msk [vmem:[#allocation2 + $0x68] sm:$0xff] %vm47_vm0, %v290_v40  ;;  %181 = vst.msk [vmem:[#allocation2 + $0x20] sm:$0xff] %vm47_vm0, %v159_v41  ;;  %v5539_v45 = vpop.f32.mrb[6].mxu0 }
  0xec   :  { %308 = vst.msk [vmem:[#allocation2 + $0x60] sm:$0xff] %vm47_vm0, %v285_v43  ;;  %v174_v46 = vadd.f32 %v5539_v45, %v5001_v18  ;;  %v5559_v47 = vpop.f32.mrb[6].mxu1  ;;  %v168_v48 = vpop.f32.mrb[7].mxu0 }
  0xed   :  { %v300_v51 = vadd.f32 %v5559_v47, %v5015_v19  ;;  %v169_v52 = vadd.f32 %v5001_v18, %v168_v48  ;;  %v294_v53 = vpop.f32.mrb[7].mxu1 }
  0xee   :  { %184 = vst.msk [vmem:[#allocation2 + $0x38] sm:$0xff] %vm47_vm0, %v174_v46  ;;  %v295_v57 = vadd.f32 %v5015_v19, %v294_v53 }
  0xef   :  { %311 = vst.msk [vmem:[#allocation2 + $0x78] sm:$0xff] %vm47_vm0, %v300_v51  ;;  %183 = vst.msk [vmem:[#allocation2 + $0x30] sm:$0xff] %vm47_vm0, %v169_v52  ;;  %v5570_v59 = vpop.f32.mrb[8].mxu0 }
  0xf0   :  { %310 = vst.msk [vmem:[#allocation2 + $0x70] sm:$0xff] %vm47_vm0, %v295_v57  ;;  %v397_v60 = vadd.f32 %v5570_v59, %v5029_v54  ;;  %v5590_v0 = vpop.f32.mrb[8].mxu1  ;;  %v391_v1 = vpop.f32.mrb[9].mxu0 }
  0xf1   :  { %v524_v2 = vadd.f32 %v5590_v0, %v5043_v58  ;;  %v392_v3 = vadd.f32 %v5029_v54, %v391_v1  ;;  %v518_v6 = vpop.f32.mrb[9].mxu1 }
  0xf2   :  { %432 = vst.msk [vmem:[#allocation2 + $0x88] sm:$0xff] %vm47_vm0, %v397_v60  ;;  %v519_v7 = vadd.f32 %v5043_v58, %v518_v6 }
  0xf3   :  { %559 = vst.msk [vmem:[#allocation2 + $0xc8] sm:$0xff] %vm47_vm0, %v524_v2  ;;  %431 = vst.msk [vmem:[#allocation2 + $0x80] sm:$0xff] %vm47_vm0, %v392_v3  ;;  %v5573_v8 = vpop.f32.mrb[10].mxu0 }
  0xf4   :  { %558 = vst.msk [vmem:[#allocation2 + $0xc0] sm:$0xff] %vm47_vm0, %v519_v7  ;;  %v407_v9 = vadd.f32 %v5573_v8, %v5029_v54  ;;  %v5593_v11 = vpop.f32.mrb[10].mxu1  ;;  %v401_v12 = vpop.f32.mrb[11].mxu0 }
  0xf5   :  { %v534_v14 = vadd.f32 %v5593_v11, %v5043_v58  ;;  %v402_v15 = vadd.f32 %v5029_v54, %v401_v12  ;;  %v528_v18 = vpop.f32.mrb[11].mxu1 }
  0xf6   :  { %434 = vst.msk [vmem:[#allocation2 + $0x98] sm:$0xff] %vm47_vm0, %v407_v9  ;;  %v529_v19 = vadd.f32 %v5043_v58, %v528_v18 }
  0xf7   :  { %561 = vst.msk [vmem:[#allocation2 + $0xd8] sm:$0xff] %vm47_vm0, %v534_v14  ;;  %433 = vst.msk [vmem:[#allocation2 + $0x90] sm:$0xff] %vm47_vm0, %v402_v15  ;;  %v5576_v20 = vpop.f32.mrb[12].mxu0 }
  0xf8   :  { %560 = vst.msk [vmem:[#allocation2 + $0xd0] sm:$0xff] %vm47_vm0, %v529_v19  ;;  %v417_v21 = vadd.f32 %v5576_v20, %v5029_v54  ;;  %v5596_v22 = vpop.f32.mrb[12].mxu1  ;;  %v411_v23 = vpop.f32.mrb[13].mxu0  ;;  %v852_v20 = vld [vmem:[#allocation2] sm:$0xff] }
  0xf9   :  { %v544_v24 = vadd.f32 %v5596_v22, %v5043_v58  ;;  %v412_v25 = vadd.f32 %v5029_v54, %v411_v23  ;;  %v538_v26 = vpop.f32.mrb[13].mxu1 }
  0xfa   :  { %436 = vst.msk [vmem:[#allocation2 + $0xa8] sm:$0xff] %vm47_vm0, %v417_v21  ;;  %v539_v27 = vadd.f32 %v5043_v58, %v538_v26 }
  0xfb   :  { %563 = vst.msk [vmem:[#allocation2 + $0xe8] sm:$0xff] %vm47_vm0, %v544_v24  ;;  %435 = vst.msk [vmem:[#allocation2 + $0xa0] sm:$0xff] %vm47_vm0, %v412_v25  ;;  %v5579_v28 = vpop.f32.mrb[14].mxu0 }
  0xfc   :  { %562 = vst.msk [vmem:[#allocation2 + $0xe0] sm:$0xff] %vm47_vm0, %v539_v27  ;;  %v427_v29 = vadd.f32 %v5579_v28, %v5029_v54  ;;  %v5599_v30 = vpop.f32.mrb[14].mxu1  ;;  %v421_v31 = vpop.f32.mrb[15].mxu0  ;;  %v855_v27 = vld [vmem:[#allocation2 + $0x40] sm:$0xff] }
  0xfd   :  { %v554_v32 = vadd.f32 %v5599_v30, %v5043_v58  ;;  %v422_v33 = vadd.f32 %v5029_v54, %v421_v31  ;;  %v548_v34 = vpop.f32.mrb[15].mxu1 }
  0xfe   :  { %438 = vst.msk [vmem:[#allocation2 + $0xb8] sm:$0xff] %vm47_vm0, %v427_v29  ;;  %v549_v36 = vadd.f32 %v5043_v58, %v548_v34 }
  0xff   :  { %565 = vst.msk [vmem:[#allocation2 + $0xf8] sm:$0xff] %vm47_vm0, %v554_v32  ;;  %437 = vst.msk [vmem:[#allocation2 + $0xb0] sm:$0xff] %vm47_vm0, %v422_v33  ;;  %v5610_v38 = vpop.f32.mrb[16].mxu0 }
 0x100   :  { %564 = vst.msk [vmem:[#allocation2 + $0xf0] sm:$0xff] %vm47_vm0, %v549_v36  ;;  %v651_v39 = vadd.f32 %v5610_v38, %v5057_v35  ;;  %v5630_v40 = vpop.f32.mrb[16].mxu1  ;;  %v645_v41 = vpop.f32.mrb[17].mxu0 }
 0x101   :  { %v778_v42 = vadd.f32 %v5630_v40, %v5071_v37  ;;  %v646_v43 = vadd.f32 %v5057_v35, %v645_v41  ;;  %v772_v45 = vpop.f32.mrb[17].mxu1 }
 0x102   :  { %686 = vst.msk [vmem:[#allocation2 + $0x108] sm:$0xff] %vm47_vm0, %v651_v39  ;;  %v773_v46 = vadd.f32 %v5071_v37, %v772_v45 }
 0x103   :  { %813 = vst.msk [vmem:[#allocation2 + $0x148] sm:$0xff] %vm47_vm0, %v778_v42  ;;  %685 = vst.msk [vmem:[#allocation2 + $0x100] sm:$0xff] %vm47_vm0, %v646_v43  ;;  %v5613_v47 = vpop.f32.mrb[18].mxu0 }
 0x104   :  { %812 = vst.msk [vmem:[#allocation2 + $0x140] sm:$0xff] %vm47_vm0, %v773_v46  ;;  %v661_v48 = vadd.f32 %v5613_v47, %v5057_v35  ;;  %v5633_v51 = vpop.f32.mrb[18].mxu1  ;;  %v655_v52 = vpop.f32.mrb[19].mxu0 }
 0x105   :  { %v788_v53 = vadd.f32 %v5633_v51, %v5071_v37  ;;  %v656_v54 = vadd.f32 %v5057_v35, %v655_v52  ;;  %v782_v57 = vpop.f32.mrb[19].mxu1  ;;  %v7184_v51 = vld [vmem:[%s7712_s4] ss:$0 sm:$0xff] }
 0x106   :  { %688 = vst.msk [vmem:[#allocation2 + $0x118] sm:$0xff] %vm47_vm0, %v661_v48  ;;  %v783_v58 = vadd.f32 %v5071_v37, %v782_v57  ;;  %v1101_v31 = vld [vmem:[#allocation2 + $0xf8] sm:$0xff] }
 0x107   :  { %815 = vst.msk [vmem:[#allocation2 + $0x158] sm:$0xff] %vm47_vm0, %v788_v53  ;;  %687 = vst.msk [vmem:[#allocation2 + $0x110] sm:$0xff] %vm47_vm0, %v656_v54  ;;  %v5616_v59 = vpop.f32.mrb[20].mxu0 }
 0x108   :  { %814 = vst.msk [vmem:[#allocation2 + $0x150] sm:$0xff] %vm47_vm0, %v783_v58  ;;  %v671_v60 = vadd.f32 %v5616_v59, %v5057_v35  ;;  %v5636_v0 = vpop.f32.mrb[20].mxu1  ;;  %v665_v1 = vpop.f32.mrb[21].mxu0  ;;  %v858_v59 = vld [vmem:[#allocation2 + $0x80] sm:$0xff] }
 0x109   :  { %v798_v2 = vadd.f32 %v5636_v0, %v5071_v37  ;;  %v666_v3 = vadd.f32 %v5057_v35, %v665_v1  ;;  %v792_v6 = vpop.f32.mrb[21].mxu1  ;;  %v7190_v1 = vld [vmem:[%s7712_s4 + $0x1] ss:$0 sm:$0xff] }
 0x10a   :  { %690 = vst.msk [vmem:[#allocation2 + $0x128] sm:$0xff] %vm47_vm0, %v671_v60  ;;  %v793_v7 = vadd.f32 %v5071_v37, %v792_v6 }
 0x10b   :  { %817 = vst.msk [vmem:[#allocation2 + $0x168] sm:$0xff] %vm47_vm0, %v798_v2  ;;  %689 = vst.msk [vmem:[#allocation2 + $0x120] sm:$0xff] %vm47_vm0, %v666_v3  ;;  %v5619_v8 = vpop.f32.mrb[22].mxu0 }
 0x10c   :  { %816 = vst.msk [vmem:[#allocation2 + $0x160] sm:$0xff] %vm47_vm0, %v793_v7  ;;  %v681_v9 = vadd.f32 %v5619_v8, %v5057_v35  ;;  %v5639_v11 = vpop.f32.mrb[22].mxu1  ;;  %v675_v12 = vpop.f32.mrb[23].mxu0 }
 0x10d   :  { %v808_v14 = vadd.f32 %v5639_v11, %v5071_v37  ;;  %v676_v15 = vadd.f32 %v5057_v35, %v675_v12  ;;  %v802_v18 = vpop.f32.mrb[23].mxu1 }
 0x10e   :  { %692 = vst.msk [vmem:[#allocation2 + $0x138] sm:$0xff] %vm47_vm0, %v681_v9  ;;  %v803_v19 = vadd.f32 %v5071_v37, %v802_v18 }
 0x10f   :  { %819 = vst.msk [vmem:[#allocation2 + $0x178] sm:$0xff] %vm47_vm0, %v808_v14  ;;  %691 = vst.msk [vmem:[#allocation2 + $0x130] sm:$0xff] %vm47_vm0, %v676_v15  ;;  %v928_v21 = vpop.f32.mrb[24].mxu0 }
 0x110   :  { %818 = vst.msk [vmem:[#allocation2 + $0x170] sm:$0xff] %vm47_vm0, %v803_v19  ;;  %v932_v22 = vadd.f32 %v928_v21, %v852_v20  ;;  %v1005_v23 = vpop.f32.mrb[24].mxu1  ;;  %v5650_v24 = vpop.f32.mrb[25].mxu0 }
 0x111   :  { %v5661_v25 = vpop.f32.mrb[25].mxu1  ;;  %v1009_v28 = vadd.f32 %v1005_v23, %v855_v27  ;;  %v1354_v27 = vld [vmem:[#allocation2 + $0x8] sm:$0xff] }
 0x112   :  { %v5101_v26 = vmul.f32 -1.442695, %v932_v22 }
 0x113   :  { %v5102_v29 = vmul.f32 -1.442695, %v1009_v28 }
 0x114   :  { %6542 = vpow2.f32 %v5101_v26 }
 0x115   :  { %6544 = vpow2.f32 %v5102_v29  ;;  %v1104_v39 = vld [vmem:[#allocation2 + $0x138] sm:$0xff] }
 0x116   :  { %v1107_v9 = vld [vmem:[#allocation2 + $0x178] sm:$0xff] }
 0x117   :  { %v1088_v30 = vpop.f32.mrb[26].mxu0 }
 0x118   :  { %v1174_v32 = vpop.f32.mrb[26].mxu1  ;;  %v5672_v33 = vpop.f32.mrb[27].mxu0  ;;  %v1089_v54 = vadd.f32 %v7184_v51, %v1088_v30 }
 0x119   :  { %v1178_v34 = vadd.f32 %v1174_v32, %v1101_v31  ;;  %v5683_v35 = vpop.f32.mrb[27].mxu1 }
 0x11b   :  { %v5104_v36 = vmul.f32 -1.442695, %v1178_v34  ;;  %v1357_v34 = vld [vmem:[#allocation2 + $0x48] sm:$0xff] }
 0x11d   :  { %6546 = vpow2.f32 %v5104_v36 }
 0x11e   :  { %v6543_v37 = vpop.eup %6542 }
 0x11f   :  { %v936_v38 = vadd.f32 1.0, %v6543_v37  ;;  %v1251_v40 = vpop.f32.mrb[28].mxu0  ;;  %v6545_v47 = vpop.eup %6544 }
 0x120   :  { %v1255_v41 = vadd.f32 %v1251_v40, %v1104_v39  ;;  %v5694_v42 = vpop.f32.mrb[29].mxu0  ;;  %v1013_v52 = vadd.f32 1.0, %v6545_v47  ;;  %v1600_v47 = vld [vmem:[#allocation2 + $0x130] sm:$0xff] }
 0x121   :  { %6548 = vrcp.f32 %v936_v38  ;;  %v1334_v43 = vpop.f32.mrb[28].mxu1  ;;  %v1597_v38 = vld [vmem:[#allocation2 + $0xf0] sm:$0xff] }
 0x122   :  { %v5105_v45 = vmul.f32 -1.442695, %v1255_v41  ;;  %v5705_v46 = vpop.f32.mrb[29].mxu1  ;;  %v1335_v3 = vadd.f32 %v7190_v1, %v1334_v43 }
 0x124   :  { %6550 = vpow2.f32 %v5105_v45 }
 0x127   :  { %v6547_v48 = vpop.eup %6546 }
 0x128   :  { %v1182_v53 = vadd.f32 1.0, %v6547_v48 }
 0x12a   :  { %6552 = vrcp.f32 %v1182_v53 }
 0x12b   :  { %v6549_v57 = vpop.eup %6548  ;;  %6554 = vrcp.f32 %v1013_v52 }
 0x12c   :  { %v1092_v58 = vmul.f32 %v6549_v57, %v1089_v54 }
 0x12e   :  { %v6551_v60 = vpop.eup %6550  ;;  %v1093_v0 = vadd.f32 %v1092_v58, %v858_v59 }
 0x12f   :  { %v1259_v2 = vadd.f32 1.0, %v6551_v60 }
 0x130   :  { %6556 = vtanh.f32 %v1093_v0 }
 0x131   :  { %6558 = vrcp.f32 %v1259_v2 }
 0x134   :  { %v6553_v6 = vpop.eup %6552 }
 0x135   :  { %v1338_v7 = vmul.f32 %v6553_v6, %v1335_v3  ;;  %v6555_v8 = vpop.eup %6554 }
 0x136   :  { %v1095_v12 = vsub.f32 1.0, %v6555_v8  ;;  %v1097_v18 = vmul.f32 0.0, %v6555_v8  ;;  %v1360_v8 = vld [vmem:[#allocation2 + $0x88] sm:$0xff] }
 0x137   :  { %v1339_v11 = vadd.f32 %v1338_v7, %v1107_v9 }
 0x139   :  { %6560 = vtanh.f32 %v1339_v11 }
 0x13a   :  { %v6557_v14 = vpop.eup %6556 }
 0x13b   :  { %v1096_v15 = vmul.f32 %v6557_v14, %v1095_v12  ;;  %v6559_v20 = vpop.eup %6558 }
 0x13c   :  { %v1341_v21 = vsub.f32 1.0, %v6559_v20  ;;  %v1343_v24 = vmul.f32 0.0, %v6559_v20 }
 0x13d   :  { %v7193_v19 = vadd.f32 %v1097_v18, %v1096_v15 }
 0x13f   :  { %5715 = vmatmul.mubr.msk.f32.vlgmr.msra.gmra.mrb[30].mxu0 %vm47_vm0, %v7193_v19  ;;  %5726 = vmatmul.mubr.msk.f32.vlgmr.msra.gmra.mrb[30].mxu1 %vm47_vm0, %v7193_v19  ;;  %1345 = vst.msk [vmem:[%s7713_s7] sm:$0xff] %vm47_vm0, %v7193_v19 }
 0x140   :  { %6288 = vmatpush3.bf16.msra.mxu0 %v7019_v62  ;;  %6294 = vmatpush3.bf16.msra.mxu1 %v7023_v63 }
 0x141   :  { %6289 = vmatprep.subr.bf16.mxu0 %v6706_v44  ;;  %6295 = vmatprep.subr.bf16.mxu1 %v6706_v44 }
 0x142   :  { %5736 = vmatprep.mubr.msk.f32.mxu0 %vm6707_vm1, %v6708_v61  ;;  %5747 = vmatprep.mubr.msk.f32.mxu1 %vm6707_vm1, %v6708_v61 }
 0x143   :  { %v6561_v22 = vpop.eup %6560 }
 0x144   :  { %6291 = vmatpush3.bf16.msra.mxu0 %v7040_v4  ;;  %6297 = vmatpush3.bf16.msra.mxu1 %v7044_v5  ;;  %v1342_v23 = vmul.f32 %v6561_v22, %v1341_v21  ;;  %v1603_v21 = vld [vmem:[#allocation2 + $0x170] sm:$0xff] }
 0x145   :  { %6298 = vmatprep.subr.bf16.mxu0 %v6706_v44  ;;  %6304 = vmatprep.subr.bf16.mxu1 %v6706_v44 }
 0x146   :  { %v7216_v25 = vadd.f32 %v1343_v24, %v1342_v23 }
 0x147   :  { %5737 = vmatmul.mubr.msk.f32.vlgmr.msra.gmra.mrb[32].mxu0 %vm47_vm0, %v7193_v19 }
 0x148   :  { %1347 = vrot.lane.b32.xlu0 %v7216_v25, %s6709_s17  ;;  %5748 = vmatmul.mubr.msk.f32.vlgmr.msra.gmra.mrb[32].mxu1 %vm47_vm0, %v7216_v25 }
 0x149   :  { %6300 = vmatpush3.bf16.msra.mxu0 %v7064_v10  ;;  %6306 = vmatpush3.bf16.msra.mxu1 %v7075_v13 }
 0x14a   :  { %6301 = vmatprep.subr.bf16.mxu0 %v6706_v44  ;;  %6307 = vmatprep.subr.bf16.mxu1 %v6706_v44 }
 0x14b   :  { %5758 = vmatprep.mubr.msk.f32.mxu0 %vm6707_vm1, %v6708_v61  ;;  %5769 = vmatprep.mubr.msk.f32.mxu1 %vm6707_vm1, %v6708_v61 }
 0x14d   :  { %6303 = vmatpush3.bf16.msra.mxu0 %v7086_v16  ;;  %6309 = vmatpush3.bf16.msra.mxu1 %v7092_v17 }
 0x14e   :  { %6310 = vmatprep.subr.bf16.mxu0 %v6706_v44  ;;  %6316 = vmatprep.subr.bf16.mxu1 %v6706_v44 }
 0x150   :  { %5759 = vmatmul.mubr.msk.f32.vlgmr.msra.gmra.mrb[34].mxu0 %vm47_vm0, %v7216_v25  ;;  %5770 = vmatmul.mubr.msk.f32.vlgmr.msra.gmra.mrb[34].mxu1 %vm47_vm0, %v7216_v25 }
 0x151   :  { %6312 = vmatpush3.bf16.msra.mxu0 %v6947_v49  ;;  %6318 = vmatpush3.bf16.msra.mxu1 %v6951_v50 }
 0x152   :  { %6313 = vmatprep.subr.bf16.mxu0 %v6706_v44  ;;  %6319 = vmatprep.subr.bf16.mxu1 %v6706_v44 }
 0x153   :  { %5780 = vmatprep.mubr.msk.f32.mxu0 %vm6707_vm1, %v6708_v61  ;;  %5791 = vmatprep.mubr.msk.f32.mxu1 %vm6707_vm1, %v6708_v61 }
 0x155   :  { %6315 = vmatpush3.bf16.msra.mxu0 %v6973_v55  ;;  %6321 = vmatpush3.bf16.msra.mxu1 %v6978_v56 }
 0x156   :  { %6322 = vmatprep.subr.bf16.mxu0 %v6706_v44  ;;  %6328 = vmatprep.subr.bf16.mxu1 %v6706_v44 }
 0x1ba   :  { %v1348_v26 = vpop.permute.xlu0 %1347 }
 0x1bb   :  { %5107 = vst.msk [vmem:[%s7713_s7 + $0x38] sm:$0xff] %vm1351_vm2, %v1348_v26 }
 0x212   :  { %v1430_v28 = vpop.f32.mrb[30].mxu0  ;;  %v1507_v29 = vpop.f32.mrb[30].mxu1 }
 0x213   :  { %v1434_v30 = vadd.f32 %v1430_v28, %v1354_v27  ;;  %v5716_v31 = vpop.f32.mrb[31].mxu0  ;;  %v5727_v32 = vpop.f32.mrb[31].mxu1  ;;  %v1511_v35 = vadd.f32 %v1507_v29, %v1357_v34  ;;  %v1846_v34 = vld [vmem:[#allocation2 + $0x10] sm:$0xff] }
 0x215   :  { %v5109_v33 = vmul.f32 -1.442695, %v1434_v30  ;;  %v5111_v36 = vmul.f32 -1.442695, %v1511_v35 }
 0x217   :  { %6562 = vpow2.f32 %v5109_v33 }
 0x218   :  { %6564 = vpow2.f32 %v5111_v36 }
 0x21a   :  { %v1584_v37 = vpop.f32.mrb[32].mxu0 }
 0x21b   :  { %v1672_v39 = vpop.f32.mrb[32].mxu1  ;;  %v5738_v40 = vpop.f32.mrb[33].mxu0  ;;  %v1585_v3 = vadd.f32 %v7184_v51, %v1584_v37 }
 0x21c   :  { %v1676_v41 = vadd.f32 %v1672_v39, %v1597_v38  ;;  %v5749_v42 = vpop.f32.mrb[33].mxu1 }
 0x21e   :  { %v5114_v43 = vmul.f32 -1.442695, %v1676_v41  ;;  %v1849_v41 = vld [vmem:[#allocation2 + $0x50] sm:$0xff] }
 0x220   :  { %6566 = vpow2.f32 %v5114_v43 }
 0x221   :  { %v6563_v45 = vpop.eup %6562 }
 0x222   :  { %v1438_v46 = vadd.f32 1.0, %v6563_v45  ;;  %v6565_v59 = vpop.eup %6564 }
 0x223   :  { %v1749_v48 = vpop.f32.mrb[34].mxu0  ;;  %v1826_v52 = vpop.f32.mrb[34].mxu1  ;;  %v1515_v0 = vadd.f32 1.0, %v6565_v59  ;;  %v2092_v59 = vld [vmem:[#allocation2 + $0x128] sm:$0xff] }
 0x224   :  { %6568 = vrcp.f32 %v1438_v46  ;;  %v1753_v53 = vadd.f32 %v1749_v48, %v1600_v47  ;;  %v5760_v54 = vpop.f32.mrb[35].mxu0  ;;  %v5771_v57 = vpop.f32.mrb[35].mxu1  ;;  %v1827_v14 = vadd.f32 %v7190_v1, %v1826_v52  ;;  %v2089_v46 = vld [vmem:[#allocation2 + $0xe8] sm:$0xff] }
 0x226   :  { %v5116_v58 = vmul.f32 -1.442695, %v1753_v53 }
 0x228   :  { %6570 = vpow2.f32 %v5116_v58 }
 0x22a   :  { %v6567_v60 = vpop.eup %6566 }
 0x22b   :  { %v1680_v2 = vadd.f32 1.0, %v6567_v60 }
 0x22d   :  { %6572 = vrcp.f32 %v1680_v2 }
 0x22e   :  { %v6569_v6 = vpop.eup %6568  ;;  %6574 = vrcp.f32 %v1515_v0 }
 0x22f   :  { %v1588_v7 = vmul.f32 %v6569_v6, %v1585_v3 }
 0x231   :  { %v1589_v9 = vadd.f32 %v1588_v7, %v1360_v8 }
 0x232   :  { %v6571_v11 = vpop.eup %6570 }
 0x233   :  { %6576 = vtanh.f32 %v1589_v9  ;;  %v1757_v12 = vadd.f32 1.0, %v6571_v11 }
 0x235   :  { %6578 = vrcp.f32 %v1757_v12 }
 0x237   :  { %v6573_v15 = vpop.eup %6572 }
 0x238   :  { %v1830_v18 = vmul.f32 %v6573_v15, %v1827_v14  ;;  %v6575_v20 = vpop.eup %6574 }
 0x239   :  { %v1591_v23 = vsub.f32 1.0, %v6575_v20  ;;  %v1593_v27 = vmul.f32 %v6575_v20, %v7193_v19  ;;  %v1852_v20 = vld [vmem:[#allocation2 + $0x90] sm:$0xff] }
 0x23a   :  { %v1831_v22 = vadd.f32 %v1830_v18, %v1603_v21 }
 0x23c   :  { %6580 = vtanh.f32 %v1831_v22 }
 0x23d   :  { %v6577_v24 = vpop.eup %6576 }
 0x23e   :  { %v1592_v26 = vmul.f32 %v6577_v24, %v1591_v23 }
 0x23f   :  { %v6579_v29 = vpop.eup %6578 }
 0x240   :  { %v7259_v28 = vadd.f32 %v1593_v27, %v1592_v26  ;;  %v1833_v19 = vsub.f32 1.0, %v6579_v29  ;;  %v1835_v32 = vmul.f32 %v6579_v29, %v7216_v25 }
 0x242   :  { %5781 = vmatmul.mubr.msk.f32.vlgmr.msra.gmra.mrb[36].mxu0 %vm47_vm0, %v7259_v28  ;;  %5118 = vst.msk [vmem:[%s7713_s7 + $0x8] sm:$0xff] %vm47_vm0, %v7259_v28  ;;  %5792 = vmatmul.mubr.msk.f32.vlgmr.msra.gmra.mrb[36].mxu1 %vm47_vm0, %v7259_v28 }
 0x243   :  { %6324 = vmatpush3.bf16.msra.mxu0 %v7019_v62  ;;  %6330 = vmatpush3.bf16.msra.mxu1 %v7023_v63 }
 0x244   :  { %6325 = vmatprep.subr.bf16.mxu0 %v6706_v44  ;;  %6331 = vmatprep.subr.bf16.mxu1 %v6706_v44 }
 0x245   :  { %5802 = vmatprep.mubr.msk.f32.mxu0 %vm6707_vm1, %v6708_v61  ;;  %5813 = vmatprep.mubr.msk.f32.mxu1 %vm6707_vm1, %v6708_v61 }
 0x246   :  { %v6581_v30 = vpop.eup %6580 }
 0x247   :  { %6327 = vmatpush3.bf16.msra.mxu0 %v7040_v4  ;;  %6333 = vmatpush3.bf16.msra.mxu1 %v7044_v5  ;;  %v1834_v31 = vmul.f32 %v6581_v30, %v1833_v19  ;;  %v2095_v19 = vld [vmem:[#allocation2 + $0x168] sm:$0xff] }
 0x248   :  { %6334 = vmatprep.subr.bf16.mxu0 %v6706_v44  ;;  %6340 = vmatprep.subr.bf16.mxu1 %v6706_v44 }
 0x249   :  { %v7283_v33 = vadd.f32 %v1835_v32, %v1834_v31 }
 0x24a   :  { %5803 = vmatmul.mubr.msk.f32.vlgmr.msra.gmra.mrb[38].mxu0 %vm47_vm0, %v7259_v28 }
 0x24b   :  { %1840 = vrot.lane.b32.xlu0 %v7283_v33, %s6709_s17  ;;  %5814 = vmatmul.mubr.msk.f32.vlgmr.msra.gmra.mrb[38].mxu1 %vm47_vm0, %v7283_v33 }
 0x24c   :  { %6336 = vmatpush3.bf16.msra.mxu0 %v7064_v10  ;;  %6342 = vmatpush3.bf16.msra.mxu1 %v7075_v13 }
 0x24d   :  { %6337 = vmatprep.subr.bf16.mxu0 %v6706_v44  ;;  %6343 = vmatprep.subr.bf16.mxu1 %v6706_v44 }
 0x24e   :  { %5824 = vmatprep.mubr.msk.f32.mxu0 %vm6707_vm1, %v6708_v61  ;;  %5835 = vmatprep.mubr.msk.f32.mxu1 %vm6707_vm1, %v6708_v61 }
 0x250   :  { %6339 = vmatpush3.bf16.msra.mxu0 %v7086_v16  ;;  %6345 = vmatpush3.bf16.msra.mxu1 %v7092_v17 }
 0x251   :  { %6346 = vmatprep.subr.bf16.mxu0 %v6706_v44  ;;  %6352 = vmatprep.subr.bf16.mxu1 %v6706_v44 }
 0x253   :  { %5825 = vmatmul.mubr.msk.f32.vlgmr.msra.gmra.mrb[40].mxu0 %vm47_vm0, %v7283_v33  ;;  %5836 = vmatmul.mubr.msk.f32.vlgmr.msra.gmra.mrb[40].mxu1 %vm47_vm0, %v7283_v33 }
 0x254   :  { %6348 = vmatpush3.bf16.msra.mxu0 %v6947_v49  ;;  %6354 = vmatpush3.bf16.msra.mxu1 %v6951_v50 }
 0x255   :  { %6349 = vmatprep.subr.bf16.mxu0 %v6706_v44  ;;  %6355 = vmatprep.subr.bf16.mxu1 %v6706_v44 }
 0x256   :  { %5846 = vmatprep.mubr.msk.f32.mxu0 %vm6707_vm1, %v6708_v61  ;;  %5857 = vmatprep.mubr.msk.f32.mxu1 %vm6707_vm1, %v6708_v61 }
 0x258   :  { %6351 = vmatpush3.bf16.msra.mxu0 %v6973_v55  ;;  %6357 = vmatpush3.bf16.msra.mxu1 %v6978_v56 }
 0x259   :  { %6358 = vmatprep.subr.bf16.mxu0 %v6706_v44  ;;  %6364 = vmatprep.subr.bf16.mxu1 %v6706_v44 }
 0x2bd   :  { %v1841_v25 = vpop.permute.xlu0 %1840 }
 0x2be   :  { %5119 = vst.msk [vmem:[%s7713_s7 + $0x30] sm:$0xff] %vm1351_vm2, %v1841_v25 }
 0x315   :  { %v1922_v35 = vpop.f32.mrb[36].mxu0  ;;  %v1999_v36 = vpop.f32.mrb[36].mxu1 }
 0x316   :  { %v1926_v37 = vadd.f32 %v1922_v35, %v1846_v34  ;;  %v5782_v38 = vpop.f32.mrb[37].mxu0  ;;  %v5793_v39 = vpop.f32.mrb[37].mxu1  ;;  %v2003_v42 = vadd.f32 %v1999_v36, %v1849_v41  ;;  %v2338_v41 = vld [vmem:[#allocation2 + $0x18] sm:$0xff] }
 0x318   :  { %v5121_v40 = vmul.f32 -1.442695, %v1926_v37  ;;  %v5123_v43 = vmul.f32 -1.442695, %v2003_v42 }
 0x31a   :  { %6582 = vpow2.f32 %v5121_v40 }
 0x31b   :  { %6584 = vpow2.f32 %v5123_v43 }
 0x31d   :  { %v2076_v45 = vpop.f32.mrb[38].mxu0 }
 0x31e   :  { %v2164_v47 = vpop.f32.mrb[38].mxu1  ;;  %v5804_v48 = vpop.f32.mrb[39].mxu0  ;;  %v2077_v14 = vadd.f32 %v7184_v51, %v2076_v45 }
 0x31f   :  { %v2168_v52 = vadd.f32 %v2164_v47, %v2089_v46  ;;  %v5815_v53 = vpop.f32.mrb[39].mxu1 }
 0x321   :  { %v5126_v54 = vmul.f32 -1.442695, %v2168_v52  ;;  %v2341_v52 = vld [vmem:[#allocation2 + $0x58] sm:$0xff] }
 0x323   :  { %6586 = vpow2.f32 %v5126_v54 }
 0x324   :  { %v6583_v57 = vpop.eup %6582 }
 0x325   :  { %v1930_v58 = vadd.f32 1.0, %v6583_v57  ;;  %v6585_v8 = vpop.eup %6584 }
 0x326   :  { %v2241_v60 = vpop.f32.mrb[40].mxu0  ;;  %v2318_v0 = vpop.f32.mrb[40].mxu1  ;;  %v2007_v11 = vadd.f32 1.0, %v6585_v8  ;;  %v2584_v8 = vld [vmem:[#allocation2 + $0x120] sm:$0xff] }
 0x327   :  { %6588 = vrcp.f32 %v1930_v58  ;;  %v2245_v2 = vadd.f32 %v2241_v60, %v2092_v59  ;;  %v5826_v3 = vpop.f32.mrb[41].mxu0  ;;  %v5837_v6 = vpop.f32.mrb[41].mxu1  ;;  %v2319_v24 = vadd.f32 %v7190_v1, %v2318_v0  ;;  %v2581_v58 = vld [vmem:[#allocation2 + $0xe0] sm:$0xff] }
 0x329   :  { %v5128_v7 = vmul.f32 -1.442695, %v2245_v2 }
 0x32b   :  { %6590 = vpow2.f32 %v5128_v7 }
 0x32d   :  { %v6587_v9 = vpop.eup %6586 }
 0x32e   :  { %v2172_v12 = vadd.f32 1.0, %v6587_v9 }
 0x330   :  { %6592 = vrcp.f32 %v2172_v12 }
 0x331   :  { %v6589_v15 = vpop.eup %6588  ;;  %6594 = vrcp.f32 %v2007_v11 }
 0x332   :  { %v2080_v18 = vmul.f32 %v6589_v15, %v2077_v14 }
 0x334   :  { %v2081_v21 = vadd.f32 %v2080_v18, %v1852_v20 }
 0x335   :  { %v6591_v22 = vpop.eup %6590 }
 0x336   :  { %6596 = vtanh.f32 %v2081_v21  ;;  %v2249_v23 = vadd.f32 1.0, %v6591_v22 }
 0x338   :  { %6598 = vrcp.f32 %v2249_v23 }
 0x33a   :  { %v6593_v26 = vpop.eup %6592 }
 0x33b   :  { %v2322_v27 = vmul.f32 %v6593_v26, %v2319_v24  ;;  %v6595_v29 = vpop.eup %6594 }
 0x33c   :  { %v2083_v31 = vsub.f32 1.0, %v6595_v29  ;;  %v2085_v34 = vmul.f32 %v6595_v29, %v7259_v28  ;;  %v2344_v29 = vld [vmem:[#allocation2 + $0x98] sm:$0xff] }
 0x33d   :  { %v2323_v30 = vadd.f32 %v2322_v27, %v2095_v19 }
 0x33f   :  { %6600 = vtanh.f32 %v2323_v30 }
 0x340   :  { %v6597_v32 = vpop.eup %6596 }
 0x341   :  { %v2084_v25 = vmul.f32 %v6597_v32, %v2083_v31 }
 0x342   :  { %v6599_v36 = vpop.eup %6598 }
 0x343   :  { %v7326_v35 = vadd.f32 %v2085_v34, %v2084_v25  ;;  %v2325_v28 = vsub.f32 1.0, %v6599_v36  ;;  %v2327_v39 = vmul.f32 %v6599_v36, %v7283_v33 }
 0x345   :  { %5847 = vmatmul.mubr.msk.f32.vlgmr.msra.gmra.mrb[42].mxu0 %vm47_vm0, %v7326_v35  ;;  %5130 = vst.msk [vmem:[%s7713_s7 + $0x10] sm:$0xff] %vm47_vm0, %v7326_v35  ;;  %5858 = vmatmul.mubr.msk.f32.vlgmr.msra.gmra.mrb[42].mxu1 %vm47_vm0, %v7326_v35 }
 0x346   :  { %6360 = vmatpush3.bf16.msra.mxu0 %v7019_v62  ;;  %6366 = vmatpush3.bf16.msra.mxu1 %v7023_v63 }
 0x347   :  { %6361 = vmatprep.subr.bf16.mxu0 %v6706_v44  ;;  %6367 = vmatprep.subr.bf16.mxu1 %v6706_v44 }
 0x348   :  { %5868 = vmatprep.mubr.msk.f32.mxu0 %vm6707_vm1, %v6708_v61  ;;  %5879 = vmatprep.mubr.msk.f32.mxu1 %vm6707_vm1, %v6708_v61 }
 0x349   :  { %v6601_v37 = vpop.eup %6600 }
 0x34a   :  { %6363 = vmatpush3.bf16.msra.mxu0 %v7040_v4  ;;  %6369 = vmatpush3.bf16.msra.mxu1 %v7044_v5  ;;  %v2326_v38 = vmul.f32 %v6601_v37, %v2325_v28  ;;  %v2587_v28 = vld [vmem:[#allocation2 + $0x160] sm:$0xff] }
 0x34b   :  { %6370 = vmatprep.subr.bf16.mxu0 %v6706_v44  ;;  %6376 = vmatprep.subr.bf16.mxu1 %v6706_v44 }
 0x34c   :  { %v7350_v40 = vadd.f32 %v2327_v39, %v2326_v38 }
 0x34d   :  { %5869 = vmatmul.mubr.msk.f32.vlgmr.msra.gmra.mrb[44].mxu0 %vm47_vm0, %v7326_v35 }
 0x34e   :  { %2332 = vrot.lane.b32.xlu1 %v7350_v40, %s6709_s17  ;;  %5880 = vmatmul.mubr.msk.f32.vlgmr.msra.gmra.mrb[44].mxu1 %vm47_vm0, %v7350_v40 }
 0x34f   :  { %6372 = vmatpush3.bf16.msra.mxu0 %v7064_v10  ;;  %6378 = vmatpush3.bf16.msra.mxu1 %v7075_v13 }
 0x350   :  { %6373 = vmatprep.subr.bf16.mxu0 %v6706_v44  ;;  %6379 = vmatprep.subr.bf16.mxu1 %v6706_v44 }
 0x351   :  { %5890 = vmatprep.mubr.msk.f32.mxu0 %vm6707_vm1, %v6708_v61  ;;  %5901 = vmatprep.mubr.msk.f32.mxu1 %vm6707_vm1, %v6708_v61 }
 0x353   :  { %6375 = vmatpush3.bf16.msra.mxu0 %v7086_v16  ;;  %6381 = vmatpush3.bf16.msra.mxu1 %v7092_v17 }
 0x354   :  { %6382 = vmatprep.subr.bf16.mxu0 %v6706_v44  ;;  %6388 = vmatprep.subr.bf16.mxu1 %v6706_v44 }
 0x356   :  { %5891 = vmatmul.mubr.msk.f32.vlgmr.msra.gmra.mrb[46].mxu0 %vm47_vm0, %v7350_v40  ;;  %5902 = vmatmul.mubr.msk.f32.vlgmr.msra.gmra.mrb[46].mxu1 %vm47_vm0, %v7350_v40 }
 0x357   :  { %6384 = vmatpush3.bf16.msra.mxu0 %v6947_v49  ;;  %6390 = vmatpush3.bf16.msra.mxu1 %v6951_v50 }
 0x358   :  { %6385 = vmatprep.subr.bf16.mxu0 %v6706_v44  ;;  %6391 = vmatprep.subr.bf16.mxu1 %v6706_v44 }
 0x359   :  { %5912 = vmatprep.mubr.msk.f32.mxu0 %vm6707_vm1, %v6708_v61  ;;  %5923 = vmatprep.mubr.msk.f32.mxu1 %vm6707_vm1, %v6708_v61 }
 0x35b   :  { %6387 = vmatpush3.bf16.msra.mxu0 %v6973_v55  ;;  %6393 = vmatpush3.bf16.msra.mxu1 %v6978_v56 }
 0x35c   :  { %6394 = vmatprep.subr.bf16.mxu0 %v6706_v44  ;;  %6400 = vmatprep.subr.bf16.mxu1 %v6706_v44 }
 0x3c0   :  { %v2333_v33 = vpop.permute.xlu1 %2332 }
 0x3c1   :  { %5131 = vst.msk [vmem:[%s7713_s7 + $0x28] sm:$0xff] %vm1351_vm2, %v2333_v33 }
 0x418   :  { %v2414_v42 = vpop.f32.mrb[42].mxu0  ;;  %v2491_v43 = vpop.f32.mrb[42].mxu1 }
 0x419   :  { %v2418_v45 = vadd.f32 %v2414_v42, %v2338_v41  ;;  %v5848_v46 = vpop.f32.mrb[43].mxu0  ;;  %v5859_v47 = vpop.f32.mrb[43].mxu1  ;;  %v2495_v53 = vadd.f32 %v2491_v43, %v2341_v52  ;;  %v2830_v52 = vld [vmem:[#allocation2 + $0x20] sm:$0xff] }
 0x41b   :  { %v5133_v48 = vmul.f32 -1.442695, %v2418_v45  ;;  %v5135_v54 = vmul.f32 -1.442695, %v2495_v53 }
 0x41d   :  { %6602 = vpow2.f32 %v5133_v48 }
 0x41e   :  { %6604 = vpow2.f32 %v5135_v54 }
 0x420   :  { %v2568_v57 = vpop.f32.mrb[44].mxu0 }
 0x421   :  { %v2656_v59 = vpop.f32.mrb[44].mxu1  ;;  %v5870_v60 = vpop.f32.mrb[45].mxu0  ;;  %v2569_v24 = vadd.f32 %v7184_v51, %v2568_v57 }
 0x422   :  { %v2660_v0 = vadd.f32 %v2656_v59, %v2581_v58  ;;  %v5881_v2 = vpop.f32.mrb[45].mxu1 }
 0x424   :  { %v5138_v3 = vmul.f32 -1.442695, %v2660_v0  ;;  %v2833_v0 = vld [vmem:[#allocation2 + $0x60] sm:$0xff] }
 0x426   :  { %6606 = vpow2.f32 %v5138_v3 }
 0x427   :  { %v6603_v6 = vpop.eup %6602 }
 0x428   :  { %v2422_v7 = vadd.f32 1.0, %v6603_v6  ;;  %v6605_v20 = vpop.eup %6604 }
 0x429   :  { %v2733_v9 = vpop.f32.mrb[46].mxu0  ;;  %v2810_v11 = vpop.f32.mrb[46].mxu1  ;;  %v2499_v22 = vadd.f32 1.0, %v6605_v20  ;;  %v3076_v20 = vld [vmem:[#allocation2 + $0x118] sm:$0xff] }
 0x42a   :  { %6608 = vrcp.f32 %v2422_v7  ;;  %v2737_v12 = vadd.f32 %v2733_v9, %v2584_v8  ;;  %v5892_v14 = vpop.f32.mrb[47].mxu0  ;;  %v5903_v15 = vpop.f32.mrb[47].mxu1  ;;  %v2811_v32 = vadd.f32 %v7190_v1, %v2810_v11  ;;  %v3073_v7 = vld [vmem:[#allocation2 + $0xd8] sm:$0xff] }
 0x42c   :  { %v5140_v18 = vmul.f32 -1.442695, %v2737_v12 }
 0x42e   :  { %6610 = vpow2.f32 %v5140_v18 }
 0x430   :  { %v6607_v21 = vpop.eup %6606 }
 0x431   :  { %v2664_v23 = vadd.f32 1.0, %v6607_v21 }
 0x433   :  { %6612 = vrcp.f32 %v2664_v23 }
 0x434   :  { %v6609_v26 = vpop.eup %6608  ;;  %6614 = vrcp.f32 %v2499_v22 }
 0x435   :  { %v2572_v27 = vmul.f32 %v6609_v26, %v2569_v24 }
 0x437   :  { %v2573_v19 = vadd.f32 %v2572_v27, %v2344_v29 }
 0x438   :  { %v6611_v30 = vpop.eup %6610 }
 0x439   :  { %6616 = vtanh.f32 %v2573_v19  ;;  %v2741_v31 = vadd.f32 1.0, %v6611_v30 }
 0x43b   :  { %6618 = vrcp.f32 %v2741_v31 }
 0x43d   :  { %v6613_v25 = vpop.eup %6612 }
 0x43e   :  { %v2814_v34 = vmul.f32 %v6613_v25, %v2811_v32  ;;  %v6615_v36 = vpop.eup %6614 }
 0x43f   :  { %v2575_v38 = vsub.f32 1.0, %v6615_v36  ;;  %v2577_v41 = vmul.f32 %v6615_v36, %v7326_v35  ;;  %v2836_v36 = vld [vmem:[#allocation2 + $0xa0] sm:$0xff] }
 0x440   :  { %v2815_v37 = vadd.f32 %v2814_v34, %v2587_v28 }
 0x442   :  { %6620 = vtanh.f32 %v2815_v37 }
 0x443   :  { %v6617_v39 = vpop.eup %6616 }
 0x444   :  { %v2576_v33 = vmul.f32 %v6617_v39, %v2575_v38 }
 0x445   :  { %v6619_v43 = vpop.eup %6618 }
 0x446   :  { %v7393_v42 = vadd.f32 %v2577_v41, %v2576_v33  ;;  %v2817_v35 = vsub.f32 1.0, %v6619_v43  ;;  %v2819_v47 = vmul.f32 %v6619_v43, %v7350_v40 }
 0x448   :  { %5913 = vmatmul.mubr.msk.f32.vlgmr.msra.gmra.mrb[48].mxu0 %vm47_vm0, %v7393_v42  ;;  %5142 = vst.msk [vmem:[%s7713_s7 + $0x18] sm:$0xff] %vm47_vm0, %v7393_v42  ;;  %5924 = vmatmul.mubr.msk.f32.vlgmr.msra.gmra.mrb[48].mxu1 %vm47_vm0, %v7393_v42 }
 0x449   :  { %6396 = vmatpush3.bf16.msra.mxu0 %v7019_v62  ;;  %6402 = vmatpush3.bf16.msra.mxu1 %v7023_v63 }
 0x44a   :  { %6397 = vmatprep.subr.bf16.mxu0 %v6706_v44  ;;  %6403 = vmatprep.subr.bf16.mxu1 %v6706_v44 }
 0x44b   :  { %5934 = vmatprep.mubr.msk.f32.mxu0 %vm6707_vm1, %v6708_v61  ;;  %5945 = vmatprep.mubr.msk.f32.mxu1 %vm6707_vm1, %v6708_v61 }
 0x44c   :  { %v6621_v45 = vpop.eup %6620 }
 0x44d   :  { %6399 = vmatpush3.bf16.msra.mxu0 %v7040_v4  ;;  %6405 = vmatpush3.bf16.msra.mxu1 %v7044_v5  ;;  %v2818_v46 = vmul.f32 %v6621_v45, %v2817_v35  ;;  %v3079_v35 = vld [vmem:[#allocation2 + $0x158] sm:$0xff] }
 0x44e   :  { %6406 = vmatprep.subr.bf16.mxu0 %v6706_v44  ;;  %6412 = vmatprep.subr.bf16.mxu1 %v6706_v44 }
 0x44f   :  { %v7417_v48 = vadd.f32 %v2819_v47, %v2818_v46 }
 0x450   :  { %5935 = vmatmul.mubr.msk.f32.vlgmr.msra.gmra.mrb[50].mxu0 %vm47_vm0, %v7393_v42 }
 0x451   :  { %2824 = vrot.lane.b32.xlu1 %v7417_v48, %s6709_s17  ;;  %5946 = vmatmul.mubr.msk.f32.vlgmr.msra.gmra.mrb[50].mxu1 %vm47_vm0, %v7417_v48 }
 0x452   :  { %6408 = vmatpush3.bf16.msra.mxu0 %v7064_v10  ;;  %6414 = vmatpush3.bf16.msra.mxu1 %v7075_v13 }
 0x453   :  { %6409 = vmatprep.subr.bf16.mxu0 %v6706_v44  ;;  %6415 = vmatprep.subr.bf16.mxu1 %v6706_v44 }
 0x454   :  { %5956 = vmatprep.mubr.msk.f32.mxu0 %vm6707_vm1, %v6708_v61  ;;  %5967 = vmatprep.mubr.msk.f32.mxu1 %vm6707_vm1, %v6708_v61 }
 0x456   :  { %6411 = vmatpush3.bf16.msra.mxu0 %v7086_v16  ;;  %6417 = vmatpush3.bf16.msra.mxu1 %v7092_v17 }
 0x457   :  { %6418 = vmatprep.subr.bf16.mxu0 %v6706_v44  ;;  %6424 = vmatprep.subr.bf16.mxu1 %v6706_v44 }
 0x459   :  { %5957 = vmatmul.mubr.msk.f32.vlgmr.msra.gmra.mrb[52].mxu0 %vm47_vm0, %v7417_v48  ;;  %5968 = vmatmul.mubr.msk.f32.vlgmr.msra.gmra.mrb[52].mxu1 %vm47_vm0, %v7417_v48 }
 0x45a   :  { %6420 = vmatpush3.bf16.msra.mxu0 %v6947_v49  ;;  %6426 = vmatpush3.bf16.msra.mxu1 %v6951_v50 }
 0x45b   :  { %6421 = vmatprep.subr.bf16.mxu0 %v6706_v44  ;;  %6427 = vmatprep.subr.bf16.mxu1 %v6706_v44 }
 0x45c   :  { %5978 = vmatprep.mubr.msk.f32.mxu0 %vm6707_vm1, %v6708_v61  ;;  %5989 = vmatprep.mubr.msk.f32.mxu1 %vm6707_vm1, %v6708_v61 }
 0x45e   :  { %6423 = vmatpush3.bf16.msra.mxu0 %v6973_v55  ;;  %6429 = vmatpush3.bf16.msra.mxu1 %v6978_v56 }
 0x45f   :  { %6430 = vmatprep.subr.bf16.mxu0 %v6706_v44  ;;  %6436 = vmatprep.subr.bf16.mxu1 %v6706_v44 }
 0x4c3   :  { %v2825_v40 = vpop.permute.xlu1 %2824 }
 0x4c4   :  { %5143 = vst.msk [vmem:[%s7713_s7 + $0x20] sm:$0xff] %vm1351_vm2, %v2825_v40 }
 0x51b   :  { %v2906_v53 = vpop.f32.mrb[48].mxu0  ;;  %v2983_v54 = vpop.f32.mrb[48].mxu1 }
 0x51c   :  { %v2910_v57 = vadd.f32 %v2906_v53, %v2830_v52  ;;  %v5914_v58 = vpop.f32.mrb[49].mxu0  ;;  %v5925_v59 = vpop.f32.mrb[49].mxu1  ;;  %v2987_v2 = vadd.f32 %v2983_v54, %v2833_v0 }
 0x51d   :  { %v3320_v59 = vld [vmem:[#allocation2 + $0x28] sm:$0xff] }
 0x51e   :  { %v5145_v60 = vmul.f32 -1.442695, %v2910_v57  ;;  %v5147_v3 = vmul.f32 -1.442695, %v2987_v2 }
 0x520   :  { %6622 = vpow2.f32 %v5145_v60 }
 0x521   :  { %6624 = vpow2.f32 %v5147_v3 }
 0x523   :  { %v3060_v6 = vpop.f32.mrb[50].mxu0 }
 0x524   :  { %v3148_v8 = vpop.f32.mrb[50].mxu1  ;;  %v5936_v9 = vpop.f32.mrb[51].mxu0  ;;  %v3061_v32 = vadd.f32 %v7184_v51, %v3060_v6 }
 0x525   :  { %v3152_v11 = vadd.f32 %v3148_v8, %v3073_v7  ;;  %v5947_v12 = vpop.f32.mrb[51].mxu1  ;;  %v3323_v8 = vld [vmem:[#allocation2 + $0x68] sm:$0xff] }
 0x527   :  { %v5150_v14 = vmul.f32 -1.442695, %v3152_v11 }
 0x529   :  { %6626 = vpow2.f32 %v5150_v14  ;;  %v3563_v14 = vld [vmem:[#allocation2 + $0xd0] sm:$0xff] }
 0x52a   :  { %v6623_v15 = vpop.eup %6622 }
 0x52b   :  { %v2914_v18 = vadd.f32 1.0, %v6623_v15  ;;  %v6625_v29 = vpop.eup %6624 }
 0x52c   :  { %v3225_v21 = vpop.f32.mrb[52].mxu0  ;;  %v3302_v22 = vpop.f32.mrb[52].mxu1  ;;  %v2991_v30 = vadd.f32 1.0, %v6625_v29 }
 0x52d   :  { %6628 = vrcp.f32 %v2914_v18  ;;  %v3229_v23 = vadd.f32 %v3225_v21, %v3076_v20  ;;  %v5958_v24 = vpop.f32.mrb[53].mxu0  ;;  %v5969_v26 = vpop.f32.mrb[53].mxu1  ;;  %v3303_v39 = vadd.f32 %v7190_v1, %v3302_v22 }
 0x52e   :  { %v3566_v26 = vld [vmem:[#allocation2 + $0x110] sm:$0xff] }
 0x52f   :  { %v5152_v27 = vmul.f32 -1.442695, %v3229_v23 }
 0x531   :  { %6630 = vpow2.f32 %v5152_v27 }
 0x533   :  { %v6627_v19 = vpop.eup %6626 }
 0x534   :  { %v3156_v31 = vadd.f32 1.0, %v6627_v19 }
 0x536   :  { %6632 = vrcp.f32 %v3156_v31 }
 0x537   :  { %v6629_v25 = vpop.eup %6628  ;;  %6634 = vrcp.f32 %v2991_v30 }
 0x538   :  { %v3064_v34 = vmul.f32 %v6629_v25, %v3061_v32 }
 0x53a   :  { %v3065_v28 = vadd.f32 %v3064_v34, %v2836_v36 }
 0x53b   :  { %v6631_v37 = vpop.eup %6630 }
 0x53c   :  { %6636 = vtanh.f32 %v3065_v28  ;;  %v3233_v38 = vadd.f32 1.0, %v6631_v37  ;;  %v7527_v37 = vld [vmem:[%s7712_s4] ss:$0 sm:$0xff] }
 0x53e   :  { %6638 = vrcp.f32 %v3233_v38 }
 0x540   :  { %v6633_v33 = vpop.eup %6632 }
 0x541   :  { %v3306_v41 = vmul.f32 %v6633_v33, %v3303_v39  ;;  %v6635_v43 = vpop.eup %6634 }
 0x542   :  { %v3067_v46 = vsub.f32 1.0, %v6635_v43  ;;  %v3069_v40 = vmul.f32 %v6635_v43, %v7393_v42 }
 0x543   :  { %v3307_v45 = vadd.f32 %v3306_v41, %v3079_v35  ;;  %v3326_v41 = vld [vmem:[#allocation2 + $0xa8] sm:$0xff] }
 0x545   :  { %6640 = vtanh.f32 %v3307_v45 }
 0x546   :  { %v6637_v51 = vpop.eup %6636 }
 0x547   :  { %v3068_v47 = vmul.f32 %v6637_v51, %v3067_v46  ;;  %v7533_v46 = vld [vmem:[%s7712_s4 + $0x1] ss:$0 sm:$0xff] }
 0x548   :  { %v6639_v53 = vpop.eup %6638 }
 0x549   :  { %v7460_v52 = vadd.f32 %v3069_v40, %v3068_v47  ;;  %v3309_v1 = vsub.f32 1.0, %v6639_v53  ;;  %v3311_v57 = vmul.f32 %v6639_v53, %v7417_v48 }
 0x54b   :  { %5154 = vst.msk [vmem:[%s7713_s7 + $0x20] sm:$0xff] %vm47_vm0, %v7460_v52  ;;  %5979 = vmatmul.mubr.msk.f32.vlgmr.msra.gmra.mrb[54].mxu0 %vm47_vm0, %v7460_v52  ;;  %5990 = vmatmul.mubr.msk.f32.vlgmr.msra.gmra.mrb[54].mxu1 %vm47_vm0, %v7460_v52 }
 0x54c   :  { %6432 = vmatpush3.bf16.msra.mxu0 %v7019_v62  ;;  %6438 = vmatpush3.bf16.msra.mxu1 %v7023_v63 }
 0x54d   :  { %6433 = vmatprep.subr.bf16.mxu0 %v6706_v44  ;;  %6439 = vmatprep.subr.bf16.mxu1 %v6706_v44 }
 0x54e   :  { %6000 = vmatprep.mubr.msk.f32.mxu0 %vm6707_vm1, %v6708_v61  ;;  %6011 = vmatprep.mubr.msk.f32.mxu1 %vm6707_vm1, %v6708_v61 }
 0x54f   :  { %v6641_v42 = vpop.eup %6640 }
 0x550   :  { %6435 = vmatpush3.bf16.msra.mxu0 %v7040_v4  ;;  %6441 = vmatpush3.bf16.msra.mxu1 %v7044_v5  ;;  %v3310_v54 = vmul.f32 %v6641_v42, %v3309_v1  ;;  %v3569_v1 = vld [vmem:[#allocation2 + $0x150] sm:$0xff] }
 0x551   :  { %6442 = vmatprep.subr.bf16.mxu0 %v6706_v44  ;;  %6448 = vmatprep.subr.bf16.mxu1 %v6706_v44 }
 0x552   :  { %v7484_v58 = vadd.f32 %v3311_v57, %v3310_v54 }
 0x553   :  { %6001 = vmatmul.mubr.msk.f32.vlgmr.msra.gmra.mrb[56].mxu0 %vm47_vm0, %v7460_v52 }
 0x554   :  { %3315 = vrot.lane.b32.xlu0 %v7484_v58, %s6709_s17  ;;  %6012 = vmatmul.mubr.msk.f32.vlgmr.msra.gmra.mrb[56].mxu1 %vm47_vm0, %v7484_v58 }
 0x555   :  { %6444 = vmatpush3.bf16.msra.mxu0 %v7064_v10  ;;  %6450 = vmatpush3.bf16.msra.mxu1 %v7075_v13 }
 0x556   :  { %6445 = vmatprep.subr.bf16.mxu0 %v6706_v44  ;;  %6451 = vmatprep.subr.bf16.mxu1 %v6706_v44 }
 0x557   :  { %6022 = vmatprep.mubr.msk.f32.mxu0 %vm6707_vm1, %v6708_v61  ;;  %6033 = vmatprep.mubr.msk.f32.mxu1 %vm6707_vm1, %v6708_v61 }
 0x559   :  { %6447 = vmatpush3.bf16.msra.mxu0 %v7086_v16  ;;  %6453 = vmatpush3.bf16.msra.mxu1 %v7092_v17 }
 0x55a   :  { %6454 = vmatprep.subr.bf16.mxu0 %v6706_v44  ;;  %6460 = vmatprep.subr.bf16.mxu1 %v6706_v44 }
 0x55c   :  { %6023 = vmatmul.mubr.msk.f32.vlgmr.msra.gmra.mrb[58].mxu0 %vm47_vm0, %v7484_v58  ;;  %6034 = vmatmul.mubr.msk.f32.vlgmr.msra.gmra.mrb[58].mxu1 %vm47_vm0, %v7484_v58 }
 0x55d   :  { %6456 = vmatpush3.bf16.msra.mxu0 %v6947_v49  ;;  %6462 = vmatpush3.bf16.msra.mxu1 %v6951_v50 }
 0x55e   :  { %6457 = vmatprep.subr.bf16.mxu0 %v6706_v44  ;;  %6463 = vmatprep.subr.bf16.mxu1 %v6706_v44 }
 0x55f   :  { %6044 = vmatprep.mubr.msk.f32.mxu0 %vm6707_vm1, %v6708_v61  ;;  %6055 = vmatprep.mubr.msk.f32.mxu1 %vm6707_vm1, %v6708_v61 }
 0x561   :  { %6459 = vmatpush3.bf16.msra.mxu0 %v6973_v55  ;;  %6465 = vmatpush3.bf16.msra.mxu1 %v6978_v56 }
 0x562   :  { %6466 = vmatprep.subr.bf16.mxu0 %v6706_v44  ;;  %6472 = vmatprep.subr.bf16.mxu1 %v6706_v44 }
 0x5c6   :  { %v3316_v48 = vpop.permute.xlu0 %3315 }
 0x5c7   :  { %5155 = vst.msk [vmem:[%s7713_s7 + $0x18] sm:$0xff] %vm1351_vm2, %v3316_v48 }
 0x61e   :  { %v3396_v60 = vpop.f32.mrb[54].mxu0  ;;  %v3473_v0 = vpop.f32.mrb[54].mxu1 }
 0x61f   :  { %v3400_v2 = vadd.f32 %v3396_v60, %v3320_v59  ;;  %v5980_v3 = vpop.f32.mrb[55].mxu0  ;;  %v5991_v6 = vpop.f32.mrb[55].mxu1  ;;  %v3477_v9 = vadd.f32 %v3473_v0, %v3323_v8 }
 0x621   :  { %v5157_v7 = vmul.f32 -1.442695, %v3400_v2  ;;  %v5159_v11 = vmul.f32 -1.442695, %v3477_v9 }
 0x623   :  { %6642 = vpow2.f32 %v5157_v7 }
 0x624   :  { %6644 = vpow2.f32 %v5159_v11 }
 0x626   :  { %v3550_v12 = vpop.f32.mrb[56].mxu0 }
 0x627   :  { %v3638_v15 = vpop.f32.mrb[56].mxu1  ;;  %v6002_v18 = vpop.f32.mrb[57].mxu0  ;;  %v3551_v38 = vadd.f32 %v7527_v37, %v3550_v12 }
 0x628   :  { %v3642_v20 = vadd.f32 %v3638_v15, %v3563_v14  ;;  %v6013_v21 = vpop.f32.mrb[57].mxu1 }
 0x62a   :  { %v5162_v22 = vmul.f32 -1.442695, %v3642_v20  ;;  %v4053_v20 = vld [vmem:[#allocation2 + $0xc8] sm:$0xff] }
 0x62c   :  { %6646 = vpow2.f32 %v5162_v22 }
 0x62d   :  { %v6643_v23 = vpop.eup %6642 }
 0x62e   :  { %v3404_v24 = vadd.f32 1.0, %v6643_v23  ;;  %v6645_v25 = vpop.eup %6644 }
 0x62f   :  { %v3715_v27 = vpop.f32.mrb[58].mxu0  ;;  %v3792_v29 = vpop.f32.mrb[58].mxu1  ;;  %v3481_v36 = vadd.f32 1.0, %v6645_v25 }
 0x630   :  { %6648 = vrcp.f32 %v3404_v24  ;;  %v3719_v19 = vadd.f32 %v3715_v27, %v3566_v26  ;;  %v6024_v30 = vpop.f32.mrb[59].mxu0  ;;  %v6035_v31 = vpop.f32.mrb[59].mxu1  ;;  %v3793_v51 = vadd.f32 %v7533_v46, %v3792_v29 }
 0x632   :  { %v5164_v32 = vmul.f32 -1.442695, %v3719_v19  ;;  %v4056_v19 = vld [vmem:[#allocation2 + $0x108] sm:$0xff] }
 0x634   :  { %6650 = vpow2.f32 %v5164_v32 }
 0x636   :  { %v6647_v34 = vpop.eup %6646 }
 0x637   :  { %v3646_v28 = vadd.f32 1.0, %v6647_v34 }
 0x639   :  { %6652 = vrcp.f32 %v3646_v28 }
 0x63a   :  { %v6649_v39 = vpop.eup %6648  ;;  %6654 = vrcp.f32 %v3481_v36 }
 0x63b   :  { %v3554_v33 = vmul.f32 %v6649_v39, %v3551_v38 }
 0x63d   :  { %v3555_v43 = vadd.f32 %v3554_v33, %v3326_v41 }
 0x63e   :  { %v6651_v35 = vpop.eup %6650 }
 0x63f   :  { %6656 = vtanh.f32 %v3555_v43  ;;  %v3723_v45 = vadd.f32 1.0, %v6651_v35 }
 0x641   :  { %6658 = vrcp.f32 %v3723_v45  ;;  %v3816_v45 = vld [vmem:[#allocation2 + $0xb0] sm:$0xff] }
 0x643   :  { %v6653_v47 = vpop.eup %6652 }
 0x644   :  { %v3796_v40 = vmul.f32 %v6653_v47, %v3793_v51  ;;  %v6655_v53 = vpop.eup %6654 }
 0x645   :  { %v3557_v54 = vsub.f32 1.0, %v6655_v53  ;;  %v3559_v59 = vmul.f32 %v6655_v53, %v7460_v52 }
 0x646   :  { %v3797_v42 = vadd.f32 %v3796_v40, %v3569_v1 }
 0x648   :  { %6660 = vtanh.f32 %v3797_v42 }
 0x649   :  { %v6657_v57 = vpop.eup %6656 }
 0x64a   :  { %v3558_v48 = vmul.f32 %v6657_v57, %v3557_v54  ;;  %v4059_v57 = vld [vmem:[#allocation2 + $0x148] sm:$0xff] }
 0x64b   :  { %v6659_v0 = vpop.eup %6658 }
 0x64c   :  { %v7537_v60 = vadd.f32 %v3559_v59, %v3558_v48  ;;  %v3799_v52 = vsub.f32 1.0, %v6659_v0  ;;  %v3801_v6 = vmul.f32 %v6659_v0, %v7484_v58 }
 0x64e   :  { %5166 = vst.msk [vmem:[%s7713_s7 + $0x28] sm:$0xff] %vm47_vm0, %v7537_v60  ;;  %6045 = vmatmul.mubr.msk.f32.vlgmr.msra.gmra.mrb[60].mxu0 %vm47_vm0, %v7537_v60  ;;  %6056 = vmatmul.mubr.msk.f32.vlgmr.msra.gmra.mrb[60].mxu1 %vm47_vm0, %v7537_v60 }
 0x64f   :  { %6468 = vmatpush3.bf16.msra.mxu0 %v7019_v62  ;;  %6474 = vmatpush3.bf16.msra.mxu1 %v7023_v63 }
 0x650   :  { %6469 = vmatprep.subr.bf16.mxu0 %v6706_v44  ;;  %6475 = vmatprep.subr.bf16.mxu1 %v6706_v44 }
 0x651   :  { %6066 = vmatprep.mubr.msk.f32.mxu0 %vm6707_vm1, %v6708_v61  ;;  %6077 = vmatprep.mubr.msk.f32.mxu1 %vm6707_vm1, %v6708_v61 }
 0x652   :  { %v6661_v2 = vpop.eup %6660 }
 0x653   :  { %6471 = vmatpush3.bf16.msra.mxu0 %v7040_v4  ;;  %6477 = vmatpush3.bf16.msra.mxu1 %v7044_v5  ;;  %v3800_v3 = vmul.f32 %v6661_v2, %v3799_v52 }
 0x654   :  { %6478 = vmatprep.subr.bf16.mxu0 %v6706_v44  ;;  %6484 = vmatprep.subr.bf16.mxu1 %v6706_v44 }
 0x655   :  { %v7561_v7 = vadd.f32 %v3801_v6, %v3800_v3 }
 0x656   :  { %6067 = vmatmul.mubr.msk.f32.vlgmr.msra.gmra.mrb[62].mxu0 %vm47_vm0, %v7537_v60 }
 0x657   :  { %3805 = vrot.lane.b32.xlu1 %v7561_v7, %s6709_s17  ;;  %6078 = vmatmul.mubr.msk.f32.vlgmr.msra.gmra.mrb[62].mxu1 %vm47_vm0, %v7561_v7 }
 0x658   :  { %6480 = vmatpush3.bf16.msra.mxu0 %v7064_v10  ;;  %6486 = vmatpush3.bf16.msra.mxu1 %v7075_v13 }
 0x659   :  { %6481 = vmatprep.subr.bf16.mxu0 %v6706_v44  ;;  %6487 = vmatprep.subr.bf16.mxu1 %v6706_v44 }
 0x65a   :  { %6088 = vmatprep.mubr.msk.f32.mxu0 %vm6707_vm1, %v6708_v61  ;;  %6099 = vmatprep.mubr.msk.f32.mxu1 %vm6707_vm1, %v6708_v61 }
 0x65c   :  { %6483 = vmatpush3.bf16.msra.mxu0 %v7086_v16  ;;  %6489 = vmatpush3.bf16.msra.mxu1 %v7092_v17 }
 0x65d   :  { %6490 = vmatprep.subr.bf16.mxu0 %v6706_v44  ;;  %6496 = vmatprep.subr.bf16.mxu1 %v6706_v44 }
 0x65f   :  { %6089 = vmatmul.mubr.msk.f32.vlgmr.msra.gmra.mrb[64].mxu0 %vm47_vm0, %v7561_v7  ;;  %6100 = vmatmul.mubr.msk.f32.vlgmr.msra.gmra.mrb[64].mxu1 %vm47_vm0, %v7561_v7 }
 0x660   :  { %6492 = vmatpush3.bf16.msra.mxu0 %v6947_v49  ;;  %6498 = vmatpush3.bf16.msra.mxu1 %v6951_v50  ;;  %v3810_v50 = vld [vmem:[#allocation2 + $0x30] sm:$0xff] }
 0x661   :  { %6493 = vmatprep.subr.bf16.mxu0 %v6706_v44  ;;  %6499 = vmatprep.subr.bf16.mxu1 %v6706_v44 }
 0x662   :  { %6110 = vmatprep.mubr.msk.f32.mxu0 %vm6707_vm1, %v6708_v61  ;;  %6121 = vmatprep.mubr.msk.f32.mxu1 %vm6707_vm1, %v6708_v61 }
 0x664   :  { %6495 = vmatpush3.bf16.msra.mxu0 %v6973_v55  ;;  %6501 = vmatpush3.bf16.msra.mxu1 %v6978_v56  ;;  %v3813_v55 = vld [vmem:[#allocation2 + $0x70] sm:$0xff] }
 0x665   :  { %6502 = vmatprep.subr.bf16.mxu0 %v6706_v44  ;;  %6508 = vmatprep.subr.bf16.mxu1 %v6706_v44 }
 0x6c9   :  { %v3806_v49 = vpop.permute.xlu1 %3805 }
 0x6ca   :  { %5167 = vst.msk [vmem:[%s7713_s7 + $0x10] sm:$0xff] %vm1351_vm2, %v3806_v49 }
 0x721   :  { %v3886_v58 = vpop.f32.mrb[60].mxu0  ;;  %v3963_v8 = vpop.f32.mrb[60].mxu1 }
 0x722   :  { %v3890_v9 = vadd.f32 %v3886_v58, %v3810_v50  ;;  %v6046_v11 = vpop.f32.mrb[61].mxu0  ;;  %v6057_v12 = vpop.f32.mrb[61].mxu1  ;;  %v3967_v15 = vadd.f32 %v3963_v8, %v3813_v55  ;;  %v5192_v58 = vld [vmem:[%s7714_s5 + $0x28] sm:$0xff] }
 0x723   :  { %v5194_v11 = vld [vmem:[%s7714_s5 + $0x38] sm:$0xff] }
 0x724   :  { %v5169_v14 = vmul.f32 -1.442695, %v3890_v9  ;;  %v5171_v56 = vmul.f32 -1.442695, %v3967_v15  ;;  %v5193_v9 = vld [vmem:[%s7714_s5 + $0x30] sm:$0xff] }
 0x725   :  { %v6530_v12 = vpack.c.bf16 %v5194_v11, %v5193_v9 }
 0x726   :  { %6662 = vpow2.f32 %v5169_v14  ;;  %v4300_v14 = vld [vmem:[#allocation2 + $0x38] sm:$0xff] }
 0x727   :  { %6664 = vpow2.f32 %v5171_v56 }
 0x729   :  { %v4040_v18 = vpop.f32.mrb[62].mxu0 }
 0x72a   :  { %v4128_v21 = vpop.f32.mrb[62].mxu1  ;;  %v6068_v22 = vpop.f32.mrb[63].mxu0  ;;  %v4041_v41 = vadd.f32 %v7527_v37, %v4040_v18 }
 0x72b   :  { %v4132_v23 = vadd.f32 %v4128_v21, %v4053_v20  ;;  %v6079_v24 = vpop.f32.mrb[63].mxu1  ;;  %v4303_v22 = vld [vmem:[#allocation2 + $0x78] sm:$0xff] }
 0x72d   :  { %v5174_v26 = vmul.f32 -1.442695, %v4132_v23 }
 0x72f   :  { %6666 = vpow2.f32 %v5174_v26  ;;  %v4543_v26 = vld [vmem:[#allocation2 + $0xc0] sm:$0xff] }
 0x730   :  { %v6663_v27 = vpop.eup %6662 }
 0x731   :  { %v3894_v29 = vadd.f32 1.0, %v6663_v27  ;;  %v6665_v28 = vpop.eup %6664 }
 0x732   :  { %v4205_v30 = vpop.f32.mrb[64].mxu0  ;;  %v4282_v31 = vpop.f32.mrb[64].mxu1  ;;  %v3971_v39 = vadd.f32 1.0, %v6665_v28 }
 0x733   :  { %6668 = vrcp.f32 %v3894_v29  ;;  %v4209_v32 = vadd.f32 %v4205_v30, %v4056_v19  ;;  %v6090_v25 = vpop.f32.mrb[65].mxu0  ;;  %v6101_v34 = vpop.f32.mrb[65].mxu1  ;;  %v4283_v53 = vadd.f32 %v7533_v46, %v4282_v31 }
 0x734   :  { %v4546_v34 = vld [vmem:[#allocation2 + $0x100] sm:$0xff] }
 0x735   :  { %v5176_v36 = vmul.f32 -1.442695, %v4209_v32 }
 0x737   :  { %6670 = vpow2.f32 %v5176_v36 }
 0x739   :  { %v6667_v38 = vpop.eup %6666 }
 0x73a   :  { %v4136_v33 = vadd.f32 1.0, %v6667_v38 }
 0x73c   :  { %6672 = vrcp.f32 %v4136_v33 }
 0x73d   :  { %v6669_v43 = vpop.eup %6668  ;;  %6674 = vrcp.f32 %v3971_v39 }
 0x73e   :  { %v4044_v35 = vmul.f32 %v6669_v43, %v4041_v41 }
 0x740   :  { %v4045_v51 = vadd.f32 %v4044_v35, %v3816_v45 }
 0x741   :  { %v6671_v47 = vpop.eup %6670 }
 0x742   :  { %6676 = vtanh.f32 %v4045_v51  ;;  %v4213_v40 = vadd.f32 1.0, %v6671_v47 }
 0x744   :  { %6678 = vrcp.f32 %v4213_v40 }
 0x746   :  { %v6673_v1 = vpop.eup %6672 }
 0x747   :  { %v4286_v42 = vmul.f32 %v6673_v1, %v4283_v53  ;;  %v6675_v54 = vpop.eup %6674  ;;  %v4306_v1 = vld [vmem:[#allocation2 + $0xb8] sm:$0xff] }
 0x748   :  { %v4047_v59 = vsub.f32 1.0, %v6675_v54  ;;  %v4049_v2 = vmul.f32 %v6675_v54, %v7537_v60 }
 0x749   :  { %v4287_v48 = vadd.f32 %v4286_v42, %v4059_v57 }
 0x74b   :  { %6680 = vtanh.f32 %v4287_v48 }
 0x74c   :  { %v6677_v0 = vpop.eup %6676 }
 0x74d   :  { %v4048_v52 = vmul.f32 %v6677_v0, %v4047_v59 }
 0x74e   :  { %v6679_v6 = vpop.eup %6678 }
 0x74f   :  { %v7604_v3 = vadd.f32 %v4049_v2, %v4048_v52  ;;  %v4289_v60 = vsub.f32 1.0, %v6679_v6  ;;  %v4549_v2 = vld [vmem:[#allocation2 + $0x140] sm:$0xff] }
 0x751   :  { %5178 = vst.msk [vmem:[%s7713_s7 + $0x30] sm:$0xff] %vm47_vm0, %v7604_v3  ;;  %6111 = vmatmul.mubr.msk.f32.vlgmr.msra.gmra.mrb[66].mxu0 %vm47_vm0, %v7604_v3  ;;  %6122 = vmatmul.mubr.msk.f32.vlgmr.msra.gmra.mrb[66].mxu1 %vm47_vm0, %v7604_v3 }
 0x752   :  { %6504 = vmatpush3.bf16.msra.mxu0 %v7019_v62  ;;  %6510 = vmatpush3.bf16.msra.mxu1 %v7023_v63  ;;  %v4291_v62 = vmul.f32 %v6679_v6, %v7561_v7 }
 0x753   :  { %6505 = vmatprep.subr.bf16.mxu0 %v6706_v44  ;;  %6511 = vmatprep.subr.bf16.mxu1 %v6706_v44 }
 0x754   :  { %6132 = vmatprep.mubr.msk.f32.mxu0 %vm6707_vm1, %v6708_v61  ;;  %6143 = vmatprep.mubr.msk.f32.mxu1 %vm6707_vm1, %v6708_v61 }
 0x755   :  { %v6681_v49 = vpop.eup %6680 }
 0x756   :  { %6507 = vmatpush3.bf16.msra.mxu0 %v7040_v4  ;;  %6513 = vmatpush3.bf16.msra.mxu1 %v7044_v5  ;;  %v4290_v50 = vmul.f32 %v6681_v49, %v4289_v60  ;;  %v4789_v5 = vld [vmem:[%s7714_s5] sm:$0xff] }
 0x757   :  { %6514 = vmatprep.subr.bf16.mxu0 %v6706_v44  ;;  %6520 = vmatprep.subr.bf16.mxu1 %v6706_v44 }
 0x758   :  { %v7628_v63 = vadd.f32 %v4291_v62, %v4290_v50 }
 0x759   :  { %6133 = vmatmul.mubr.msk.f32.vlgmr.msra.gmra.mrb[68].mxu0 %vm47_vm0, %v7604_v3 }
 0x75a   :  { %4295 = vrot.lane.b32.xlu0 %v7628_v63, %s6709_s17  ;;  %6144 = vmatmul.mubr.msk.f32.vlgmr.msra.gmra.mrb[68].mxu1 %vm47_vm0, %v7628_v63 }
 0x75b   :  { %6516 = vmatpush3.bf16.msra.mxu0 %v7064_v10  ;;  %6522 = vmatpush3.bf16.msra.mxu1 %v7075_v13  ;;  %v4790_v10 = vld [vmem:[%s7714_s5 + $0x8] sm:$0xff] }
 0x75c   :  { %6517 = vmatprep.subr.bf16.mxu0 %v6706_v44  ;;  %6523 = vmatprep.subr.bf16.mxu1 %v6706_v44  ;;  %v6533_v13 = vpack.c.bf16 %v4790_v10, %v4789_v5 }
 0x75d   :  { %6154 = vmatprep.mubr.msk.f32.mxu0 %vm6707_vm1, %v6708_v61  ;;  %6165 = vmatprep.mubr.msk.f32.mxu1 %vm6707_vm1, %v6708_v61 }
 0x75f   :  { %6519 = vmatpush3.bf16.msra.mxu0 %v7086_v16  ;;  %6525 = vmatpush3.bf16.msra.mxu1 %v7092_v17  ;;  %v4791_v16 = vld [vmem:[%s7714_s5 + $0x10] sm:$0xff]  ;;  %v5191_v17 = vld [vmem:[%s7714_s5 + $0x20] sm:$0xff] }
 0x760   :  { %6532 = vmatprep.subr.bf16.mxu1 %v6706_v44  ;;  %6526 = vmatprep.subr.bf16.mxu0 %v6706_v44  ;;  %v6527_v8 = vpack.c.bf16 %v5192_v58, %v5191_v17  ;;  %v5197_v58 = vld [vmem:[%s7715_s6] ss:$0 sm:$0xff] }
 0x762   :  { %6155 = vmatmul.mubr.msk.f32.vlgmr.msra.gmra.mrb[70].mxu0 %vm47_vm0, %v7628_v63  ;;  %6166 = vmatmul.mubr.msk.f32.vlgmr.msra.gmra.mrb[70].mxu1 %vm47_vm0, %v7628_v63 }
 0x763   :  { %6187 = vmatprep.mubr.msk.f32.mxu1 %vm6707_vm1, %v6708_v61  ;;  %6176 = vmatprep.mubr.msk.f32.mxu0 %vm6707_vm1, %v6708_v61  ;;  %v4792_v61 = vld [vmem:[%s7714_s5 + $0x18] sm:$0xff] }
 0x764   :  { %6534 = vmatpush3.bf16.msra.mxu1 %v6533_v13  ;;  %v6536_v7 = vpack.c.bf16 %v4792_v61, %v4791_v16  ;;  %6528 = vmatpush3.bf16.msra.mxu0 %v6527_v8 }
 0x765   :  { %6535 = vmatprep.subr.bf16.mxu1 %v6706_v44  ;;  %6529 = vmatprep.subr.bf16.mxu0 %v6706_v44 }
 0x768   :  { %6537 = vmatpush3.bf16.msra.mxu1 %v6536_v7  ;;  %6531 = vmatpush3.bf16.msra.mxu0 %v6530_v12 }
 0x7cc   :  { %v4296_v4 = vpop.permute.xlu0 %4295 }
 0x7cd   :  { %5179 = vst.msk [vmem:[%s7713_s7 + $0x8] sm:$0xff] %vm1351_vm2, %v4296_v4 }
 0x824   :  { %v4376_v55 = vpop.f32.mrb[66].mxu0  ;;  %v4453_v15 = vpop.f32.mrb[66].mxu1 }
 0x825   :  { %v4380_v56 = vadd.f32 %v4376_v55, %v4300_v14  ;;  %v6112_v18 = vpop.f32.mrb[67].mxu0  ;;  %v6123_v20 = vpop.f32.mrb[67].mxu1  ;;  %v4457_v23 = vadd.f32 %v4453_v15, %v4303_v22 }
 0x827   :  { %v5181_v21 = vmul.f32 -1.442695, %v4380_v56  ;;  %v5183_v44 = vmul.f32 -1.442695, %v4457_v23 }
 0x829   :  { %6682 = vpow2.f32 %v5181_v21 }
 0x82a   :  { %6684 = vpow2.f32 %v5183_v44 }
 0x82c   :  { %v4530_v24 = vpop.f32.mrb[68].mxu0 }
 0x82d   :  { %v4618_v27 = vpop.f32.mrb[68].mxu1  ;;  %v6134_v29 = vpop.f32.mrb[69].mxu0  ;;  %v4531_v47 = vadd.f32 %v7527_v37, %v4530_v24 }
 0x82e   :  { %v4622_v19 = vadd.f32 %v4618_v27, %v4543_v26  ;;  %v6145_v30 = vpop.f32.mrb[69].mxu1 }
 0x830   :  { %v5186_v31 = vmul.f32 -1.442695, %v4622_v19 }
 0x832   :  { %6686 = vpow2.f32 %v5186_v31 }
 0x833   :  { %v6683_v32 = vpop.eup %6682 }
 0x834   :  { %v4384_v25 = vadd.f32 1.0, %v6683_v32  ;;  %v6685_v43 = vpop.eup %6684 }
 0x835   :  { %v4695_v36 = vpop.f32.mrb[70].mxu0  ;;  %v4772_v28 = vpop.f32.mrb[70].mxu1  ;;  %v4461_v45 = vadd.f32 1.0, %v6685_v43 }
 0x836   :  { %6688 = vrcp.f32 %v4384_v25  ;;  %v4699_v38 = vadd.f32 %v4695_v36, %v4546_v34  ;;  %v6156_v39 = vpop.f32.mrb[71].mxu0  ;;  %v6167_v33 = vpop.f32.mrb[71].mxu1  ;;  %v4773_v48 = vadd.f32 %v7533_v46, %v4772_v28 }
 0x838   :  { %v5188_v41 = vmul.f32 -1.442695, %v4699_v38 }
 0x83a   :  { %6690 = vpow2.f32 %v5188_v41 }
 0x83c   :  { %v6687_v35 = vpop.eup %6686 }
 0x83d   :  { %v4626_v51 = vadd.f32 1.0, %v6687_v35 }
 0x83f   :  { %6692 = vrcp.f32 %v4626_v51 }
 0x840   :  { %v6689_v40 = vpop.eup %6688  ;;  %6694 = vrcp.f32 %v4461_v45 }
 0x841   :  { %v4534_v53 = vmul.f32 %v6689_v40, %v4531_v47 }
 0x843   :  { %v4535_v42 = vadd.f32 %v4534_v53, %v4306_v1 }
 0x844   :  { %v6691_v54 = vpop.eup %6690 }
 0x845   :  { %6696 = vtanh.f32 %v4535_v42  ;;  %v4703_v57 = vadd.f32 1.0, %v6691_v54 }
 0x847   :  { %6698 = vrcp.f32 %v4703_v57 }
 0x849   :  { %v6693_v59 = vpop.eup %6692 }
 0x84a   :  { %v4776_v0 = vmul.f32 %v6693_v59, %v4773_v48  ;;  %v6695_v52 = vpop.eup %6694 }
 0x84b   :  { %v4537_v60 = vsub.f32 1.0, %v6695_v52  ;;  %v4539_v50 = vmul.f32 %v6695_v52, %v7604_v3 }
 0x84c   :  { %v4777_v6 = vadd.f32 %v4776_v0, %v4549_v2 }
 0x84e   :  { %6700 = vtanh.f32 %v4777_v6 }
 0x84f   :  { %v6697_v37 = vpop.eup %6696 }
 0x850   :  { %v4538_v49 = vmul.f32 %v6697_v37, %v4537_v60 }
 0x851   :  { %v6699_v4 = vpop.eup %6698 }
 0x852   :  { %v4540_v62 = vadd.f32 %v4539_v50, %v4538_v49  ;;  %v4779_v46 = vsub.f32 1.0, %v6699_v4  ;;  %v4781_v13 = vmul.f32 %v6699_v4, %v7628_v63 }
 0x854   :  { %5190 = vst.msk [vmem:[%s7713_s7 + $0x38] sm:$0xff] %vm47_vm0, %v4540_v62  ;;  %6188 = vmatmul.mubr.msk.f32.vlgmr.msra.gmra.mrb[72].mxu1 %vm47_vm0, %v4540_v62 }
 0x858   :  { %v6701_v5 = vpop.eup %6700 }
 0x859   :  { %v4780_v10 = vmul.f32 %v6701_v5, %v4779_v46 }
 0x85b   :  { %v4782_v16 = vadd.f32 %v4781_v13, %v4780_v10 }
 0x85d   :  { %4785 = vrot.lane.b32.xlu1 %v4782_v16, %s6709_s17  ;;  %6177 = vmatmul.mubr.msk.f32.vlgmr.msra.gmra.mrb[72].mxu0 %vm47_vm0, %v4782_v16 }
 0x8cf   :  { %v4786_v3 = vpop.permute.xlu1 %4785 }
 0x8d0   :  { %4788 = vst.msk [vmem:[%s7713_s7] sm:$0xff] %vm1351_vm2, %v4786_v3 }
 0x927   :  { %v4939_v61 = vpop.f32.mrb[72].mxu1 }
 0x928   :  { %v6189_v17 = vpop.f32.mrb[73].mxu1 }
 0x930   :  { %v4866_v7 = vpop.f32.mrb[72].mxu0 }
 0x931   :  { %v4940_v8 = vadd.f32 %v4939_v61, %v4866_v7  ;;  %v6178_v63 = vpop.f32.mrb[73].mxu0 }
 0x933   :  { %v4950_v9 = vadd.f32 %v5197_v58, %v4940_v8 }
 0x935   :  { %6702 = vtanh.f32 %v4950_v9 }
 0x93f   :  { %v6703_v11 = vpop.eup %6702 }
 0x940   :  { %4952 = vst.msk [vmem:[%s7716_s8] sm:$0xff] %vm47_vm0, %v6703_v11 }

</bundles_post_ra>
